<compile_context>
chip_gen: v7x
topology: tpu7x:2x2x1
jax: 0.10.0
libtpu: 0.0.40
codegen_flags: <defaults>
</compile_context>

<pallas_src>
import functools

import jax
import jax.numpy as jnp
from jax.experimental import pallas as pl
from jax.experimental.pallas import tpu as pltpu


# ---------------------------------------------------------------------------
# Fused kernel: to_common (shared weights) -> cross align -> 3x MHSA(+LN)
# ---------------------------------------------------------------------------
def _jra_kernel(num_heads, div_scale, inv_sqrt_hidden, mm_dtype,
                fp_ref, fi_ref,
                w1_ref, s1_ref, t1_ref, w2_ref, s2_ref, t2_ref,
                wqkv_ref, bqkv_ref, lng_ref, lnb_ref,
                o_ref):
    C = w2_ref.shape[0]
    Dh = C // num_heads
    mm = lambda a: a.astype(mm_dtype)     # MXU operand cast (f32 -> no-op)

    # ---- to_common (Conv1x1 + folded BN + ReLU, twice), weights shared ------
    def to_common(x_cn):                                              # [C, N]
        h = jnp.dot(mm(w1_ref[...]), mm(x_cn),
                    preferred_element_type=jnp.float32)               # [2C, N]
        h = jnp.maximum(h * s1_ref[...] + t1_ref[...], 0.0)           # bias+BN folded
        y = jnp.dot(mm(w2_ref[...]), mm(h),
                    preferred_element_type=jnp.float32)               # [C, N]
        return jnp.maximum(y * s2_ref[...] + t2_ref[...], 0.0)

    P = to_common(fp_ref[...])                                        # [C, Np]
    I = to_common(fi_ref[...])                                        # [C, Ni]

    # ---- cross alignment, channels-major, no explicit transposes ----------
    # phi[np, ni] = sum_c P[c, np] * I[c, ni]
    phi = jax.lax.dot_general(mm(P), mm(I), (((0,), (0,)), ((), ())),
                              preferred_element_type=jnp.float32) * div_scale
    phi_p = jax.nn.softmax(phi, axis=0)     # softmax over N_p (torch dim=1)
    phi_i = jax.nn.softmax(phi, axis=-1)    # softmax over N_i
    I_enh = jnp.dot(mm(P), mm(phi_p),
                    preferred_element_type=jnp.float32)               # [C, Ni]
    # P_enh[c, np] = sum_ni I[c, ni] * phi_i[np, ni]
    P_enh = jax.lax.dot_general(mm(I), mm(phi_i), (((1,), (1,)), ((), ())),
                                preferred_element_type=jnp.float32)   # [C, Np]

    # ---- Inherent_relation: MHSA (no out-proj) + residual + LayerNorm ------
    def attention(x_cs, idx):
        # x_cs: [C, S] channels-major; head slices are sublane-aligned 8-row
        # groups (Dh = 8), so slicing & merging heads costs no lane shuffles.
        qkv = jnp.dot(mm(wqkv_ref[idx]), mm(x_cs),
                      preferred_element_type=jnp.float32) + bqkv_ref[idx]  # [3C, S]
        head_outs = []
        for hd in range(num_heads):                                   # static unroll
            lo = hd * Dh
            qh = qkv[lo:lo + Dh, :]                                   # [Dh, S]
            kh = qkv[C + lo:C + lo + Dh, :]                           # [Dh, S]
            vh = qkv[2 * C + lo:2 * C + lo + Dh, :]                   # [Dh, S]
            # scores[s, t] = sum_d qh[d, s] * kh[d, t]
            sc = jax.lax.dot_general(mm(qh), mm(kh), (((0,), (0,)), ((), ())),
                                     preferred_element_type=jnp.float32)
            aw = jax.nn.softmax(sc * inv_sqrt_hidden, axis=-1)        # [S, S]
            # out[d, s] = sum_t vh[d, t] * aw[s, t]
            head_outs.append(
                jax.lax.dot_general(mm(vh), mm(aw), (((1,), (1,)), ((), ())),
                                    preferred_element_type=jnp.float32))
        out = jnp.concatenate(head_outs, axis=0)                      # [C, S]
        r = out + x_cs                                                # residual
        mean = jnp.mean(r, axis=0, keepdims=True)
        var = jnp.mean(jnp.square(r - mean), axis=0, keepdims=True)
        rn = (r - mean) * jax.lax.rsqrt(var + 1e-5)
        return rn * lng_ref[idx] + lnb_ref[idx]                       # [C, S]

    I_ = attention(I_enh, 0)                                          # i_atten
    P_ = attention(P_enh, 1)                                          # p_atten
    joint = jnp.concatenate([P_, I_], axis=-1)                        # [C, Np+Ni]
    F_j = attention(joint, 2)                                         # joint_atten
    o_ref[...] = F_j.T.astype(o_ref.dtype)                            # [Np+Ni, C]


def joint_region_alignment(F_i, F_p, kparams, emb_dim, num_heads,
                           mm_dtype=jnp.float32):
    """F_i: [B, C, H, W], F_p: [B, C, N_p] -> [B, N_p + H*W, C]"""
    B, C, Hh, Ww = F_i.shape
    Ni = Hh * Ww
    Np = F_p.shape[-1]
    S = Np + Ni
    C2 = 2 * C
    Fi = F_i.reshape(B, C, Ni)
    div_scale = emb_dim ** (-0.5)
    inv_sqrt_hidden = 1.0 / (emb_dim ** 0.5)   # torch divides by hidden_size**0.5

    kernel = functools.partial(_jra_kernel, num_heads, div_scale,
                               inv_sqrt_hidden, mm_dtype)

    def full(shape):
        return pl.BlockSpec(shape, lambda b, _n=len(shape): (0,) * _n)

    return pl.pallas_call(
        kernel,
        out_shape=jax.ShapeDtypeStruct((B, S, C), F_i.dtype),
        grid=(B,),
        in_specs=[
            pl.BlockSpec((None, C, Np), lambda b: (b, 0, 0)),         # F_p
            pl.BlockSpec((None, C, Ni), lambda b: (b, 0, 0)),         # F_i
            full((C2, C)), full((C2, 1)), full((C2, 1)),              # conv1+BN1
            full((C, C2)), full((C, 1)), full((C, 1)),                # conv2+BN2
            full((3, 3 * C, C)), full((3, 3 * C, 1)),                 # qkv x3 modules
            full((3, C, 1)), full((3, C, 1)),                         # LN gamma/beta
        ],
        out_specs=pl.BlockSpec((None, S, C), lambda b: (b, 0, 0)),
        compiler_params=pltpu.CompilerParams(
            dimension_semantics=("parallel",)),
    )(F_p, Fi,
      kparams["w1"], kparams["s1"], kparams["t1"],
      kparams["w2"], kparams["s2"], kparams["t2"],
      kparams["wqkv"], kparams["bqkv"], kparams["ln_g"], kparams["ln_b"])


# ---------------------------------------------------------------------------
# One-time parameter packing (hoisted out of the per-call graph)
# ---------------------------------------------------------------------------
def prepare_params(params, emb_dim):
    eps = 1e-5
    tc = params["to_common"]
    col = lambda v: v.reshape(-1, 1).astype(jnp.float32)
    s1 = tc["bn1_gamma"] / jnp.sqrt(tc["bn1_var"] + eps)
    t1 = tc["bn1_beta"] - tc["bn1_mean"] * s1 + tc["b1"] * s1   # conv bias folded
    s2 = tc["bn2_gamma"] / jnp.sqrt(tc["bn2_var"] + eps)
    t2 = tc["bn2_beta"] - tc["bn2_mean"] * s2 + tc["b2"] * s2

    def pack_attn(p):
        wqkv = jnp.concatenate([p["wq"], p["wk"], p["wv"]], axis=0)   # [3C, C]
        bqkv = jnp.concatenate([p["bq"], p["bk"], p["bv"]]).reshape(-1, 1)
        return wqkv, bqkv, col(p["ln_gamma"]), col(p["ln_beta"])

    mods = [params["i_atten"], params["p_atten"], params["joint_atten"]]
    packed = [pack_attn(m) for m in mods]
    return dict(
        w1=tc["w1"].astype(jnp.float32), s1=col(s1), t1=col(t1),
        w2=tc["w2"].astype(jnp.float32), s2=col(s2), t2=col(t2),
        wqkv=jnp.stack([p[0] for p in packed]).astype(jnp.float32),
        bqkv=jnp.stack([p[1] for p in packed]).astype(jnp.float32),
        ln_g=jnp.stack([p[2] for p in packed]).astype(jnp.float32),
        ln_b=jnp.stack([p[3] for p in packed]).astype(jnp.float32),
    )


# ---------------------------------------------------------------------------
# Deterministic parameter init (shapes per module __init__)
# ---------------------------------------------------------------------------
def init_params(key, emb_dim):
    C = emb_dim

    def lin(k, out_d, in_d):
        bound = 1.0 / (in_d ** 0.5)
        kw, kb = jax.random.split(k)
        W = jax.random.uniform(kw, (out_d, in_d), jnp.float32, -bound, bound)
        b = jax.random.uniform(kb, (out_d,), jnp.float32, -bound, bound)
        return W, b

    keys = jax.random.split(key, 5)
    w1, b1 = lin(keys[0], 2 * C, C)      # Conv1d(C, 2C, 1) weight squeezed [2C, C]
    w2, b2 = lin(keys[1], C, 2 * C)      # Conv1d(2C, C, 1) weight squeezed [C, 2C]
    tc = dict(
        w1=w1, b1=b1,
        bn1_gamma=jnp.ones(2 * C), bn1_beta=jnp.zeros(2 * C),
        bn1_mean=jnp.zeros(2 * C), bn1_var=jnp.ones(2 * C),
        w2=w2, b2=b2,
        bn2_gamma=jnp.ones(C), bn2_beta=jnp.zeros(C),
        bn2_mean=jnp.zeros(C), bn2_var=jnp.ones(C),
    )

    def attn_params(k):
        k1, k2, k3 = jax.random.split(k, 3)
        wq, bq = lin(k1, C, C)
        wk, bk = lin(k2, C, C)
        wv, bv = lin(k3, C, C)
        return dict(wq=wq, bq=bq, wk=wk, bk=bk, wv=wv, bv=bv,
                    ln_gamma=jnp.ones(C), ln_beta=jnp.zeros(C))

    return dict(to_common=tc,
                i_atten=attn_params(keys[2]),
                p_atten=attn_params(keys[3]),
                joint_atten=attn_params(keys[4]))


# ---------------------------------------------------------------------------
# Pure-JAX reference (mirrors the PyTorch source) for correctness checking
# ---------------------------------------------------------------------------
def reference_forward(F_i, F_p, params, emb_dim, num_heads):
    B, C, Hh, Ww = F_i.shape
    Fi = F_i.reshape(B, C, Hh * Ww)
    eps = 1e-5
    tc = params["to_common"]

    def to_common_ref(x):
        h = jnp.einsum('oc,bcn->bon', tc["w1"], x) + tc["b1"][None, :, None]
        s1 = tc["bn1_gamma"] / jnp.sqrt(tc["bn1_var"] + eps)
        h = (h - tc["bn1_mean"][None, :, None]) * s1[None, :, None] \
            + tc["bn1_beta"][None, :, None]
        h = jnp.maximum(h, 0.0)
        y = jnp.einsum('oc,bcn->bon', tc["w2"], h) + tc["b2"][None, :, None]
        s2 = tc["bn2_gamma"] / jnp.sqrt(tc["bn2_var"] + eps)
        y = (y - tc["bn2_mean"][None, :, None]) * s2[None, :, None] \
            + tc["bn2_beta"][None, :, None]
        return jnp.maximum(y, 0.0)

    I = to_common_ref(Fi)
    P = to_common_ref(F_p)
    phi = jnp.einsum('bcp,bci->bpi', P, I) * (emb_dim ** (-0.5))
    phi_p = jax.nn.softmax(phi, axis=1)
    phi_i = jax.nn.softmax(phi, axis=-1)
    I_enh = jnp.einsum('bcp,bpi->bci', P, phi_p)
    P_enh = jnp.einsum('bci,bpi->bcp', I, phi_i)

    def attn_ref(x, p):
        Bq, S, Cq = x.shape
        H = num_heads
        Dh = Cq // H
        q = (x @ p["wq"].T + p["bq"]).reshape(Bq, S, H, Dh).transpose(0, 2, 1, 3)
        k = (x @ p["wk"].T + p["bk"]).reshape(Bq, S, H, Dh).transpose(0, 2, 1, 3)
        v = (x @ p["wv"].T + p["bv"]).reshape(Bq, S, H, Dh).transpose(0, 2, 1, 3)
        sc = jnp.einsum('bhsd,bhtd->bhst', q, k) / (emb_dim ** 0.5)
        a = jax.nn.softmax(sc, axis=-1)
        o = jnp.einsum('bhst,bhtd->bhsd', a, v).transpose(0, 2, 1, 3).reshape(Bq, S, Cq)
        r = o + x
        mean = r.mean(-1, keepdims=True)
        var = ((r - mean) ** 2).mean(-1, keepdims=True)
        return (r - mean) / jnp.sqrt(var + 1e-5) * p["ln_gamma"] + p["ln_beta"]

    I_ = attn_ref(jnp.transpose(I_enh, (0, 2, 1)), params["i_atten"])
    P_ = attn_ref(jnp.transpose(P_enh, (0, 2, 1)), params["p_atten"])
    joint = jnp.concatenate([P_, I_], axis=1)
    return attn_ref(joint, params["joint_atten"])


if __name__ == "__main__":
    emb_dim, num_heads = 32, 4
    B, Hh, Ww, Np = 2, 4, 4, 8          # N_i = 16, joint seq = 24
    key = jax.random.PRNGKey(0)
    k1, k2, k3 = jax.random.split(key, 3)
    F_i = jax.random.normal(k1, (B, emb_dim, Hh, Ww), jnp.float32)
    F_p = jax.random.normal(k2, (B, emb_dim, Np), jnp.float32)
    params = init_params(k3, emb_dim)
    kparams = prepare_params(params, emb_dim)

    out = joint_region_alignment(F_i, F_p, kparams, emb_dim, num_heads)
    out = jax.block_until_ready(out)

    assert out.shape == (B, Np + Hh * Ww, emb_dim), out.shape
    assert bool(jnp.all(jnp.isfinite(out)))

    ref = reference_forward(F_i, F_p, params, emb_dim, num_heads)
    max_err = float(jnp.max(jnp.abs(out - ref)))
    assert max_err < 5e-2, f"mismatch vs reference: {max_err}"
    print("KERNEL_OK")
</pallas_src>

<mosaic_0001>
module attributes {stable_mosaic.version = 11 : i64} {
  func.func @_jra_kernel(%arg0: i32, %arg1: memref<1x32x8xf32, #tpu.memory_space<vmem>>, %arg2: memref<1x32x16xf32, #tpu.memory_space<vmem>>, %arg3: memref<64x32xf32, #tpu.memory_space<vmem>>, %arg4: memref<64x1xf32, #tpu.memory_space<vmem>>, %arg5: memref<64x1xf32, #tpu.memory_space<vmem>>, %arg6: memref<32x64xf32, #tpu.memory_space<vmem>>, %arg7: memref<32x1xf32, #tpu.memory_space<vmem>>, %arg8: memref<32x1xf32, #tpu.memory_space<vmem>>, %arg9: memref<3x96x32xf32, #tpu.memory_space<vmem>>, %arg10: memref<3x96x1xf32, #tpu.memory_space<vmem>>, %arg11: memref<3x32x1xf32, #tpu.memory_space<vmem>>, %arg12: memref<3x32x1xf32, #tpu.memory_space<vmem>>, %arg13: memref<1x24x32xf32, #tpu.memory_space<vmem>>) attributes {dimension_semantics = [#tpu.dimension_semantics<parallel>], iteration_bounds = array<i64: 2>, scalar_prefetch = 0 : i64, scratch_operands = 0 : i64, tpu.core_type = #tpu.core_type<tc>, window_params = [{transform_indices = @transform_0, window_bounds = array<i64: 1, 32, 8>}, {transform_indices = @transform_1, window_bounds = array<i64: 1, 32, 16>}, {pipeline_mode = #tpu.pipeline_mode<synchronous>, transform_indices = @transform_2, window_bounds = array<i64: 64, 32>}, {pipeline_mode = #tpu.pipeline_mode<synchronous>, transform_indices = @transform_3, window_bounds = array<i64: 64, 1>}, {pipeline_mode = #tpu.pipeline_mode<synchronous>, transform_indices = @transform_4, window_bounds = array<i64: 64, 1>}, {pipeline_mode = #tpu.pipeline_mode<synchronous>, transform_indices = @transform_5, window_bounds = array<i64: 32, 64>}, {pipeline_mode = #tpu.pipeline_mode<synchronous>, transform_indices = @transform_6, window_bounds = array<i64: 32, 1>}, {pipeline_mode = #tpu.pipeline_mode<synchronous>, transform_indices = @transform_7, window_bounds = array<i64: 32, 1>}, {pipeline_mode = #tpu.pipeline_mode<synchronous>, transform_indices = @transform_8, window_bounds = array<i64: 3, 96, 32>}, {pipeline_mode = #tpu.pipeline_mode<synchronous>, transform_indices = @transform_9, window_bounds = array<i64: 3, 96, 1>}, {pipeline_mode = #tpu.pipeline_mode<synchronous>, transform_indices = @transform_10, window_bounds = array<i64: 3, 32, 1>}, {pipeline_mode = #tpu.pipeline_mode<synchronous>, transform_indices = @transform_11, window_bounds = array<i64: 3, 32, 1>}, {transform_indices = @transform_12, window_bounds = array<i64: 1, 24, 32>}]} {
    %c0 = arith.constant 0 : index
    %c0_0 = arith.constant 0 : index
    %c0_1 = arith.constant 0 : index
    %0 = vector.load %arg1[%c0, %c0_0, %c0_1] : memref<1x32x8xf32, #tpu.memory_space<vmem>>, vector<1x32x8xf32>
    %1 = vector.shape_cast %0 : vector<1x32x8xf32> to vector<32x8xf32>
    %c0_2 = arith.constant 0 : index
    %c0_3 = arith.constant 0 : index
    %2 = vector.load %arg3[%c0_2, %c0_3] : memref<64x32xf32, #tpu.memory_space<vmem>>, vector<64x32xf32>
    %cst = arith.constant dense<0.000000e+00> : vector<64x8xf32>
    %3 = tpu.matmul %2, %1, %cst {dimension_numbers = #tpu.dot_dimension_numbers<[1], [0], [0], [1], [0, 0, 1, 1], [], []>} : vector<64x32xf32>, vector<32x8xf32>, vector<64x8xf32> -> vector<64x8xf32>
    %c0_4 = arith.constant 0 : index
    %c0_5 = arith.constant 0 : index
    %4 = vector.load %arg4[%c0_4, %c0_5] : memref<64x1xf32, #tpu.memory_space<vmem>>, vector<64x1xf32>
    %5 = vector.broadcast %4 : vector<64x1xf32> to vector<64x8xf32>
    %6 = arith.mulf %3, %5 : vector<64x8xf32>
    %c0_6 = arith.constant 0 : index
    %c0_7 = arith.constant 0 : index
    %7 = vector.load %arg5[%c0_6, %c0_7] : memref<64x1xf32, #tpu.memory_space<vmem>>, vector<64x1xf32>
    %8 = vector.broadcast %7 : vector<64x1xf32> to vector<64x8xf32>
    %9 = arith.addf %6, %8 : vector<64x8xf32>
    %cst_8 = arith.constant 0.000000e+00 : f32
    %10 = vector.broadcast %cst_8 : f32 to vector<64x8xf32>
    %11 = arith.maximumf %9, %10 : vector<64x8xf32>
    %c0_9 = arith.constant 0 : index
    %c0_10 = arith.constant 0 : index
    %12 = vector.load %arg6[%c0_9, %c0_10] : memref<32x64xf32, #tpu.memory_space<vmem>>, vector<32x64xf32>
    %cst_11 = arith.constant dense<0.000000e+00> : vector<32x8xf32>
    %13 = tpu.matmul %12, %11, %cst_11 {dimension_numbers = #tpu.dot_dimension_numbers<[1], [0], [0], [1], [0, 0, 1, 1], [], []>} : vector<32x64xf32>, vector<64x8xf32>, vector<32x8xf32> -> vector<32x8xf32>
    %c0_12 = arith.constant 0 : index
    %c0_13 = arith.constant 0 : index
    %14 = vector.load %arg7[%c0_12, %c0_13] : memref<32x1xf32, #tpu.memory_space<vmem>>, vector<32x1xf32>
    %15 = vector.broadcast %14 : vector<32x1xf32> to vector<32x8xf32>
    %16 = arith.mulf %13, %15 : vector<32x8xf32>
    %c0_14 = arith.constant 0 : index
    %c0_15 = arith.constant 0 : index
    %17 = vector.load %arg8[%c0_14, %c0_15] : memref<32x1xf32, #tpu.memory_space<vmem>>, vector<32x1xf32>
    %18 = vector.broadcast %17 : vector<32x1xf32> to vector<32x8xf32>
    %19 = arith.addf %16, %18 : vector<32x8xf32>
    %cst_16 = arith.constant 0.000000e+00 : f32
    %20 = vector.broadcast %cst_16 : f32 to vector<32x8xf32>
    %21 = arith.maximumf %19, %20 : vector<32x8xf32>
    %c0_17 = arith.constant 0 : index
    %c0_18 = arith.constant 0 : index
    %c0_19 = arith.constant 0 : index
    %22 = vector.load %arg2[%c0_17, %c0_18, %c0_19] : memref<1x32x16xf32, #tpu.memory_space<vmem>>, vector<1x32x16xf32>
    %23 = vector.shape_cast %22 : vector<1x32x16xf32> to vector<32x16xf32>
    %c0_20 = arith.constant 0 : index
    %c0_21 = arith.constant 0 : index
    %24 = vector.load %arg3[%c0_20, %c0_21] : memref<64x32xf32, #tpu.memory_space<vmem>>, vector<64x32xf32>
    %cst_22 = arith.constant dense<0.000000e+00> : vector<64x16xf32>
    %25 = tpu.matmul %24, %23, %cst_22 {dimension_numbers = #tpu.dot_dimension_numbers<[1], [0], [0], [1], [0, 0, 1, 1], [], []>} : vector<64x32xf32>, vector<32x16xf32>, vector<64x16xf32> -> vector<64x16xf32>
    %c0_23 = arith.constant 0 : index
    %c0_24 = arith.constant 0 : index
    %26 = vector.load %arg4[%c0_23, %c0_24] : memref<64x1xf32, #tpu.memory_space<vmem>>, vector<64x1xf32>
    %27 = vector.broadcast %26 : vector<64x1xf32> to vector<64x16xf32>
    %28 = arith.mulf %25, %27 : vector<64x16xf32>
    %c0_25 = arith.constant 0 : index
    %c0_26 = arith.constant 0 : index
    %29 = vector.load %arg5[%c0_25, %c0_26] : memref<64x1xf32, #tpu.memory_space<vmem>>, vector<64x1xf32>
    %30 = vector.broadcast %29 : vector<64x1xf32> to vector<64x16xf32>
    %31 = arith.addf %28, %30 : vector<64x16xf32>
    %cst_27 = arith.constant 0.000000e+00 : f32
    %32 = vector.broadcast %cst_27 : f32 to vector<64x16xf32>
    %33 = arith.maximumf %31, %32 : vector<64x16xf32>
    %c0_28 = arith.constant 0 : index
    %c0_29 = arith.constant 0 : index
    %34 = vector.load %arg6[%c0_28, %c0_29] : memref<32x64xf32, #tpu.memory_space<vmem>>, vector<32x64xf32>
    %cst_30 = arith.constant dense<0.000000e+00> : vector<32x16xf32>
    %35 = tpu.matmul %34, %33, %cst_30 {dimension_numbers = #tpu.dot_dimension_numbers<[1], [0], [0], [1], [0, 0, 1, 1], [], []>} : vector<32x64xf32>, vector<64x16xf32>, vector<32x16xf32> -> vector<32x16xf32>
    %c0_31 = arith.constant 0 : index
    %c0_32 = arith.constant 0 : index
    %36 = vector.load %arg7[%c0_31, %c0_32] : memref<32x1xf32, #tpu.memory_space<vmem>>, vector<32x1xf32>
    %37 = vector.broadcast %36 : vector<32x1xf32> to vector<32x16xf32>
    %38 = arith.mulf %35, %37 : vector<32x16xf32>
    %c0_33 = arith.constant 0 : index
    %c0_34 = arith.constant 0 : index
    %39 = vector.load %arg8[%c0_33, %c0_34] : memref<32x1xf32, #tpu.memory_space<vmem>>, vector<32x1xf32>
    %40 = vector.broadcast %39 : vector<32x1xf32> to vector<32x16xf32>
    %41 = arith.addf %38, %40 : vector<32x16xf32>
    %cst_35 = arith.constant 0.000000e+00 : f32
    %42 = vector.broadcast %cst_35 : f32 to vector<32x16xf32>
    %43 = arith.maximumf %41, %42 : vector<32x16xf32>
    %cst_36 = arith.constant dense<0.000000e+00> : vector<8x16xf32>
    %44 = tpu.matmul %21, %43, %cst_36 {dimension_numbers = #tpu.dot_dimension_numbers<[0], [0], [1], [1], [0, 1, 1, 1], [], []>} : vector<32x8xf32>, vector<32x16xf32>, vector<8x16xf32> -> vector<8x16xf32>
    %cst_37 = arith.constant 0.176776692 : f32
    %45 = vector.broadcast %cst_37 : f32 to vector<8x16xf32>
    %46 = arith.mulf %44, %45 : vector<8x16xf32>
    %cst_38 = arith.constant dense<0xFF800000> : vector<16xf32>
    %47 = vector.multi_reduction <maximumf>, %46, %cst_38 [0] : vector<8x16xf32> to vector<16xf32>
    %cst_39 = arith.constant 0xFF800000 : f32
    %48 = vector.broadcast %cst_39 : f32 to vector<16xf32>
    %49 = arith.maximumf %48, %47 : vector<16xf32>
    %50 = vector.shape_cast %49 : vector<16xf32> to vector<1x16xf32>
    %51 = vector.broadcast %50 : vector<1x16xf32> to vector<8x16xf32>
    %52 = arith.subf %46, %51 : vector<8x16xf32>
    %53 = math.exp %52 : vector<8x16xf32>
    %cst_40 = arith.constant dense<0.000000e+00> : vector<16xf32>
    %54 = vector.multi_reduction <add>, %53, %cst_40 [0] : vector<8x16xf32> to vector<16xf32>
    %55 = vector.shape_cast %54 : vector<16xf32> to vector<1x16xf32>
    %56 = vector.broadcast %55 : vector<1x16xf32> to vector<8x16xf32>
    %57 = arith.divf %53, %56 : vector<8x16xf32>
    %cst_41 = arith.constant dense<0xFF800000> : vector<8xf32>
    %58 = vector.multi_reduction <maximumf>, %46, %cst_41 [1] : vector<8x16xf32> to vector<8xf32>
    %cst_42 = arith.constant 0xFF800000 : f32
    %59 = vector.broadcast %cst_42 : f32 to vector<8xf32>
    %60 = arith.maximumf %59, %58 : vector<8xf32>
    %61 = vector.shape_cast %60 : vector<8xf32> to vector<8x1xf32>
    %62 = vector.broadcast %61 : vector<8x1xf32> to vector<8x16xf32>
    %63 = arith.subf %46, %62 : vector<8x16xf32>
    %64 = math.exp %63 : vector<8x16xf32>
    %cst_43 = arith.constant dense<0.000000e+00> : vector<8xf32>
    %65 = vector.multi_reduction <add>, %64, %cst_43 [1] : vector<8x16xf32> to vector<8xf32>
    %66 = vector.shape_cast %65 : vector<8xf32> to vector<8x1xf32>
    %67 = vector.broadcast %66 : vector<8x1xf32> to vector<8x16xf32>
    %68 = arith.divf %64, %67 : vector<8x16xf32>
    %cst_44 = arith.constant dense<0.000000e+00> : vector<32x16xf32>
    %69 = tpu.matmul %21, %57, %cst_44 {dimension_numbers = #tpu.dot_dimension_numbers<[1], [0], [0], [1], [0, 0, 1, 1], [], []>} : vector<32x8xf32>, vector<8x16xf32>, vector<32x16xf32> -> vector<32x16xf32>
    %cst_45 = arith.constant dense<0.000000e+00> : vector<32x8xf32>
    %70 = tpu.matmul %43, %68, %cst_45 {dimension_numbers = #tpu.dot_dimension_numbers<[1], [1], [0], [0], [0, 0, 1, 0], [], []>} : vector<32x16xf32>, vector<8x16xf32>, vector<32x8xf32> -> vector<32x8xf32>
    %c0_46 = arith.constant 0 : index
    %c0_47 = arith.constant 0 : index
    %c0_48 = arith.constant 0 : index
    %71 = vector.load %arg9[%c0_46, %c0_47, %c0_48] : memref<3x96x32xf32, #tpu.memory_space<vmem>>, vector<1x96x32xf32>
    %72 = vector.shape_cast %71 : vector<1x96x32xf32> to vector<96x32xf32>
    %cst_49 = arith.constant dense<0.000000e+00> : vector<96x16xf32>
    %73 = tpu.matmul %72, %69, %cst_49 {dimension_numbers = #tpu.dot_dimension_numbers<[1], [0], [0], [1], [0, 0, 1, 1], [], []>} : vector<96x32xf32>, vector<32x16xf32>, vector<96x16xf32> -> vector<96x16xf32>
    %c0_50 = arith.constant 0 : index
    %c0_51 = arith.constant 0 : index
    %c0_52 = arith.constant 0 : index
    %74 = vector.load %arg10[%c0_50, %c0_51, %c0_52] : memref<3x96x1xf32, #tpu.memory_space<vmem>>, vector<1x96x1xf32>
    %75 = vector.shape_cast %74 : vector<1x96x1xf32> to vector<96x1xf32>
    %76 = vector.broadcast %75 : vector<96x1xf32> to vector<96x16xf32>
    %77 = arith.addf %73, %76 : vector<96x16xf32>
    %78 = vector.extract_strided_slice %77 {offsets = [0, 0], sizes = [8, 16], strides = [1, 1]} : vector<96x16xf32> to vector<8x16xf32>
    %79 = vector.extract_strided_slice %77 {offsets = [32, 0], sizes = [8, 16], strides = [1, 1]} : vector<96x16xf32> to vector<8x16xf32>
    %80 = vector.extract_strided_slice %77 {offsets = [64, 0], sizes = [8, 16], strides = [1, 1]} : vector<96x16xf32> to vector<8x16xf32>
    %cst_53 = arith.constant dense<0.000000e+00> : vector<16x16xf32>
    %81 = tpu.matmul %78, %79, %cst_53 {dimension_numbers = #tpu.dot_dimension_numbers<[0], [0], [1], [1], [0, 1, 1, 1], [], []>} : vector<8x16xf32>, vector<8x16xf32>, vector<16x16xf32> -> vector<16x16xf32>
    %cst_54 = arith.constant 0.176776692 : f32
    %82 = vector.broadcast %cst_54 : f32 to vector<16x16xf32>
    %83 = arith.mulf %81, %82 : vector<16x16xf32>
    %cst_55 = arith.constant dense<0xFF800000> : vector<16xf32>
    %84 = vector.multi_reduction <maximumf>, %83, %cst_55 [1] : vector<16x16xf32> to vector<16xf32>
    %cst_56 = arith.constant 0xFF800000 : f32
    %85 = vector.broadcast %cst_56 : f32 to vector<16xf32>
    %86 = arith.maximumf %85, %84 : vector<16xf32>
    %87 = vector.shape_cast %86 : vector<16xf32> to vector<16x1xf32>
    %88 = vector.broadcast %87 : vector<16x1xf32> to vector<16x16xf32>
    %89 = arith.subf %83, %88 : vector<16x16xf32>
    %90 = math.exp %89 : vector<16x16xf32>
    %cst_57 = arith.constant dense<0.000000e+00> : vector<16xf32>
    %91 = vector.multi_reduction <add>, %90, %cst_57 [1] : vector<16x16xf32> to vector<16xf32>
    %92 = vector.shape_cast %91 : vector<16xf32> to vector<16x1xf32>
    %93 = vector.broadcast %92 : vector<16x1xf32> to vector<16x16xf32>
    %94 = arith.divf %90, %93 : vector<16x16xf32>
    %cst_58 = arith.constant dense<0.000000e+00> : vector<8x16xf32>
    %95 = tpu.matmul %80, %94, %cst_58 {dimension_numbers = #tpu.dot_dimension_numbers<[1], [1], [0], [0], [0, 0, 1, 0], [], []>} : vector<8x16xf32>, vector<16x16xf32>, vector<8x16xf32> -> vector<8x16xf32>
    %96 = vector.extract_strided_slice %77 {offsets = [8, 0], sizes = [8, 16], strides = [1, 1]} : vector<96x16xf32> to vector<8x16xf32>
    %97 = vector.extract_strided_slice %77 {offsets = [40, 0], sizes = [8, 16], strides = [1, 1]} : vector<96x16xf32> to vector<8x16xf32>
    %98 = vector.extract_strided_slice %77 {offsets = [72, 0], sizes = [8, 16], strides = [1, 1]} : vector<96x16xf32> to vector<8x16xf32>
    %cst_59 = arith.constant dense<0.000000e+00> : vector<16x16xf32>
    %99 = tpu.matmul %96, %97, %cst_59 {dimension_numbers = #tpu.dot_dimension_numbers<[0], [0], [1], [1], [0, 1, 1, 1], [], []>} : vector<8x16xf32>, vector<8x16xf32>, vector<16x16xf32> -> vector<16x16xf32>
    %cst_60 = arith.constant 0.176776692 : f32
    %100 = vector.broadcast %cst_60 : f32 to vector<16x16xf32>
    %101 = arith.mulf %99, %100 : vector<16x16xf32>
    %cst_61 = arith.constant dense<0xFF800000> : vector<16xf32>
    %102 = vector.multi_reduction <maximumf>, %101, %cst_61 [1] : vector<16x16xf32> to vector<16xf32>
    %cst_62 = arith.constant 0xFF800000 : f32
    %103 = vector.broadcast %cst_62 : f32 to vector<16xf32>
    %104 = arith.maximumf %103, %102 : vector<16xf32>
    %105 = vector.shape_cast %104 : vector<16xf32> to vector<16x1xf32>
    %106 = vector.broadcast %105 : vector<16x1xf32> to vector<16x16xf32>
    %107 = arith.subf %101, %106 : vector<16x16xf32>
    %108 = math.exp %107 : vector<16x16xf32>
    %cst_63 = arith.constant dense<0.000000e+00> : vector<16xf32>
    %109 = vector.multi_reduction <add>, %108, %cst_63 [1] : vector<16x16xf32> to vector<16xf32>
    %110 = vector.shape_cast %109 : vector<16xf32> to vector<16x1xf32>
    %111 = vector.broadcast %110 : vector<16x1xf32> to vector<16x16xf32>
    %112 = arith.divf %108, %111 : vector<16x16xf32>
    %cst_64 = arith.constant dense<0.000000e+00> : vector<8x16xf32>
    %113 = tpu.matmul %98, %112, %cst_64 {dimension_numbers = #tpu.dot_dimension_numbers<[1], [1], [0], [0], [0, 0, 1, 0], [], []>} : vector<8x16xf32>, vector<16x16xf32>, vector<8x16xf32> -> vector<8x16xf32>
    %114 = vector.extract_strided_slice %77 {offsets = [16, 0], sizes = [8, 16], strides = [1, 1]} : vector<96x16xf32> to vector<8x16xf32>
    %115 = vector.extract_strided_slice %77 {offsets = [48, 0], sizes = [8, 16], strides = [1, 1]} : vector<96x16xf32> to vector<8x16xf32>
    %116 = vector.extract_strided_slice %77 {offsets = [80, 0], sizes = [8, 16], strides = [1, 1]} : vector<96x16xf32> to vector<8x16xf32>
    %cst_65 = arith.constant dense<0.000000e+00> : vector<16x16xf32>
    %117 = tpu.matmul %114, %115, %cst_65 {dimension_numbers = #tpu.dot_dimension_numbers<[0], [0], [1], [1], [0, 1, 1, 1], [], []>} : vector<8x16xf32>, vector<8x16xf32>, vector<16x16xf32> -> vector<16x16xf32>
    %cst_66 = arith.constant 0.176776692 : f32
    %118 = vector.broadcast %cst_66 : f32 to vector<16x16xf32>
    %119 = arith.mulf %117, %118 : vector<16x16xf32>
    %cst_67 = arith.constant dense<0xFF800000> : vector<16xf32>
    %120 = vector.multi_reduction <maximumf>, %119, %cst_67 [1] : vector<16x16xf32> to vector<16xf32>
    %cst_68 = arith.constant 0xFF800000 : f32
    %121 = vector.broadcast %cst_68 : f32 to vector<16xf32>
    %122 = arith.maximumf %121, %120 : vector<16xf32>
    %123 = vector.shape_cast %122 : vector<16xf32> to vector<16x1xf32>
    %124 = vector.broadcast %123 : vector<16x1xf32> to vector<16x16xf32>
    %125 = arith.subf %119, %124 : vector<16x16xf32>
    %126 = math.exp %125 : vector<16x16xf32>
    %cst_69 = arith.constant dense<0.000000e+00> : vector<16xf32>
    %127 = vector.multi_reduction <add>, %126, %cst_69 [1] : vector<16x16xf32> to vector<16xf32>
    %128 = vector.shape_cast %127 : vector<16xf32> to vector<16x1xf32>
    %129 = vector.broadcast %128 : vector<16x1xf32> to vector<16x16xf32>
    %130 = arith.divf %126, %129 : vector<16x16xf32>
    %cst_70 = arith.constant dense<0.000000e+00> : vector<8x16xf32>
    %131 = tpu.matmul %116, %130, %cst_70 {dimension_numbers = #tpu.dot_dimension_numbers<[1], [1], [0], [0], [0, 0, 1, 0], [], []>} : vector<8x16xf32>, vector<16x16xf32>, vector<8x16xf32> -> vector<8x16xf32>
    %132 = vector.extract_strided_slice %77 {offsets = [24, 0], sizes = [8, 16], strides = [1, 1]} : vector<96x16xf32> to vector<8x16xf32>
    %133 = vector.extract_strided_slice %77 {offsets = [56, 0], sizes = [8, 16], strides = [1, 1]} : vector<96x16xf32> to vector<8x16xf32>
    %134 = vector.extract_strided_slice %77 {offsets = [88, 0], sizes = [8, 16], strides = [1, 1]} : vector<96x16xf32> to vector<8x16xf32>
    %cst_71 = arith.constant dense<0.000000e+00> : vector<16x16xf32>
    %135 = tpu.matmul %132, %133, %cst_71 {dimension_numbers = #tpu.dot_dimension_numbers<[0], [0], [1], [1], [0, 1, 1, 1], [], []>} : vector<8x16xf32>, vector<8x16xf32>, vector<16x16xf32> -> vector<16x16xf32>
    %cst_72 = arith.constant 0.176776692 : f32
    %136 = vector.broadcast %cst_72 : f32 to vector<16x16xf32>
    %137 = arith.mulf %135, %136 : vector<16x16xf32>
    %cst_73 = arith.constant dense<0xFF800000> : vector<16xf32>
    %138 = vector.multi_reduction <maximumf>, %137, %cst_73 [1] : vector<16x16xf32> to vector<16xf32>
    %cst_74 = arith.constant 0xFF800000 : f32
    %139 = vector.broadcast %cst_74 : f32 to vector<16xf32>
    %140 = arith.maximumf %139, %138 : vector<16xf32>
    %141 = vector.shape_cast %140 : vector<16xf32> to vector<16x1xf32>
    %142 = vector.broadcast %141 : vector<16x1xf32> to vector<16x16xf32>
    %143 = arith.subf %137, %142 : vector<16x16xf32>
    %144 = math.exp %143 : vector<16x16xf32>
    %cst_75 = arith.constant dense<0.000000e+00> : vector<16xf32>
    %145 = vector.multi_reduction <add>, %144, %cst_75 [1] : vector<16x16xf32> to vector<16xf32>
    %146 = vector.shape_cast %145 : vector<16xf32> to vector<16x1xf32>
    %147 = vector.broadcast %146 : vector<16x1xf32> to vector<16x16xf32>
    %148 = arith.divf %144, %147 : vector<16x16xf32>
    %cst_76 = arith.constant dense<0.000000e+00> : vector<8x16xf32>
    %149 = tpu.matmul %134, %148, %cst_76 {dimension_numbers = #tpu.dot_dimension_numbers<[1], [1], [0], [0], [0, 0, 1, 0], [], []>} : vector<8x16xf32>, vector<16x16xf32>, vector<8x16xf32> -> vector<8x16xf32>
    %150 = tpu.concatenate %95, %113, %131, %149 in 0 : vector<8x16xf32>, vector<8x16xf32>, vector<8x16xf32>, vector<8x16xf32> -> vector<32x16xf32>
    %151 = arith.addf %150, %69 : vector<32x16xf32>
    %cst_77 = arith.constant dense<0.000000e+00> : vector<16xf32>
    %152 = vector.multi_reduction <add>, %151, %cst_77 [0] : vector<32x16xf32> to vector<16xf32>
    %153 = vector.shape_cast %152 : vector<16xf32> to vector<1x16xf32>
    %cst_78 = arith.constant 3.200000e+01 : f32
    %154 = vector.broadcast %cst_78 : f32 to vector<1x16xf32>
    %155 = arith.divf %153, %154 : vector<1x16xf32>
    %156 = vector.broadcast %155 : vector<1x16xf32> to vector<32x16xf32>
    %157 = arith.subf %151, %156 : vector<32x16xf32>
    %158 = arith.mulf %157, %157 : vector<32x16xf32>
    %cst_79 = arith.constant dense<0.000000e+00> : vector<16xf32>
    %159 = vector.multi_reduction <add>, %158, %cst_79 [0] : vector<32x16xf32> to vector<16xf32>
    %160 = vector.shape_cast %159 : vector<16xf32> to vector<1x16xf32>
    %cst_80 = arith.constant 3.200000e+01 : f32
    %161 = vector.broadcast %cst_80 : f32 to vector<1x16xf32>
    %162 = arith.divf %160, %161 : vector<1x16xf32>
    %163 = vector.broadcast %155 : vector<1x16xf32> to vector<32x16xf32>
    %164 = arith.subf %151, %163 : vector<32x16xf32>
    %cst_81 = arith.constant 9.99999974E-6 : f32
    %165 = vector.broadcast %cst_81 : f32 to vector<1x16xf32>
    %166 = arith.addf %162, %165 : vector<1x16xf32>
    %167 = math.rsqrt %166 : vector<1x16xf32>
    %168 = vector.broadcast %167 : vector<1x16xf32> to vector<32x16xf32>
    %169 = arith.mulf %164, %168 : vector<32x16xf32>
    %c0_82 = arith.constant 0 : index
    %c0_83 = arith.constant 0 : index
    %c0_84 = arith.constant 0 : index
    %170 = vector.load %arg11[%c0_82, %c0_83, %c0_84] : memref<3x32x1xf32, #tpu.memory_space<vmem>>, vector<1x32x1xf32>
    %171 = vector.shape_cast %170 : vector<1x32x1xf32> to vector<32x1xf32>
    %172 = vector.broadcast %171 : vector<32x1xf32> to vector<32x16xf32>
    %173 = arith.mulf %169, %172 : vector<32x16xf32>
    %c0_85 = arith.constant 0 : index
    %c0_86 = arith.constant 0 : index
    %c0_87 = arith.constant 0 : index
    %174 = vector.load %arg12[%c0_85, %c0_86, %c0_87] : memref<3x32x1xf32, #tpu.memory_space<vmem>>, vector<1x32x1xf32>
    %175 = vector.shape_cast %174 : vector<1x32x1xf32> to vector<32x1xf32>
    %176 = vector.broadcast %175 : vector<32x1xf32> to vector<32x16xf32>
    %177 = arith.addf %173, %176 : vector<32x16xf32>
    %c1 = arith.constant 1 : index
    %c0_88 = arith.constant 0 : index
    %c0_89 = arith.constant 0 : index
    %178 = vector.load %arg9[%c1, %c0_88, %c0_89] : memref<3x96x32xf32, #tpu.memory_space<vmem>>, vector<1x96x32xf32>
    %179 = vector.shape_cast %178 : vector<1x96x32xf32> to vector<96x32xf32>
    %cst_90 = arith.constant dense<0.000000e+00> : vector<96x8xf32>
    %180 = tpu.matmul %179, %70, %cst_90 {dimension_numbers = #tpu.dot_dimension_numbers<[1], [0], [0], [1], [0, 0, 1, 1], [], []>} : vector<96x32xf32>, vector<32x8xf32>, vector<96x8xf32> -> vector<96x8xf32>
    %c1_91 = arith.constant 1 : index
    %c0_92 = arith.constant 0 : index
    %c0_93 = arith.constant 0 : index
    %181 = vector.load %arg10[%c1_91, %c0_92, %c0_93] : memref<3x96x1xf32, #tpu.memory_space<vmem>>, vector<1x96x1xf32>
    %182 = vector.shape_cast %181 : vector<1x96x1xf32> to vector<96x1xf32>
    %183 = vector.broadcast %182 : vector<96x1xf32> to vector<96x8xf32>
    %184 = arith.addf %180, %183 : vector<96x8xf32>
    %185 = vector.extract_strided_slice %184 {offsets = [0, 0], sizes = [8, 8], strides = [1, 1]} : vector<96x8xf32> to vector<8x8xf32>
    %186 = vector.extract_strided_slice %184 {offsets = [32, 0], sizes = [8, 8], strides = [1, 1]} : vector<96x8xf32> to vector<8x8xf32>
    %187 = vector.extract_strided_slice %184 {offsets = [64, 0], sizes = [8, 8], strides = [1, 1]} : vector<96x8xf32> to vector<8x8xf32>
    %cst_94 = arith.constant dense<0.000000e+00> : vector<8x8xf32>
    %188 = tpu.matmul %185, %186, %cst_94 {dimension_numbers = #tpu.dot_dimension_numbers<[0], [0], [1], [1], [0, 1, 1, 1], [], []>} : vector<8x8xf32>, vector<8x8xf32>, vector<8x8xf32> -> vector<8x8xf32>
    %cst_95 = arith.constant 0.176776692 : f32
    %189 = vector.broadcast %cst_95 : f32 to vector<8x8xf32>
    %190 = arith.mulf %188, %189 : vector<8x8xf32>
    %cst_96 = arith.constant dense<0xFF800000> : vector<8xf32>
    %191 = vector.multi_reduction <maximumf>, %190, %cst_96 [1] : vector<8x8xf32> to vector<8xf32>
    %cst_97 = arith.constant 0xFF800000 : f32
    %192 = vector.broadcast %cst_97 : f32 to vector<8xf32>
    %193 = arith.maximumf %192, %191 : vector<8xf32>
    %194 = vector.shape_cast %193 : vector<8xf32> to vector<8x1xf32>
    %195 = vector.broadcast %194 : vector<8x1xf32> to vector<8x8xf32>
    %196 = arith.subf %190, %195 : vector<8x8xf32>
    %197 = math.exp %196 : vector<8x8xf32>
    %cst_98 = arith.constant dense<0.000000e+00> : vector<8xf32>
    %198 = vector.multi_reduction <add>, %197, %cst_98 [1] : vector<8x8xf32> to vector<8xf32>
    %199 = vector.shape_cast %198 : vector<8xf32> to vector<8x1xf32>
    %200 = vector.broadcast %199 : vector<8x1xf32> to vector<8x8xf32>
    %201 = arith.divf %197, %200 : vector<8x8xf32>
    %cst_99 = arith.constant dense<0.000000e+00> : vector<8x8xf32>
    %202 = tpu.matmul %187, %201, %cst_99 {dimension_numbers = #tpu.dot_dimension_numbers<[1], [1], [0], [0], [0, 0, 1, 0], [], []>} : vector<8x8xf32>, vector<8x8xf32>, vector<8x8xf32> -> vector<8x8xf32>
    %203 = vector.extract_strided_slice %184 {offsets = [8, 0], sizes = [8, 8], strides = [1, 1]} : vector<96x8xf32> to vector<8x8xf32>
    %204 = vector.extract_strided_slice %184 {offsets = [40, 0], sizes = [8, 8], strides = [1, 1]} : vector<96x8xf32> to vector<8x8xf32>
    %205 = vector.extract_strided_slice %184 {offsets = [72, 0], sizes = [8, 8], strides = [1, 1]} : vector<96x8xf32> to vector<8x8xf32>
    %cst_100 = arith.constant dense<0.000000e+00> : vector<8x8xf32>
    %206 = tpu.matmul %203, %204, %cst_100 {dimension_numbers = #tpu.dot_dimension_numbers<[0], [0], [1], [1], [0, 1, 1, 1], [], []>} : vector<8x8xf32>, vector<8x8xf32>, vector<8x8xf32> -> vector<8x8xf32>
    %cst_101 = arith.constant 0.176776692 : f32
    %207 = vector.broadcast %cst_101 : f32 to vector<8x8xf32>
    %208 = arith.mulf %206, %207 : vector<8x8xf32>
    %cst_102 = arith.constant dense<0xFF800000> : vector<8xf32>
    %209 = vector.multi_reduction <maximumf>, %208, %cst_102 [1] : vector<8x8xf32> to vector<8xf32>
    %cst_103 = arith.constant 0xFF800000 : f32
    %210 = vector.broadcast %cst_103 : f32 to vector<8xf32>
    %211 = arith.maximumf %210, %209 : vector<8xf32>
    %212 = vector.shape_cast %211 : vector<8xf32> to vector<8x1xf32>
    %213 = vector.broadcast %212 : vector<8x1xf32> to vector<8x8xf32>
    %214 = arith.subf %208, %213 : vector<8x8xf32>
    %215 = math.exp %214 : vector<8x8xf32>
    %cst_104 = arith.constant dense<0.000000e+00> : vector<8xf32>
    %216 = vector.multi_reduction <add>, %215, %cst_104 [1] : vector<8x8xf32> to vector<8xf32>
    %217 = vector.shape_cast %216 : vector<8xf32> to vector<8x1xf32>
    %218 = vector.broadcast %217 : vector<8x1xf32> to vector<8x8xf32>
    %219 = arith.divf %215, %218 : vector<8x8xf32>
    %cst_105 = arith.constant dense<0.000000e+00> : vector<8x8xf32>
    %220 = tpu.matmul %205, %219, %cst_105 {dimension_numbers = #tpu.dot_dimension_numbers<[1], [1], [0], [0], [0, 0, 1, 0], [], []>} : vector<8x8xf32>, vector<8x8xf32>, vector<8x8xf32> -> vector<8x8xf32>
    %221 = vector.extract_strided_slice %184 {offsets = [16, 0], sizes = [8, 8], strides = [1, 1]} : vector<96x8xf32> to vector<8x8xf32>
    %222 = vector.extract_strided_slice %184 {offsets = [48, 0], sizes = [8, 8], strides = [1, 1]} : vector<96x8xf32> to vector<8x8xf32>
    %223 = vector.extract_strided_slice %184 {offsets = [80, 0], sizes = [8, 8], strides = [1, 1]} : vector<96x8xf32> to vector<8x8xf32>
    %cst_106 = arith.constant dense<0.000000e+00> : vector<8x8xf32>
    %224 = tpu.matmul %221, %222, %cst_106 {dimension_numbers = #tpu.dot_dimension_numbers<[0], [0], [1], [1], [0, 1, 1, 1], [], []>} : vector<8x8xf32>, vector<8x8xf32>, vector<8x8xf32> -> vector<8x8xf32>
    %cst_107 = arith.constant 0.176776692 : f32
    %225 = vector.broadcast %cst_107 : f32 to vector<8x8xf32>
    %226 = arith.mulf %224, %225 : vector<8x8xf32>
    %cst_108 = arith.constant dense<0xFF800000> : vector<8xf32>
    %227 = vector.multi_reduction <maximumf>, %226, %cst_108 [1] : vector<8x8xf32> to vector<8xf32>
    %cst_109 = arith.constant 0xFF800000 : f32
    %228 = vector.broadcast %cst_109 : f32 to vector<8xf32>
    %229 = arith.maximumf %228, %227 : vector<8xf32>
    %230 = vector.shape_cast %229 : vector<8xf32> to vector<8x1xf32>
    %231 = vector.broadcast %230 : vector<8x1xf32> to vector<8x8xf32>
    %232 = arith.subf %226, %231 : vector<8x8xf32>
    %233 = math.exp %232 : vector<8x8xf32>
    %cst_110 = arith.constant dense<0.000000e+00> : vector<8xf32>
    %234 = vector.multi_reduction <add>, %233, %cst_110 [1] : vector<8x8xf32> to vector<8xf32>
    %235 = vector.shape_cast %234 : vector<8xf32> to vector<8x1xf32>
    %236 = vector.broadcast %235 : vector<8x1xf32> to vector<8x8xf32>
    %237 = arith.divf %233, %236 : vector<8x8xf32>
    %cst_111 = arith.constant dense<0.000000e+00> : vector<8x8xf32>
    %238 = tpu.matmul %223, %237, %cst_111 {dimension_numbers = #tpu.dot_dimension_numbers<[1], [1], [0], [0], [0, 0, 1, 0], [], []>} : vector<8x8xf32>, vector<8x8xf32>, vector<8x8xf32> -> vector<8x8xf32>
    %239 = vector.extract_strided_slice %184 {offsets = [24, 0], sizes = [8, 8], strides = [1, 1]} : vector<96x8xf32> to vector<8x8xf32>
    %240 = vector.extract_strided_slice %184 {offsets = [56, 0], sizes = [8, 8], strides = [1, 1]} : vector<96x8xf32> to vector<8x8xf32>
    %241 = vector.extract_strided_slice %184 {offsets = [88, 0], sizes = [8, 8], strides = [1, 1]} : vector<96x8xf32> to vector<8x8xf32>
    %cst_112 = arith.constant dense<0.000000e+00> : vector<8x8xf32>
    %242 = tpu.matmul %239, %240, %cst_112 {dimension_numbers = #tpu.dot_dimension_numbers<[0], [0], [1], [1], [0, 1, 1, 1], [], []>} : vector<8x8xf32>, vector<8x8xf32>, vector<8x8xf32> -> vector<8x8xf32>
    %cst_113 = arith.constant 0.176776692 : f32
    %243 = vector.broadcast %cst_113 : f32 to vector<8x8xf32>
    %244 = arith.mulf %242, %243 : vector<8x8xf32>
    %cst_114 = arith.constant dense<0xFF800000> : vector<8xf32>
    %245 = vector.multi_reduction <maximumf>, %244, %cst_114 [1] : vector<8x8xf32> to vector<8xf32>
    %cst_115 = arith.constant 0xFF800000 : f32
    %246 = vector.broadcast %cst_115 : f32 to vector<8xf32>
    %247 = arith.maximumf %246, %245 : vector<8xf32>
    %248 = vector.shape_cast %247 : vector<8xf32> to vector<8x1xf32>
    %249 = vector.broadcast %248 : vector<8x1xf32> to vector<8x8xf32>
    %250 = arith.subf %244, %249 : vector<8x8xf32>
    %251 = math.exp %250 : vector<8x8xf32>
    %cst_116 = arith.constant dense<0.000000e+00> : vector<8xf32>
    %252 = vector.multi_reduction <add>, %251, %cst_116 [1] : vector<8x8xf32> to vector<8xf32>
    %253 = vector.shape_cast %252 : vector<8xf32> to vector<8x1xf32>
    %254 = vector.broadcast %253 : vector<8x1xf32> to vector<8x8xf32>
    %255 = arith.divf %251, %254 : vector<8x8xf32>
    %cst_117 = arith.constant dense<0.000000e+00> : vector<8x8xf32>
    %256 = tpu.matmul %241, %255, %cst_117 {dimension_numbers = #tpu.dot_dimension_numbers<[1], [1], [0], [0], [0, 0, 1, 0], [], []>} : vector<8x8xf32>, vector<8x8xf32>, vector<8x8xf32> -> vector<8x8xf32>
    %257 = tpu.concatenate %202, %220, %238, %256 in 0 : vector<8x8xf32>, vector<8x8xf32>, vector<8x8xf32>, vector<8x8xf32> -> vector<32x8xf32>
    %258 = arith.addf %257, %70 : vector<32x8xf32>
    %cst_118 = arith.constant dense<0.000000e+00> : vector<8xf32>
    %259 = vector.multi_reduction <add>, %258, %cst_118 [0] : vector<32x8xf32> to vector<8xf32>
    %260 = vector.shape_cast %259 : vector<8xf32> to vector<1x8xf32>
    %cst_119 = arith.constant 3.200000e+01 : f32
    %261 = vector.broadcast %cst_119 : f32 to vector<1x8xf32>
    %262 = arith.divf %260, %261 : vector<1x8xf32>
    %263 = vector.broadcast %262 : vector<1x8xf32> to vector<32x8xf32>
    %264 = arith.subf %258, %263 : vector<32x8xf32>
    %265 = arith.mulf %264, %264 : vector<32x8xf32>
    %cst_120 = arith.constant dense<0.000000e+00> : vector<8xf32>
    %266 = vector.multi_reduction <add>, %265, %cst_120 [0] : vector<32x8xf32> to vector<8xf32>
    %267 = vector.shape_cast %266 : vector<8xf32> to vector<1x8xf32>
    %cst_121 = arith.constant 3.200000e+01 : f32
    %268 = vector.broadcast %cst_121 : f32 to vector<1x8xf32>
    %269 = arith.divf %267, %268 : vector<1x8xf32>
    %270 = vector.broadcast %262 : vector<1x8xf32> to vector<32x8xf32>
    %271 = arith.subf %258, %270 : vector<32x8xf32>
    %cst_122 = arith.constant 9.99999974E-6 : f32
    %272 = vector.broadcast %cst_122 : f32 to vector<1x8xf32>
    %273 = arith.addf %269, %272 : vector<1x8xf32>
    %274 = math.rsqrt %273 : vector<1x8xf32>
    %275 = vector.broadcast %274 : vector<1x8xf32> to vector<32x8xf32>
    %276 = arith.mulf %271, %275 : vector<32x8xf32>
    %c1_123 = arith.constant 1 : index
    %c0_124 = arith.constant 0 : index
    %c0_125 = arith.constant 0 : index
    %277 = vector.load %arg11[%c1_123, %c0_124, %c0_125] : memref<3x32x1xf32, #tpu.memory_space<vmem>>, vector<1x32x1xf32>
    %278 = vector.shape_cast %277 : vector<1x32x1xf32> to vector<32x1xf32>
    %279 = vector.broadcast %278 : vector<32x1xf32> to vector<32x8xf32>
    %280 = arith.mulf %276, %279 : vector<32x8xf32>
    %c1_126 = arith.constant 1 : index
    %c0_127 = arith.constant 0 : index
    %c0_128 = arith.constant 0 : index
    %281 = vector.load %arg12[%c1_126, %c0_127, %c0_128] : memref<3x32x1xf32, #tpu.memory_space<vmem>>, vector<1x32x1xf32>
    %282 = vector.shape_cast %281 : vector<1x32x1xf32> to vector<32x1xf32>
    %283 = vector.broadcast %282 : vector<32x1xf32> to vector<32x8xf32>
    %284 = arith.addf %280, %283 : vector<32x8xf32>
    %285 = tpu.concatenate %284, %177 in 1 : vector<32x8xf32>, vector<32x16xf32> -> vector<32x24xf32>
    %c2 = arith.constant 2 : index
    %c0_129 = arith.constant 0 : index
    %c0_130 = arith.constant 0 : index
    %286 = vector.load %arg9[%c2, %c0_129, %c0_130] : memref<3x96x32xf32, #tpu.memory_space<vmem>>, vector<1x96x32xf32>
    %287 = vector.shape_cast %286 : vector<1x96x32xf32> to vector<96x32xf32>
    %cst_131 = arith.constant dense<0.000000e+00> : vector<96x24xf32>
    %288 = tpu.matmul %287, %285, %cst_131 {dimension_numbers = #tpu.dot_dimension_numbers<[1], [0], [0], [1], [0, 0, 1, 1], [], []>} : vector<96x32xf32>, vector<32x24xf32>, vector<96x24xf32> -> vector<96x24xf32>
    %c2_132 = arith.constant 2 : index
    %c0_133 = arith.constant 0 : index
    %c0_134 = arith.constant 0 : index
    %289 = vector.load %arg10[%c2_132, %c0_133, %c0_134] : memref<3x96x1xf32, #tpu.memory_space<vmem>>, vector<1x96x1xf32>
    %290 = vector.shape_cast %289 : vector<1x96x1xf32> to vector<96x1xf32>
    %291 = vector.broadcast %290 : vector<96x1xf32> to vector<96x24xf32>
    %292 = arith.addf %288, %291 : vector<96x24xf32>
    %293 = vector.extract_strided_slice %292 {offsets = [0, 0], sizes = [8, 24], strides = [1, 1]} : vector<96x24xf32> to vector<8x24xf32>
    %294 = vector.extract_strided_slice %292 {offsets = [32, 0], sizes = [8, 24], strides = [1, 1]} : vector<96x24xf32> to vector<8x24xf32>
    %295 = vector.extract_strided_slice %292 {offsets = [64, 0], sizes = [8, 24], strides = [1, 1]} : vector<96x24xf32> to vector<8x24xf32>
    %cst_135 = arith.constant dense<0.000000e+00> : vector<24x24xf32>
    %296 = tpu.matmul %293, %294, %cst_135 {dimension_numbers = #tpu.dot_dimension_numbers<[0], [0], [1], [1], [0, 1, 1, 1], [], []>} : vector<8x24xf32>, vector<8x24xf32>, vector<24x24xf32> -> vector<24x24xf32>
    %cst_136 = arith.constant 0.176776692 : f32
    %297 = vector.broadcast %cst_136 : f32 to vector<24x24xf32>
    %298 = arith.mulf %296, %297 : vector<24x24xf32>
    %cst_137 = arith.constant dense<0xFF800000> : vector<24xf32>
    %299 = vector.multi_reduction <maximumf>, %298, %cst_137 [1] : vector<24x24xf32> to vector<24xf32>
    %cst_138 = arith.constant 0xFF800000 : f32
    %300 = vector.broadcast %cst_138 : f32 to vector<24xf32>
    %301 = arith.maximumf %300, %299 : vector<24xf32>
    %302 = vector.shape_cast %301 : vector<24xf32> to vector<24x1xf32>
    %303 = vector.broadcast %302 : vector<24x1xf32> to vector<24x24xf32>
    %304 = arith.subf %298, %303 : vector<24x24xf32>
    %305 = math.exp %304 : vector<24x24xf32>
    %cst_139 = arith.constant dense<0.000000e+00> : vector<24xf32>
    %306 = vector.multi_reduction <add>, %305, %cst_139 [1] : vector<24x24xf32> to vector<24xf32>
    %307 = vector.shape_cast %306 : vector<24xf32> to vector<24x1xf32>
    %308 = vector.broadcast %307 : vector<24x1xf32> to vector<24x24xf32>
    %309 = arith.divf %305, %308 : vector<24x24xf32>
    %cst_140 = arith.constant dense<0.000000e+00> : vector<8x24xf32>
    %310 = tpu.matmul %295, %309, %cst_140 {dimension_numbers = #tpu.dot_dimension_numbers<[1], [1], [0], [0], [0, 0, 1, 0], [], []>} : vector<8x24xf32>, vector<24x24xf32>, vector<8x24xf32> -> vector<8x24xf32>
    %311 = vector.extract_strided_slice %292 {offsets = [8, 0], sizes = [8, 24], strides = [1, 1]} : vector<96x24xf32> to vector<8x24xf32>
    %312 = vector.extract_strided_slice %292 {offsets = [40, 0], sizes = [8, 24], strides = [1, 1]} : vector<96x24xf32> to vector<8x24xf32>
    %313 = vector.extract_strided_slice %292 {offsets = [72, 0], sizes = [8, 24], strides = [1, 1]} : vector<96x24xf32> to vector<8x24xf32>
    %cst_141 = arith.constant dense<0.000000e+00> : vector<24x24xf32>
    %314 = tpu.matmul %311, %312, %cst_141 {dimension_numbers = #tpu.dot_dimension_numbers<[0], [0], [1], [1], [0, 1, 1, 1], [], []>} : vector<8x24xf32>, vector<8x24xf32>, vector<24x24xf32> -> vector<24x24xf32>
    %cst_142 = arith.constant 0.176776692 : f32
    %315 = vector.broadcast %cst_142 : f32 to vector<24x24xf32>
    %316 = arith.mulf %314, %315 : vector<24x24xf32>
    %cst_143 = arith.constant dense<0xFF800000> : vector<24xf32>
    %317 = vector.multi_reduction <maximumf>, %316, %cst_143 [1] : vector<24x24xf32> to vector<24xf32>
    %cst_144 = arith.constant 0xFF800000 : f32
    %318 = vector.broadcast %cst_144 : f32 to vector<24xf32>
    %319 = arith.maximumf %318, %317 : vector<24xf32>
    %320 = vector.shape_cast %319 : vector<24xf32> to vector<24x1xf32>
    %321 = vector.broadcast %320 : vector<24x1xf32> to vector<24x24xf32>
    %322 = arith.subf %316, %321 : vector<24x24xf32>
    %323 = math.exp %322 : vector<24x24xf32>
    %cst_145 = arith.constant dense<0.000000e+00> : vector<24xf32>
    %324 = vector.multi_reduction <add>, %323, %cst_145 [1] : vector<24x24xf32> to vector<24xf32>
    %325 = vector.shape_cast %324 : vector<24xf32> to vector<24x1xf32>
    %326 = vector.broadcast %325 : vector<24x1xf32> to vector<24x24xf32>
    %327 = arith.divf %323, %326 : vector<24x24xf32>
    %cst_146 = arith.constant dense<0.000000e+00> : vector<8x24xf32>
    %328 = tpu.matmul %313, %327, %cst_146 {dimension_numbers = #tpu.dot_dimension_numbers<[1], [1], [0], [0], [0, 0, 1, 0], [], []>} : vector<8x24xf32>, vector<24x24xf32>, vector<8x24xf32> -> vector<8x24xf32>
    %329 = vector.extract_strided_slice %292 {offsets = [16, 0], sizes = [8, 24], strides = [1, 1]} : vector<96x24xf32> to vector<8x24xf32>
    %330 = vector.extract_strided_slice %292 {offsets = [48, 0], sizes = [8, 24], strides = [1, 1]} : vector<96x24xf32> to vector<8x24xf32>
    %331 = vector.extract_strided_slice %292 {offsets = [80, 0], sizes = [8, 24], strides = [1, 1]} : vector<96x24xf32> to vector<8x24xf32>
    %cst_147 = arith.constant dense<0.000000e+00> : vector<24x24xf32>
    %332 = tpu.matmul %329, %330, %cst_147 {dimension_numbers = #tpu.dot_dimension_numbers<[0], [0], [1], [1], [0, 1, 1, 1], [], []>} : vector<8x24xf32>, vector<8x24xf32>, vector<24x24xf32> -> vector<24x24xf32>
    %cst_148 = arith.constant 0.176776692 : f32
    %333 = vector.broadcast %cst_148 : f32 to vector<24x24xf32>
    %334 = arith.mulf %332, %333 : vector<24x24xf32>
    %cst_149 = arith.constant dense<0xFF800000> : vector<24xf32>
    %335 = vector.multi_reduction <maximumf>, %334, %cst_149 [1] : vector<24x24xf32> to vector<24xf32>
    %cst_150 = arith.constant 0xFF800000 : f32
    %336 = vector.broadcast %cst_150 : f32 to vector<24xf32>
    %337 = arith.maximumf %336, %335 : vector<24xf32>
    %338 = vector.shape_cast %337 : vector<24xf32> to vector<24x1xf32>
    %339 = vector.broadcast %338 : vector<24x1xf32> to vector<24x24xf32>
    %340 = arith.subf %334, %339 : vector<24x24xf32>
    %341 = math.exp %340 : vector<24x24xf32>
    %cst_151 = arith.constant dense<0.000000e+00> : vector<24xf32>
    %342 = vector.multi_reduction <add>, %341, %cst_151 [1] : vector<24x24xf32> to vector<24xf32>
    %343 = vector.shape_cast %342 : vector<24xf32> to vector<24x1xf32>
    %344 = vector.broadcast %343 : vector<24x1xf32> to vector<24x24xf32>
    %345 = arith.divf %341, %344 : vector<24x24xf32>
    %cst_152 = arith.constant dense<0.000000e+00> : vector<8x24xf32>
    %346 = tpu.matmul %331, %345, %cst_152 {dimension_numbers = #tpu.dot_dimension_numbers<[1], [1], [0], [0], [0, 0, 1, 0], [], []>} : vector<8x24xf32>, vector<24x24xf32>, vector<8x24xf32> -> vector<8x24xf32>
    %347 = vector.extract_strided_slice %292 {offsets = [24, 0], sizes = [8, 24], strides = [1, 1]} : vector<96x24xf32> to vector<8x24xf32>
    %348 = vector.extract_strided_slice %292 {offsets = [56, 0], sizes = [8, 24], strides = [1, 1]} : vector<96x24xf32> to vector<8x24xf32>
    %349 = vector.extract_strided_slice %292 {offsets = [88, 0], sizes = [8, 24], strides = [1, 1]} : vector<96x24xf32> to vector<8x24xf32>
    %cst_153 = arith.constant dense<0.000000e+00> : vector<24x24xf32>
    %350 = tpu.matmul %347, %348, %cst_153 {dimension_numbers = #tpu.dot_dimension_numbers<[0], [0], [1], [1], [0, 1, 1, 1], [], []>} : vector<8x24xf32>, vector<8x24xf32>, vector<24x24xf32> -> vector<24x24xf32>
    %cst_154 = arith.constant 0.176776692 : f32
    %351 = vector.broadcast %cst_154 : f32 to vector<24x24xf32>
    %352 = arith.mulf %350, %351 : vector<24x24xf32>
    %cst_155 = arith.constant dense<0xFF800000> : vector<24xf32>
    %353 = vector.multi_reduction <maximumf>, %352, %cst_155 [1] : vector<24x24xf32> to vector<24xf32>
    %cst_156 = arith.constant 0xFF800000 : f32
    %354 = vector.broadcast %cst_156 : f32 to vector<24xf32>
    %355 = arith.maximumf %354, %353 : vector<24xf32>
    %356 = vector.shape_cast %355 : vector<24xf32> to vector<24x1xf32>
    %357 = vector.broadcast %356 : vector<24x1xf32> to vector<24x24xf32>
    %358 = arith.subf %352, %357 : vector<24x24xf32>
    %359 = math.exp %358 : vector<24x24xf32>
    %cst_157 = arith.constant dense<0.000000e+00> : vector<24xf32>
    %360 = vector.multi_reduction <add>, %359, %cst_157 [1] : vector<24x24xf32> to vector<24xf32>
    %361 = vector.shape_cast %360 : vector<24xf32> to vector<24x1xf32>
    %362 = vector.broadcast %361 : vector<24x1xf32> to vector<24x24xf32>
    %363 = arith.divf %359, %362 : vector<24x24xf32>
    %cst_158 = arith.constant dense<0.000000e+00> : vector<8x24xf32>
    %364 = tpu.matmul %349, %363, %cst_158 {dimension_numbers = #tpu.dot_dimension_numbers<[1], [1], [0], [0], [0, 0, 1, 0], [], []>} : vector<8x24xf32>, vector<24x24xf32>, vector<8x24xf32> -> vector<8x24xf32>
    %365 = tpu.concatenate %310, %328, %346, %364 in 0 : vector<8x24xf32>, vector<8x24xf32>, vector<8x24xf32>, vector<8x24xf32> -> vector<32x24xf32>
    %366 = arith.addf %365, %285 : vector<32x24xf32>
    %cst_159 = arith.constant dense<0.000000e+00> : vector<24xf32>
    %367 = vector.multi_reduction <add>, %366, %cst_159 [0] : vector<32x24xf32> to vector<24xf32>
    %368 = vector.shape_cast %367 : vector<24xf32> to vector<1x24xf32>
    %cst_160 = arith.constant 3.200000e+01 : f32
    %369 = vector.broadcast %cst_160 : f32 to vector<1x24xf32>
    %370 = arith.divf %368, %369 : vector<1x24xf32>
    %371 = vector.broadcast %370 : vector<1x24xf32> to vector<32x24xf32>
    %372 = arith.subf %366, %371 : vector<32x24xf32>
    %373 = arith.mulf %372, %372 : vector<32x24xf32>
    %cst_161 = arith.constant dense<0.000000e+00> : vector<24xf32>
    %374 = vector.multi_reduction <add>, %373, %cst_161 [0] : vector<32x24xf32> to vector<24xf32>
    %375 = vector.shape_cast %374 : vector<24xf32> to vector<1x24xf32>
    %cst_162 = arith.constant 3.200000e+01 : f32
    %376 = vector.broadcast %cst_162 : f32 to vector<1x24xf32>
    %377 = arith.divf %375, %376 : vector<1x24xf32>
    %378 = vector.broadcast %370 : vector<1x24xf32> to vector<32x24xf32>
    %379 = arith.subf %366, %378 : vector<32x24xf32>
    %cst_163 = arith.constant 9.99999974E-6 : f32
    %380 = vector.broadcast %cst_163 : f32 to vector<1x24xf32>
    %381 = arith.addf %377, %380 : vector<1x24xf32>
    %382 = math.rsqrt %381 : vector<1x24xf32>
    %383 = vector.broadcast %382 : vector<1x24xf32> to vector<32x24xf32>
    %384 = arith.mulf %379, %383 : vector<32x24xf32>
    %c2_164 = arith.constant 2 : index
    %c0_165 = arith.constant 0 : index
    %c0_166 = arith.constant 0 : index
    %385 = vector.load %arg11[%c2_164, %c0_165, %c0_166] : memref<3x32x1xf32, #tpu.memory_space<vmem>>, vector<1x32x1xf32>
    %386 = vector.shape_cast %385 : vector<1x32x1xf32> to vector<32x1xf32>
    %387 = vector.broadcast %386 : vector<32x1xf32> to vector<32x24xf32>
    %388 = arith.mulf %384, %387 : vector<32x24xf32>
    %c2_167 = arith.constant 2 : index
    %c0_168 = arith.constant 0 : index
    %c0_169 = arith.constant 0 : index
    %389 = vector.load %arg12[%c2_167, %c0_168, %c0_169] : memref<3x32x1xf32, #tpu.memory_space<vmem>>, vector<1x32x1xf32>
    %390 = vector.shape_cast %389 : vector<1x32x1xf32> to vector<32x1xf32>
    %391 = vector.broadcast %390 : vector<32x1xf32> to vector<32x24xf32>
    %392 = arith.addf %388, %391 : vector<32x24xf32>
    %393 = tpu.transpose %392, [1, 0] : vector<32x24xf32> -> vector<24x32xf32>
    %c0_170 = arith.constant 0 : index
    %c0_171 = arith.constant 0 : index
    %c0_172 = arith.constant 0 : index
    %394 = vector.load %arg13[%c0_170, %c0_171, %c0_172] : memref<1x24x32xf32, #tpu.memory_space<vmem>>, vector<1x24x32xf32>
    %395 = vector.shape_cast %394 : vector<1x24x32xf32> to vector<24x32xf32>
    %396 = vector.shape_cast %393 : vector<24x32xf32> to vector<1x24x32xf32>
    tpu.vector_store %arg13[%c0_170, %c0_171, %c0_172], %396 {strides = array<i32>} : memref<1x24x32xf32, #tpu.memory_space<vmem>>, vector<1x24x32xf32>,
    return
  }
  func.func @transform_0(%arg0: i32) -> (i32, i32, i32) {
    %c0_i32 = arith.constant 0 : i32
    %c0_i32_0 = arith.constant 0 : i32
    %c0_i32_1 = arith.constant 0 : i32
    return %arg0, %c0_i32, %c0_i32_0 : i32, i32, i32
  }
  func.func @transform_1(%arg0: i32) -> (i32, i32, i32) {
    %c0_i32 = arith.constant 0 : i32
    %c0_i32_0 = arith.constant 0 : i32
    %c0_i32_1 = arith.constant 0 : i32
    return %arg0, %c0_i32, %c0_i32_0 : i32, i32, i32
  }
  func.func @transform_2(%arg0: i32) -> (i32, i32) {
    %c0_i32 = arith.constant 0 : i32
    %c0_i32_0 = arith.constant 0 : i32
    %c0_i32_1 = arith.constant 0 : i32
    return %c0_i32, %c0_i32_0 : i32, i32
  }
  func.func @transform_3(%arg0: i32) -> (i32, i32) {
    %c0_i32 = arith.constant 0 : i32
    %c0_i32_0 = arith.constant 0 : i32
    %c0_i32_1 = arith.constant 0 : i32
    return %c0_i32, %c0_i32_0 : i32, i32
  }
  func.func @transform_4(%arg0: i32) -> (i32, i32) {
    %c0_i32 = arith.constant 0 : i32
    %c0_i32_0 = arith.constant 0 : i32
    %c0_i32_1 = arith.constant 0 : i32
    return %c0_i32, %c0_i32_0 : i32, i32
  }
  func.func @transform_5(%arg0: i32) -> (i32, i32) {
    %c0_i32 = arith.constant 0 : i32
    %c0_i32_0 = arith.constant 0 : i32
    %c0_i32_1 = arith.constant 0 : i32
    return %c0_i32, %c0_i32_0 : i32, i32
  }
  func.func @transform_6(%arg0: i32) -> (i32, i32) {
    %c0_i32 = arith.constant 0 : i32
    %c0_i32_0 = arith.constant 0 : i32
    %c0_i32_1 = arith.constant 0 : i32
    return %c0_i32, %c0_i32_0 : i32, i32
  }
  func.func @transform_7(%arg0: i32) -> (i32, i32) {
    %c0_i32 = arith.constant 0 : i32
    %c0_i32_0 = arith.constant 0 : i32
    %c0_i32_1 = arith.constant 0 : i32
    return %c0_i32, %c0_i32_0 : i32, i32
  }
  func.func @transform_8(%arg0: i32) -> (i32, i32, i32) {
    %c0_i32 = arith.constant 0 : i32
    %c0_i32_0 = arith.constant 0 : i32
    %c0_i32_1 = arith.constant 0 : i32
    %c0_i32_2 = arith.constant 0 : i32
    return %c0_i32, %c0_i32_0, %c0_i32_1 : i32, i32, i32
  }
  func.func @transform_9(%arg0: i32) -> (i32, i32, i32) {
    %c0_i32 = arith.constant 0 : i32
    %c0_i32_0 = arith.constant 0 : i32
    %c0_i32_1 = arith.constant 0 : i32
    %c0_i32_2 = arith.constant 0 : i32
    return %c0_i32, %c0_i32_0, %c0_i32_1 : i32, i32, i32
  }
  func.func @transform_10(%arg0: i32) -> (i32, i32, i32) {
    %c0_i32 = arith.constant 0 : i32
    %c0_i32_0 = arith.constant 0 : i32
    %c0_i32_1 = arith.constant 0 : i32
    %c0_i32_2 = arith.constant 0 : i32
    return %c0_i32, %c0_i32_0, %c0_i32_1 : i32, i32, i32
  }
  func.func @transform_11(%arg0: i32) -> (i32, i32, i32) {
    %c0_i32 = arith.constant 0 : i32
    %c0_i32_0 = arith.constant 0 : i32
    %c0_i32_1 = arith.constant 0 : i32
    %c0_i32_2 = arith.constant 0 : i32
    return %c0_i32, %c0_i32_0, %c0_i32_1 : i32, i32, i32
  }
  func.func @transform_12(%arg0: i32) -> (i32, i32, i32) {
    %c0_i32 = arith.constant 0 : i32
    %c0_i32_0 = arith.constant 0 : i32
    %c0_i32_1 = arith.constant 0 : i32
    return %arg0, %c0_i32, %c0_i32_0 : i32, i32, i32
  }
}

</mosaic_0001>

<bundles_post_ra>
// kernel: tpu_custom_call.1
= control target key start
LH: loop header
LB: loop body
LE: loop exit
PB: predicated region body
PF: predicated region fallthrough
CT: control target
= control target key end

     0   :  { %17 = vsyncpa [#allocation3], 0  ;;  %s7450_s0 = inlined_call_operand.vmem [shape: f32[2,32,8], index: 0, kind: input, shape index: {}]   ;;  %s7451_s1 = inlined_call_operand.vmem [shape: f32[2,32,16], index: 1, kind: input, shape index: {}]   ;;  %s7452_s2 = inlined_call_operand.vmem [shape: f32[64,32], index: 2, kind: input, shape index: {}]   ;;  %s7453_s3 = inlined_call_operand.vmem [shape: f32[64,1], index: 3, kind: input, shape index: {}]   ;;  %s7454_s4 = inlined_call_operand.vmem [shape: f32[64,1], index: 4, kind: input, shape index: {}]   ;;  %s7455_s5 = inlined_call_operand.vmem [shape: f32[32,64], index: 5, kind: input, shape index: {}]   ;;  %s7456_s6 = inlined_call_operand.vmem [shape: f32[32,1], index: 6, kind: input, shape index: {}]   ;;  %s7457_s7 = inlined_call_operand.vmem [shape: f32[32,1], index: 7, kind: input, shape index: {}]   ;;  %s7458_s8 = inlined_call_operand.vmem [shape: f32[3,96,32], index: 8, kind: input, shape index: {}]   ;;  %s7459_s9 = inlined_call_operand.vmem [shape: f32[3,96,1], index: 9, kind: input, shape index: {}]   ;;  %s7460_s10 = inlined_call_operand.vmem [shape: f32[3,32,1], index: 10, kind: input, shape index: {}]   ;;  %s7461_s11 = inlined_call_operand.vmem [shape: f32[3,32,1], index: 11, kind: input, shape index: {}]   ;;  %s7462_s12 = inlined_call_operand.hbm [shape: f32[2,24,32], index: 12, kind: output, shape index: {}]  }
   0x1   :  { %19 = vsyncpa [#allocation3 + $0x1], 0  ;;  %s6358_s21 = smov 0   ;;  %s6360_s22 = smov 0  }
   0x2   :  { %s6362_s23 = smov 0   ;;  %s6364_s24 = smov 0  }
   0x3 LB: > { %7468 = sst [smem:[#allocation5_spill]] %s6272_s21  ;;  %s6379_s25 = sadd.s32 4294967295, %s6284_s24   ;;  %s6284_s24 = sphi %s6364_s24, %s7481_s24   ;;  %s6280_s23 = sphi %s6362_s23, %s7483_s23   ;;  %s6276_s22 = sphi %s6360_s22, %s7485_s22   ;;  %s6272_s21 = sphi %s6358_s21, %s7484_s21  }
   0x4   : > { %7469 = sst [smem:[#allocation6_spill]] %s6280_s23  ;;  %s5206_s26 = sadd.s32 4294967294, %s6284_s24  }
   0x5   : > { %s6383_s27 = sadd.s32 1, %s6284_s24   ;;  %s294_s28 = sadd.s32 1, %s6280_s23 }
   0x6   : > { %7470 = sst [smem:[#allocation7_spill]] %s6383_s27  ;;  %s291_s29 = ssub.s32 %s6284_s24, %s6383_s27 }
   0x7   : > { %p304_p0 = scmp.ne.s32.totalorder %s6280_s23, %s6276_s22  ;;  %p292_p1 = scmp.eq.s32.totalorder %s291_s29, 0 }
   0x8   : > { %p305_p2 = scmp.eq.s32.totalorder %s6379_s25, 1  ;;  %p310_p3 = scmp.ne.s32.totalorder %s6276_s22, %s6272_s21 }
   0x9   : > { %p311_p4 = scmp.eq.s32.totalorder %s5206_s26, 1  ;;  %p5209_p7 = scmp.ge.s32.totalorder %s6284_s24, 1 }
   0xa   : > { %s6394_s30 = scalar_select %p292_p1, %s6280_s23, %s294_s28  }
   0xb   : > { %p6396_p5 = por %p305_p2, %p304_p0  ;;  %p6400_p6 = por %p311_p4, %p310_p3 }
   0xc   : > { %7471 = sst [smem:[#allocation8_spill]] %s6394_s30  ;;  %p375_p8 = scmp.lt.s32.totalorder %s6284_s24, 3 }
   0xd   : > { %s7473_s14 = scalar_select %p6400_p6, 1, 0 }
   0xe   : > { %p376_p9 = pnand %p5209_p7, %p375_p8 }
   0xf   : > { %7474 = sst [smem:[#allocation9_spill]] %s7473_s14  ;;  %p422_p10 = scmp.lt.s32.totalorder (!%p376_p9), %s6379_s25, 1  ;;  %v6410_v0 = vld [vmem:[%s7452_s2] sm:$0xff] (!%p376_p9)  ;;  %vm444_vm0 = vcmask (!%p376_p9), 261120   ;;  %v6286_v1 = vmov (!%p376_p9), 0   ;;  %v631_v4 = vld [vmem:[%s7454_s4 + $0x8] sm:$0xff] (!%p376_p9) }
  0x10   : > { %379 = sbr.rel (%p376_p9) target bundleno = 6890 (0x1aea), region = 68  ;;  %5604 = vmatprep.mubr.msk.f32.mxu0 (!%p376_p9), %vm444_vm0, %v6410_v0  ;;  %6111 = vset.pattern.permute.xlu1 (!%p376_p9), %v6286_v1  ;;  %v630_v2 = vld [vmem:[%s7454_s4] sm:$0xff] (!%p376_p9)  ;;  %v575_v5 = vld [vmem:[%s7453_s3 + $0x8] sm:$0xff] (!%p376_p9)  ;;  %v577_v14 = vld [vmem:[%s7453_s3 + $0x18] sm:$0xff] (!%p376_p9)  ;;  %vm698_vm1 = vcmask (!%p376_p9), 523264   ;;  %vm6288_vm2 = vmmov (!%p376_p9), 0  }
  0x11   : > { %6110 = vset.pattern.permute.xlu0 (!%p376_p9), %v6286_v1  ;;  %640 = vperm.xlu1 (!%p376_p9), %6111, %v630_v2   ;;  %v574_v3 = vld [vmem:[%s7453_s3] sm:$0xff] (!%p376_p9)  ;;  %v576_v15 = vld [vmem:[%s7453_s3 + $0x10] sm:$0xff] (!%p376_p9)  ;;  %v633_v19 = vld [vmem:[%s7454_s4 + $0x18] sm:$0xff] (!%p376_p9)  ;;  %vm1222_vm3 = vcmask (!%p376_p9), 64512   ;;  %vm1192_vm4 = vcmask (!%p376_p9), 130048   ;;  %vm4146_vm6 = vcmask (!%p376_p9), 195584  }
  0x12   : > { %584 = vperm.xlu0 (!%p376_p9), %6110, %v574_v3   ;;  %v632_v20 = vld [vmem:[%s7454_s4 + $0x10] sm:$0xff] (!%p376_p9)  ;;  %v437_v21 = vld [vmem:[%s7452_s2 + $0x8] sm:$0xff] (!%p376_p9)  ;;  %v578_v25 = vld [vmem:[%s7453_s3 + $0x20] sm:$0xff] (!%p376_p9)  ;;  %s419_s26 = sand.u32 (!%p376_p9), 1, %s6276_s22  }
  0x13   : > { %v438_v22 = vld [vmem:[%s7452_s2 + $0x10] sm:$0xff] (!%p376_p9)  ;;  %v579_v24 = vld [vmem:[%s7453_s3 + $0x28] sm:$0xff] (!%p376_p9)  ;;  %v439_v26 = vld [vmem:[%s7452_s2 + $0x18] sm:$0xff] (!%p376_p9)  ;;  %s6063_s29 = smul.u32 (!%p376_p9), 24, %s419_s26  ;;  %s7408_s27 = scalar_lea.sflag (!%p376_p9), [#allocation3], %s419_s26 }
  0x14   : > { %v440_v27 = vld [vmem:[%s7452_s2 + $0x20] sm:$0xff] (!%p376_p9)  ;;  %v635_v28 = vld [vmem:[%s7454_s4 + $0x28] sm:$0xff] (!%p376_p9)  ;;  %v442_v31 = vld [vmem:[%s7452_s2 + $0x30] sm:$0xff] (!%p376_p9) }
  0x15   : > { %645 = vperm.xlu1 (!%p376_p9), %6111, %v631_v4   ;;  %v634_v29 = vld [vmem:[%s7454_s4 + $0x20] sm:$0xff] (!%p376_p9)  ;;  %v441_v30 = vld [vmem:[%s7452_s2 + $0x28] sm:$0xff] (!%p376_p9)  ;;  %v581_v32 = vld [vmem:[%s7453_s3 + $0x38] sm:$0xff] (!%p376_p9)  ;;  %s421_s15 = scalar_lea.vmem (!%p376_p9), [#allocation2], %s6063_s29 }
  0x16   : > { %589 = vperm.xlu0 (!%p376_p9), %6110, %v575_v5   ;;  %v580_v33 = vld [vmem:[%s7453_s3 + $0x30] sm:$0xff] (!%p376_p9)  ;;  %v443_v34 = vld [vmem:[%s7452_s2 + $0x38] sm:$0xff] (!%p376_p9)  ;;  %v797_v37 = vld [vmem:[%s7456_s6 + $0x8] sm:$0xff] (!%p376_p9)  ;;  %s5132_s16 = sshll.u32 (!%p376_p9), %s421_s15, 4  ;;  %s7400_s16 = int_to_ptr.vmem [resolvable:$true] %s5132_s16 }
  0x17   : > { %s423_s17 = scalar_select %p422_p10, %s6379_s25, 1  ;;  %v637_v35 = vld [vmem:[%s7454_s4 + $0x38] sm:$0xff]  ;;  %v636_v36 = vld [vmem:[%s7454_s4 + $0x30] sm:$0xff]  ;;  %v796_v38 = vld [vmem:[%s7456_s6] sm:$0xff] }
  0x18   : > { %v798_v39 = vld [vmem:[%s7456_s6 + $0x10] sm:$0xff]  ;;  %v824_v40 = vld [vmem:[%s7457_s7] sm:$0xff]  ;;  %v799_v41 = vld [vmem:[%s7456_s6 + $0x18] sm:$0xff]  ;;  %s6222_s14 = scalar_lea.vmem %s7400_s16, 384 }
  0x19   : > { %s5411_s28 = sshll.u32 %s423_s17, 5  ;;  %599 = vperm.xlu1 %6111, %v577_v14   ;;  %v825_v42 = vld [vmem:[%s7457_s7 + $0x8] sm:$0xff]  ;;  %v827_v43 = vld [vmem:[%s7457_s7 + $0x18] sm:$0xff]  ;;  %v826_v44 = vld [vmem:[%s7457_s7 + $0x10] sm:$0xff]  ;;  %p6223_p11 = scmp.ne.s32.totalorder %s7400_s16, %s6222_s14 }
  0x1a   : > { %s426_s23 = scalar_lea.vmem %s7450_s0, %s5411_s28  ;;  %s431_s18 = scalar_lea.vmem %s7451_s1, %s5411_s28  ;;  %594 = vperm.xlu0 %6110, %v576_v15   ;;  %v6533_v45 = vld [vmem:[%s7455_s5] sm:$0xff]  ;;  %vm6768_vm5 = vmpackc.low %vm1192_vm4, %vm1192_vm4 }
  0x1b   : > { %v432_v6 = vld [vmem:[%s426_s23] sm:$0xff]  ;;  %v433_v7 = vld [vmem:[%s426_s23 + $0x8] sm:$0xff]  ;;  %v434_v8 = vld [vmem:[%s426_s23 + $0x10] sm:$0xff]  ;;  %5632 = vmatprep.mubr.msk.f32.mxu1 %vm698_vm1, %v6533_v45  ;;  %s6290_s28 = smov 8   ;;  %p6224_p12 = pnand %p6223_p11, %p6396_p5 }
  0x1c   : > { %v5953_v9 = vpack.c.bf16 %v433_v7, %v432_v6  ;;  %v435_v10 = vld [vmem:[%s426_s23 + $0x18] sm:$0xff]  ;;  %v856_v12 = vld [vmem:[%s431_s18] sm:$0xff]  ;;  %v857_v13 = vld [vmem:[%s431_s18 + $0x8] sm:$0xff] }
  0x1d   : > { %v5957_v11 = vpack.c.bf16 %v435_v10, %v434_v8  ;;  %v5977_v16 = vpack.c.bf16 %v857_v13, %v856_v12  ;;  %v858_v17 = vld [vmem:[%s431_s18 + $0x10] sm:$0xff]  ;;  %v859_v18 = vld [vmem:[%s431_s18 + $0x18] sm:$0xff]  ;;  %655 = vperm.xlu1 %6111, %v633_v19   ;;  %vm7214_vm7 = vmpackc.low %vm4146_vm6, %vm4146_vm6  ;;  %s6064_s18 = smul.u32 384, %s6379_s25  ;;  %p6225_p13 = pneg %p6224_p12 }
  0x1e   : > { %5954 = vmatprep.subr.bf16.mxu0 %v5953_v9  ;;  %v5981_v23 = vpack.c.bf16 %v859_v18, %v858_v17  ;;  %650 = vperm.xlu0 %6110, %v632_v20   ;;  %s6291_s25 = smov [#allocation2]  }
  0x1f   : > { %5956 = vmatpush3.bf16.msra.mxu0 %v5953_v9  ;;  %s7405_s17 = scalar_lea.hbm %s7462_s12, %s6064_s18  ;;  %s6226_s21 = sshll.u32 %s6291_s25, 4  ;;  %s6227_s21 = int_to_ptr.vmem [resolvable:$false] %s6226_s21 }
  0x20   : > { %5958 = vmatprep.subr.bf16.mxu0 %v5957_v11  ;;  %s6228_s23 = scalar_lea.vmem %s6227_s21, 768  ;;  %p6229_p0 = scmp.lt.s32.totalorder %s7400_s16, %s6227_s21 }
  0x21   : > { %609 = vperm.xlu1 %6111, %v579_v24   ;;  %p6230_p1 = scmp.lt.s32.totalorder %s6228_s23, %s6222_s14 }
  0x22   : > { %604 = vperm.xlu0 %6110, %v578_v25  }
  0x23   : > { %5960 = vmatpush3.bf16.msra.mxu0 %v5957_v11  ;;  %p6231_p2 = por %p6230_p1, %p6229_p0 }
  0x24   : > { %5978 = vmatprep.subr.bf16.mxu0 %v5977_v16 }
  0x25   : > { %665 = vperm.xlu1 %6111, %v635_v28   ;;  %p6232_p3 = pnand %p6231_p2, %p6225_p13 }
  0x26   : > { %5605 = vmatmul.mubr.msk.f32.vlgmr.msra.gmra.mrb[0].mxu0 %vm444_vm0, %v437_v21  ;;  %660 = vperm.xlu0 %6110, %v634_v29  }
  0x27   : > { %5607 = vmatprep.mubr.msk.f32.mxu0 %vm444_vm0, %v438_v22  ;;  %5980 = vmatpush3.bf16.msra.mxu0 %v5977_v16 }
  0x28   : > { %5982 = vmatprep.subr.bf16.mxu0 %v5981_v23 }
  0x29   : > { %619 = vperm.xlu1 %6111, %v581_v32  }
  0x2a   : > { %5608 = vmatmul.mubr.msk.f32.gmra.mrb[2].mxu0 %vm444_vm0, %v439_v26  ;;  %614 = vperm.xlu0 %6110, %v580_v33  }
  0x2b   : > { %5610 = vmatprep.mubr.msk.f32.mxu0 %vm444_vm0, %v440_v27  ;;  %5984 = vmatpush3.bf16.msra.mxu0 %v5981_v23 }
  0x2d   : > { %675 = vperm.xlu1 %6111, %v637_v35  }
  0x2e   : > { %5611 = vmatmul.mubr.msk.f32.gmra.mrb[4].mxu0 %vm444_vm0, %v441_v30  ;;  %670 = vperm.xlu0 %6110, %v636_v36  }
  0x2f   : > { %5613 = vmatprep.mubr.msk.f32.mxu0 %vm444_vm0, %v442_v31 }
  0x31   : > { %807 = vperm.xlu1 %6111, %v797_v37  }
  0x32   : > { %5614 = vmatmul.mubr.msk.f32.gmra.mrb[6].mxu0 %vm444_vm0, %v443_v34  ;;  %802 = vperm.xlu0 %6110, %v796_v38  }
  0x33   : > { %5646 = vmatprep.mubr.msk.f32.mxu0 %vm444_vm0, %v6410_v0 }
  0x35   : > { %812 = vperm.xlu1 %6111, %v798_v39  }
  0x36   : > { %5647 = vmatmul.mubr.msk.f32.vlgmr.msra.gmra.mrb[8].mxu0 %vm444_vm0, %v437_v21  ;;  %830 = vperm.xlu0 %6110, %v824_v40  }
  0x37   : > { %5649 = vmatprep.mubr.msk.f32.mxu0 %vm444_vm0, %v438_v22 }
  0x39   : > { %817 = vperm.xlu1 %6111, %v799_v41  }
  0x3a   : > { %5650 = vmatmul.mubr.msk.f32.gmra.mrb[10].mxu0 %vm444_vm0, %v439_v26  ;;  %835 = vperm.xlu0 %6110, %v825_v42  }
  0x3b   : > { %5652 = vmatprep.mubr.msk.f32.mxu0 %vm444_vm0, %v440_v27 }
  0x3d   : > { %845 = vperm.xlu1 %6111, %v827_v43  }
  0x3e   : > { %5653 = vmatmul.mubr.msk.f32.gmra.mrb[12].mxu0 %vm444_vm0, %v441_v30  ;;  %840 = vperm.xlu0 %6110, %v826_v44  }
  0x3f   : > { %5655 = vmatprep.mubr.msk.f32.mxu0 %vm444_vm0, %v442_v31 }
  0x42   : > { %5656 = vmatmul.mubr.msk.f32.gmra.mrb[14].mxu0 %vm444_vm0, %v443_v34 }
  0x90   : > { %v641_v46 = vpop.permute.xlu1 %640 }
  0x91   : > { %v585_v47 = vpop.permute.xlu0 %584 }
  0x94   : > { %v646_v48 = vpop.permute.xlu1 %645 }
  0x95   : > { %v590_v49 = vpop.permute.xlu0 %589 }
  0x98   : > { %v600_v50 = vpop.permute.xlu1 %599 }
  0x99   : > { %v6537_v51 = vpop.permute.xlu0 %594 }
  0x9c   : > { %v6539_v52 = vpop.permute.xlu1 %655 }
  0x9d   : > { %v6541_v53 = vpop.permute.xlu0 %650 }
  0xa0   : > { %v6543_v54 = vpop.permute.xlu1 %609 }
  0xa1   : > { %v6545_v55 = vpop.permute.xlu0 %604 }
  0xa4   : > { %v6547_v59 = vpop.permute.xlu1 %665 }
  0xa5   : > { %v6549_v61 = vpop.permute.xlu0 %660 }
  0xa8   : > { %v6553_v7 = vpop.permute.xlu1 %619 }
  0xa9   : > { %v6556_v11 = vpop.permute.xlu0 %614 }
  0xac   : > { %v676_v24 = vpop.permute.xlu1 %675 }
  0xad   : > { %v671_v27 = vpop.permute.xlu0 %670 }
  0xf9   : > { %v5606_v56 = vpop.f32.mrb[0].mxu0 }
  0xfa   : > { %v623_v57 = vmul.f32 %v5606_v56, %v590_v49  ;;  %v535_v58 = vpop.f32.mrb[1].mxu0 }
  0xfb   : > { %v622_v60 = vmul.f32 %v585_v47, %v535_v58 }
  0xfc   : > { %v679_v62 = vadd.f32 %v646_v48, %v623_v57 }
  0xfd   : > { %v678_v63 = vadd.f32 %v641_v46, %v622_v60  ;;  %v5609_v0 = vpop.f32.mrb[2].mxu0 }
  0xfe   : > { %v687_v1 = vmax.f32 %v679_v62, 0.0  ;;  %v625_v2 = vmul.f32 %v5609_v0, %v600_v50  ;;  %v545_v3 = vpop.f32.mrb[3].mxu0 }
  0xff   : > { %v686_v4 = vmax.f32 %v678_v63, 0.0  ;;  %v624_v5 = vmul.f32 %v6537_v51, %v545_v3 }
 0x100   : > { %v681_v6 = vadd.f32 %v6539_v52, %v625_v2 }
 0x101   : > { %v680_v8 = vadd.f32 %v6541_v53, %v624_v5  ;;  %v5612_v9 = vpop.f32.mrb[4].mxu0  ;;  %v5961_v10 = vpack.c.bf16 %v687_v1, %v686_v4 }
 0x102   : > { %v689_v12 = vmax.f32 %v681_v6, 0.0  ;;  %v627_v13 = vmul.f32 %v5612_v9, %v6543_v54  ;;  %v555_v14 = vpop.f32.mrb[5].mxu0 }
 0x103   : > { %v688_v15 = vmax.f32 %v680_v8, 0.0  ;;  %v626_v16 = vmul.f32 %v6545_v55, %v555_v14  ;;  %5962 = vmatprep.subr.bf16.mxu1 %v5961_v10 }
 0x104   : > { %v683_v17 = vadd.f32 %v6547_v59, %v627_v13  ;;  %5964 = vmatpush3.bf16.msra.mxu1 %v5961_v10 }
 0x105   : > { %v682_v18 = vadd.f32 %v6549_v61, %v626_v16  ;;  %v5615_v19 = vpop.f32.mrb[6].mxu0  ;;  %v5965_v20 = vpack.c.bf16 %v689_v12, %v688_v15  ;;  %v808_v12 = vpop.permute.xlu1 %807 }
 0x106   : > { %v691_v21 = vmax.f32 %v683_v17, 0.0  ;;  %v629_v22 = vmul.f32 %v5615_v19, %v6553_v7  ;;  %v565_v23 = vpop.f32.mrb[7].mxu0 }
 0x107   : > { %v690_v25 = vmax.f32 %v682_v18, 0.0  ;;  %v628_v26 = vmul.f32 %v6556_v11, %v565_v23  ;;  %5966 = vmatprep.subr.bf16.mxu1 %v5965_v20 }
 0x108   : > { %v685_v28 = vadd.f32 %v676_v24, %v629_v22  ;;  %5968 = vmatpush3.bf16.msra.mxu1 %v5965_v20 }
 0x109   : > { %v684_v29 = vadd.f32 %v671_v27, %v628_v26  ;;  %v5648_v30 = vpop.f32.mrb[8].mxu0  ;;  %v5969_v31 = vpack.c.bf16 %v691_v21, %v690_v25  ;;  %v813_v15 = vpop.permute.xlu1 %812 }
 0x10a   : > { %v693_v32 = vmax.f32 %v685_v28, 0.0  ;;  %v966_v33 = vmul.f32 %v5648_v30, %v590_v49  ;;  %v926_v34 = vpop.f32.mrb[9].mxu0 }
 0x10b   : > { %v692_v35 = vmax.f32 %v684_v29, 0.0  ;;  %v965_v36 = vmul.f32 %v926_v34, %v585_v47  ;;  %5970 = vmatprep.subr.bf16.mxu1 %v5969_v31  ;;  %v695_v47 = vld [vmem:[%s7455_s5 + $0x8] sm:$0xff] }
 0x10c   : > { %v974_v37 = vadd.f32 %v966_v33, %v646_v48  ;;  %5972 = vmatpush3.bf16.msra.mxu1 %v5969_v31 }
 0x10d   : > { %v973_v38 = vadd.f32 %v965_v36, %v641_v46  ;;  %v5651_v39 = vpop.f32.mrb[10].mxu0  ;;  %v5973_v40 = vpack.c.bf16 %v693_v32, %v692_v35  ;;  %v818_v26 = vpop.permute.xlu1 %817 }
 0x10e   : > { %v982_v41 = vmax.f32 %v974_v37, 0.0  ;;  %v968_v42 = vmul.f32 %v5651_v39, %v600_v50  ;;  %v936_v43 = vpop.f32.mrb[11].mxu0  ;;  %v696_v50 = vld [vmem:[%s7455_s5 + $0x10] sm:$0xff] }
 0x10f   : > { %v981_v44 = vmax.f32 %v973_v38, 0.0  ;;  %v967_v56 = vmul.f32 %v936_v43, %v6537_v51  ;;  %5974 = vmatprep.subr.bf16.mxu1 %v5973_v40 }
 0x110   : > { %v976_v57 = vadd.f32 %v968_v42, %v6539_v52  ;;  %5976 = vmatpush3.bf16.msra.mxu1 %v5973_v40 }
 0x111   : > { %v975_v48 = vadd.f32 %v967_v56, %v6541_v53  ;;  %v5654_v49 = vpop.f32.mrb[12].mxu0  ;;  %v5985_v46 = vpack.c.bf16 %v982_v41, %v981_v44  ;;  %v697_v53 = vld [vmem:[%s7455_s5 + $0x18] sm:$0xff]  ;;  %v846_v31 = vpop.permute.xlu1 %845 }
 0x112   : > { %v984_v58 = vmax.f32 %v976_v57, 0.0  ;;  %v970_v60 = vmul.f32 %v5654_v49, %v6543_v54  ;;  %v946_v51 = vpop.f32.mrb[13].mxu0 }
 0x113   : > { %v983_v62 = vmax.f32 %v975_v48, 0.0  ;;  %v969_v52 = vmul.f32 %v946_v51, %v6545_v55  ;;  %5633 = vmatmul.mubr.msk.f32.vlgmr.msra.gmra.mrb[0].mxu1 %vm698_vm1, %v695_v47  ;;  %5986 = vmatprep.subr.bf16.mxu1 %v5985_v46 }
 0x114   : > { %v978_v63 = vadd.f32 %v970_v60, %v6547_v59  ;;  %5988 = vmatpush3.bf16.msra.mxu1 %v5985_v46  ;;  %5635 = vmatprep.mubr.msk.f32.mxu1 %vm698_vm1, %v696_v50 }
 0x115   : > { %v977_v0 = vadd.f32 %v969_v52, %v6549_v61  ;;  %v5657_v1 = vpop.f32.mrb[14].mxu0  ;;  %v5989_v54 = vpack.c.bf16 %v984_v58, %v983_v62 }
 0x116   : > { %v986_v2 = vmax.f32 %v978_v63, 0.0  ;;  %v972_v3 = vmul.f32 %v5657_v1, %v6553_v7  ;;  %v956_v55 = vpop.f32.mrb[15].mxu0  ;;  %v6287_v7 = vmov 0.0|0.0  }
 0x117   : > { %v985_v4 = vmax.f32 %v977_v0, 0.0  ;;  %v971_v5 = vmul.f32 %v956_v55, %v6556_v11  ;;  %5636 = vmatmul.mubr.msk.f32.gmra.mrb[2].mxu1 %vm698_vm1, %v697_v53  ;;  %5990 = vmatprep.subr.bf16.mxu1 %v5989_v54  ;;  %v803_v11 = vpop.permute.xlu0 %802 }
 0x118   : > { %v980_v59 = vadd.f32 %v972_v3, %v676_v24  ;;  %5992 = vmatpush3.bf16.msra.mxu1 %v5989_v54  ;;  %5674 = vmatprep.mubr.msk.f32.mxu1 %vm698_vm1, %v6533_v45  ;;  %v6289_v45 = vmov 0.0  }
 0x119   : > { %v979_v6 = vadd.f32 %v971_v5, %v671_v27  ;;  %v5993_v8 = vpack.c.bf16 %v986_v2, %v985_v4  ;;  %6001 = vmatprep.subr.bf16.mxu0 %v6287_v7  ;;  %5688 = vmatprep.mubr.msk.f32.mxu0 %vm6288_vm2, %v6289_v45  ;;  %v1432_v5 = vld [vmem:[%s7459_s9] sm:$0xff] }
 0x11a   : > { %v988_v61 = vmax.f32 %v980_v59, 0.0  ;;  %v1436_v59 = vld [vmem:[%s7459_s9 + $0x20] sm:$0xff] }
 0x11b   : > { %v987_v9 = vmax.f32 %v979_v6, 0.0  ;;  %5994 = vmatprep.subr.bf16.mxu1 %v5993_v8  ;;  %v831_v13 = vpop.permute.xlu0 %830 }
 0x11c   : > { %5996 = vmatpush3.bf16.msra.mxu1 %v5993_v8 }
 0x11d   : > { %v5997_v10 = vpack.c.bf16 %v988_v61, %v987_v9 }
 0x11f   : > { %5998 = vmatprep.subr.bf16.mxu1 %v5997_v10  ;;  %v836_v19 = vpop.permute.xlu0 %835 }
 0x120   : > { %6000 = vmatpush3.bf16.msra.mxu1 %v5997_v10 }
 0x123   : > { %5675 = vmatmul.mubr.msk.f32.vlgmr.msra.gmra.mrb[4].mxu1 %vm698_vm1, %v695_v47  ;;  %v841_v27 = vpop.permute.xlu0 %840 }
 0x124   : > { %5677 = vmatprep.mubr.msk.f32.mxu1 %vm698_vm1, %v696_v50 }
 0x127   : > { %5678 = vmatmul.mubr.msk.f32.gmra.mrb[6].mxu1 %vm698_vm1, %v697_v53 }
 0x1e6   : > { %v5634_v14 = vpop.f32.mrb[0].mxu1 }
 0x1e7   : > { %v777_v16 = vpop.f32.mrb[1].mxu1  ;;  %v821_v17 = vmul.f32 %v5634_v14, %v808_v12 }
 0x1e8   : > { %v820_v18 = vmul.f32 %v803_v11, %v777_v16 }
 0x1e9   : > { %v6593_v23 = vadd.f32 %v836_v19, %v821_v17 }
 0x1ea   : > { %v848_v20 = vadd.f32 %v831_v13, %v820_v18  ;;  %v5637_v21 = vpop.f32.mrb[2].mxu1 }
 0x1eb   : > { %v787_v22 = vpop.f32.mrb[3].mxu1  ;;  %v853_v28 = vmax.f32 %v6593_v23, 0.0  ;;  %v823_v29 = vmul.f32 %v5637_v21, %v818_v26 }
 0x1ec   : > { %v852_v24 = vmax.f32 %v848_v20, 0.0  ;;  %v822_v25 = vmul.f32 %v813_v15, %v787_v22 }
 0x1ed   : > { %v6601_v32 = vadd.f32 %v846_v31, %v823_v29  ;;  %v1422_v29 = vld [vmem:[%s7458_s8 + $0x10] sm:$0xff] }
 0x1ee   : > { %1086 = vxpose.xlu0.b32.start [1/4] (short) (narrow) %v852_v24, 8  ;;  %5693 = vmatprep.mubr.msk.f32.mxu1 %vm1222_vm3, %v852_v24  ;;  %v6597_v30 = vadd.f32 %v841_v27, %v822_v25 }
 0x1ef   : > { %v855_v37 = vmax.f32 %v6601_v32, 0.0  ;;  %v1425_v32 = vld [vmem:[%s7458_s8 + $0x28] sm:$0xff] }
 0x1f0   : > { %v854_v33 = vmax.f32 %v6597_v30, 0.0  ;;  %v1423_v30 = vld [vmem:[%s7458_s8 + $0x18] sm:$0xff] }
 0x1f2   : > { %1087 = vxpose.xlu0.b32.cont [2/4] (short) (narrow) %v853_v28, 8 }
 0x1f6   : > { %v5676_v34 = vpop.f32.mrb[4].mxu1  ;;  %1088 = vxpose.xlu0.b32.cont [3/4] (short) (narrow) %v854_v33, 8 }
 0x1f7   : > { %v1075_v35 = vmul.f32 %v5676_v34, %v808_v12  ;;  %v1055_v36 = vpop.f32.mrb[5].mxu1 }
 0x1f8   : > { %v1074_v38 = vmul.f32 %v1055_v36, %v803_v11 }
 0x1f9   : > { %v6605_v39 = vadd.f32 %v1075_v35, %v836_v19  ;;  %v1420_v19 = vld [vmem:[%s7458_s8] sm:$0xff] }
 0x1fa   : > { %v1078_v40 = vadd.f32 %v1074_v38, %v831_v13  ;;  %v5679_v41 = vpop.f32.mrb[6].mxu1  ;;  %1089 = vxpose.xlu0.b32.end [4/4] (short) (narrow) %v855_v37, 8 }
 0x1fb   : > { %v1083_v42 = vmax.f32 %v6605_v39, 0.0  ;;  %v1077_v43 = vmul.f32 %v5679_v41, %v818_v26  ;;  %v1065_v44 = vpop.f32.mrb[7].mxu1 }
 0x1fc   : > { %v1082_v56 = vmax.f32 %v1078_v40, 0.0  ;;  %v1076_v57 = vmul.f32 %v1065_v44, %v813_v15 }
 0x1fd   : > { %v6608_v47 = vadd.f32 %v1077_v43, %v846_v31  ;;  %v1424_v31 = vld [vmem:[%s7458_s8 + $0x20] sm:$0xff] }
 0x1fe   : > { %v6002_v48 = vpack.c.bf16 %v1083_v42, %v1082_v56  ;;  %v6612_v49 = vadd.f32 %v1076_v57, %v841_v27  ;;  %v1434_v57 = vld [vmem:[%s7459_s9 + $0x10] sm:$0xff] }
 0x1ff   : > { %v1085_v46 = vmax.f32 %v6608_v47, 0.0 }
 0x200   : > { %v1084_v50 = vmax.f32 %v6612_v49, 0.0  ;;  %6003 = vmatpush3.bf16.msra.mxu0 %v6002_v48  ;;  %v1437_v48 = vld [vmem:[%s7459_s9 + $0x28] sm:$0xff] }
 0x201   : > { %6004 = vmatprep.subr.bf16.mxu0 %v6287_v7 }
 0x202   : > { %v6005_v58 = vpack.c.bf16 %v1085_v46, %v1084_v50 }
 0x204   : > { %6006 = vmatpush3.bf16.msra.mxu0 %v6005_v58 }
 0x26e   : > { %v1102_v60 = vpop.trf.xlu0 }
 0x26f   : > { %5689 = vmatmul.mubr.msk.f32.vlgmr.msra.gmra.mrb[16].mxu0 %vm444_vm0, %v1102_v60 }
 0x270   : > { %5701 = vmatprep.mubr.msk.f32.mxu0 %vm1192_vm4, %v1082_v56 }
 0x342   : > { %v1187_v51 = vpop.f32.mrb[16].mxu0 }
 0x343   : > { %v1191_v62 = vmul.f32 0.17677669, %v1187_v51  ;;  %v5690_v52 = vpop.f32.mrb[17].mxu0 }
 0x344   : > { %v1426_v52 = vld [vmem:[%s7458_s8 + $0x30] sm:$0xff] }
 0x345   : > { %v1193_v63 = vsel %vm1192_vm4, %v1191_v62, -inf }
 0x346   : > { %1212 = vmax.xlane.f32.xlu1 %v1193_v63  ;;  %v1194_v53 = vrot.slane %v1193_v63, 4 }
 0x348   : > { %v1195_v0 = vmax.f32 %v1193_v63, %v1194_v53  ;;  %v1427_v63 = vld [vmem:[%s7458_s8 + $0x38] sm:$0xff]  ;;  %v1428_v53 = vld [vmem:[%s7458_s8 + $0x40] sm:$0xff] }
 0x34a   : > { %v1196_v1 = vrot.slane %v1195_v0, 2 }
 0x34c   : > { %v1197_v54 = vmax.f32 %v1195_v0, %v1196_v1  ;;  %v1429_v0 = vld [vmem:[%s7458_s8 + $0x48] sm:$0xff] }
 0x34e   : > { %v1198_v2 = vrot.slane %v1197_v54, 1 }
 0x350   : > { %v1199_v3 = vmax.f32 %v1197_v54, %v1198_v2 }
 0x352   : > { %v1200_v55 = vsub.f32 %v1191_v62, %v1199_v3 }
 0x354   : > { %v1201_v4 = vmul.f32 1.442695, %v1200_v55 }
 0x356   : > { %6112 = vpow2.f32 %v1201_v4 }
 0x357   : > { %1446 = vperm.xlu1 %6111, %v1432_v5   ;;  %v1433_v5 = vld [vmem:[%s7459_s9 + $0x8] sm:$0xff] }
 0x35b   : > { %1466 = vperm.xlu1 %6111, %v1436_v59  }
 0x360   : > { %v6113_v6 = vpop.eup %6112 }
 0x361   : > { %v1203_v8 = vsel %vm1192_vm4, %v6113_v6, 0.0 }
 0x362   : > { %v1204_v61 = vrot.slane %v1203_v8, 4 }
 0x364   : > { %v1205_v9 = vadd.f32 %v1204_v61, %v1203_v8 }
 0x366   : > { %v1206_v10 = vrot.slane %v1205_v9, 2 }
 0x368   : > { %v1207_v11 = vadd.f32 %v1206_v10, %v1205_v9 }
 0x36a   : > { %v1208_v12 = vrot.slane %v1207_v11, 1 }
 0x36c   : > { %v1209_v13 = vadd.f32 %v1208_v12, %v1207_v11 }
 0x36e   : > { %6114 = vrcp.f32 %v1209_v13 }
 0x378   : > { %v6115_v14 = vpop.eup %6114 }
 0x379   : > { %v1211_v15 = vmul.f32 %v6115_v14, %v6113_v6 }
 0x37b   : > { %5691 = vmatprep.subr.mxu1 %v1211_v15 }
 0x37c   : > { %5692 = vmatpush3.msra.mxu1 %v1211_v15  ;;  %v1438_v15 = vld [vmem:[%s7459_s9 + $0x30] sm:$0xff] }
 0x37d   : > { %5694 = vmatmul.mubr.msk.f32.vlgmr.msra.gmra.mrb[8].mxu1 %vm1222_vm3, %v853_v28  ;;  %v1421_v28 = vld [vmem:[%s7458_s8 + $0x8] sm:$0xff] }
 0x37e   : > { %5696 = vmatprep.mubr.msk.f32.mxu1 %vm1222_vm3, %v854_v33 }
 0x381   : > { %5697 = vmatmul.mubr.msk.f32.gmra.mrb[10].mxu1 %vm1222_vm3, %v855_v37 }
 0x382   : > { %5715 = vmatprep.mubr.msk.f32.mxu1 %vm444_vm0, %v1420_v19 }
 0x3d3   : > { %v1213_v16 = vpop.xlane.xlu1 %1212 }
 0x3d4   : > { %v1214_v17 = vsub.f32 %v1191_v62, %v1213_v16 }
 0x3d6   : > { %v1215_v18 = vmul.f32 1.442695, %v1214_v17 }
 0x3d7   : > { %v1447_v37 = vpop.permute.xlu1 %1446 }
 0x3d8   : > { %6116 = vpow2.f32 %v1215_v18  ;;  %v1440_v18 = vld [vmem:[%s7459_s9 + $0x40] sm:$0xff] }
 0x3e2   : > { %v6117_v20 = vpop.eup %6116 }
 0x3e3   : > { %v1217_v21 = vsel %vm1192_vm4, %v6117_v20, 0.0 }
 0x3e4   : > { %1218 = vadd.xlane.f32.xlu0 %v1217_v21 }
 0x450   : > { %v6641_v22 = vpop.f32.mrb[8].mxu1 }
 0x451   : > { %v6643_v23 = vpop.f32.mrb[9].mxu1 }
 0x452   : > { %v6007_v24 = vpack.c.bf16 %v6641_v22, %v6643_v23 }
 0x454   : > { %v6647_v25 = vpop.f32.mrb[10].mxu1  ;;  %6008 = vmatprep.subr.bf16.mxu1 %v6007_v24 }
 0x455   : > { %v6649_v26 = vpop.f32.mrb[11].mxu1  ;;  %6010 = vmatpush3.bf16.msra.mxu1 %v6007_v24 }
 0x456   : > { %v6011_v27 = vpack.c.bf16 %v6647_v25, %v6649_v26 }
 0x458   : > { %6012 = vmatprep.subr.bf16.mxu1 %v6011_v27 }
 0x459   : > { %6014 = vmatpush3.bf16.msra.mxu1 %v6011_v27 }
 0x45c   : > { %5716 = vmatmul.mubr.msk.f32.vlgmr.msra.gmra.mrb[12].mxu1 %vm444_vm0, %v1421_v28 }
 0x45d   : > { %5718 = vmatprep.mubr.msk.f32.mxu1 %vm444_vm0, %v1422_v29  ;;  %v1430_v29 = vld [vmem:[%s7458_s8 + $0x50] sm:$0xff] }
 0x460   : > { %5719 = vmatmul.mubr.msk.f32.gmra.mrb[14].mxu1 %vm444_vm0, %v1423_v30  ;;  %v1431_v30 = vld [vmem:[%s7458_s8 + $0x58] sm:$0xff] }
 0x461   : > { %5721 = vmatprep.mubr.msk.f32.mxu1 %vm444_vm0, %v1424_v31  ;;  %v1439_v31 = vld [vmem:[%s7459_s9 + $0x38] sm:$0xff] }
 0x464   : > { %5722 = vmatmul.mubr.msk.f32.gmra.mrb[16].mxu1 %vm444_vm0, %v1425_v32  ;;  %v1435_v32 = vld [vmem:[%s7459_s9 + $0x18] sm:$0xff] }
 0x465   : > { %5724 = vmatprep.mubr.msk.f32.mxu1 %vm444_vm0, %v1426_v52 }
 0x468   : > { %5725 = vmatmul.mubr.msk.f32.gmra.mrb[18].mxu1 %vm444_vm0, %v1427_v63 }
 0x469   : > { %5727 = vmatprep.mubr.msk.f32.mxu1 %vm444_vm0, %v1428_v53 }
 0x46c   : > { %5728 = vmatmul.mubr.msk.f32.gmra.mrb[20].mxu1 %vm444_vm0, %v1429_v0 }
 0x46d   : > { %5730 = vmatprep.mubr.msk.f32.mxu1 %vm444_vm0, %v1430_v29 }
 0x470   : > { %5731 = vmatmul.mubr.msk.f32.gmra.mrb[22].mxu1 %vm444_vm0, %v1431_v30 }
 0x471   : > { %v1219_v33 = vpop.xlane.xlu0 %1218 }
 0x472   : > { %6118 = vrcp.f32 %v1219_v33 }
 0x47c   : > { %v6119_v34 = vpop.eup %6118 }
 0x47d   : > { %v1221_v35 = vmul.f32 %v6119_v34, %v6117_v20 }
 0x47f   : > { %5699 = vmatprep.subr.msk.mxu0 %vm1192_vm4, %v1221_v35 }
 0x480   : > { %5700 = vmatpush3.xpose.msk.msra.mxu0 %vm1192_vm4, %v1221_v35 }
 0x483   : > { %5702 = vmatmul.mubr.msk.f32.vlgmr.msra.gmra.mrb[18].mxu0 %vm1192_vm4, %v1083_v42  ;;  %v1467_v42 = vpop.permute.xlu1 %1466 }
 0x484   : > { %5704 = vmatprep.mubr.msk.f32.mxu0 %vm1192_vm4, %v1084_v50 }
 0x487   : > { %5705 = vmatmul.mubr.msk.f32.gmra.mrb[20].mxu0 %vm1192_vm4, %v1085_v46 }
 0x52f   : > { %v6684_v36 = vpop.f32.mrb[12].mxu1 }
 0x530   : > { %v1606_v38 = vpop.f32.mrb[13].mxu1 }
 0x531   : > { %v1607_v40 = vadd.f32 %v1606_v38, %v1447_v37 }
 0x533   : > { %1665 = vxpose.xlu1.b32.start.end [1/1] (short) (narrow) %v1607_v40, 16  ;;  %v6686_v41 = vpop.f32.mrb[14].mxu1 }
 0x534   : > { %v6688_v43 = vpop.f32.mrb[15].mxu1 }
 0x537   : > { %v6690_v39 = vpop.f32.mrb[16].mxu1 }
 0x538   : > { %v1626_v44 = vpop.f32.mrb[17].mxu1 }
 0x539   : > { %v1627_v56 = vadd.f32 %v1626_v44, %v1467_v42 }
 0x53b   : > { %5733 = vmatprep.subr.mxu0 %v1627_v56  ;;  %v5726_v16 = vpop.f32.mrb[18].mxu1 }
 0x53c   : > { %5734 = vmatpush3.msra.mxu0 %v1627_v56  ;;  %v1636_v17 = vpop.f32.mrb[19].mxu1 }
 0x53d   : > { %6015 = vmatprep.subr.bf16.mxu0 %v6287_v7 }
 0x53f   : > { %v6748_v19 = vpop.f32.mrb[20].mxu1 }
 0x540   : > { %v1646_v20 = vpop.f32.mrb[21].mxu1 }
 0x555   : > { %1456 = vperm.xlu1 %6111, %v1434_v57  }
 0x556   : > { %v6696_v47 = vpop.f32.mrb[18].mxu0 }
 0x557   : > { %v6701_v49 = vpop.f32.mrb[19].mxu0 }
 0x558   : > { %v6705_v46 = vpack.c.bf16 %v6696_v47, %v6701_v49 }
 0x559   : > { %1471 = vperm.xlu1 %6111, %v1437_v48  }
 0x55a   : > { %v6707_v50 = vpop.f32.mrb[20].mxu0 }
 0x55b   : > { %v6709_v58 = vpop.f32.mrb[21].mxu0 }
 0x55c   : > { %v6713_v60 = vpack.c.bf16 %v6707_v50, %v6709_v58 }
 0x5b3   : > { %v1681_v51 = vpop.trf.xlu1 }
 0x5b4   : > { %5735 = vmatprep.mubr.msk.f32.mxu0 %vm1222_vm3, %v1681_v51 }
 0x5b7   : > { %v1682_v62 = vpop.trf.xlu1 }
 0x5b8   : > { %5736 = vmatmul.mubr.msk.f32.vlgmr.msra.gmra.mrb[22].mxu0 %vm1222_vm3, %v1682_v62 }
 0x5b9   : > { %5742 = vmatprep.mubr.msk.f32.mxu0 %vm6288_vm2, %v6289_v45 }
 0x5d4   : > { %v1457_v21 = vpop.permute.xlu1 %1456 }
 0x5d5   : > { %v1617_v27 = vadd.f32 %v6688_v43, %v1457_v21 }
 0x5d8   : > { %v1472_v33 = vpop.permute.xlu1 %1471 }
 0x5d9   : > { %v1632_v57 = vadd.f32 %v6690_v39, %v1472_v33  ;;  %v1441_v33 = vld [vmem:[%s7459_s9 + $0x48] sm:$0xff] }
 0x68b   : > { %v5737_v1 = vpop.f32.mrb[22].mxu0 }
 0x68c   : > { %v1769_v54 = vpop.f32.mrb[23].mxu0  ;;  %v1779_v3 = vmul.f32 0.17677669, %v5737_v1  ;;  %v6784_v1 = vpop.f32.mrb[22].mxu1 }
 0x68d   : > { %v1778_v2 = vmul.f32 0.17677669, %v1769_v54  ;;  %v6786_v54 = vpop.f32.mrb[23].mxu1 }
 0x68e   : > { %v1783_v4 = vsel %vm1192_vm4, %v1779_v3, -inf }
 0x68f   : > { %v1780_v55 = vsel %vm1192_vm4, %v1778_v2, -inf }
 0x690   : > { %1781 = vmax.xlane.f32.xlu0 %v1780_v55 }
 0x694   : > { %1784 = vmax.xlane.f32.xlu0 %v1783_v4 }
 0x6aa   : > { %1451 = vperm.xlu0 %6110, %v1433_v5  }
 0x71d   : > { %v1782_v59 = vpop.xlane.xlu0 %1781 }
 0x71e   : > { %v1786_v6 = vsub.f32 %v1778_v2, %v1782_v59 }
 0x720   : > { %v1788_v8 = vmul.f32 1.442695, %v1786_v6 }
 0x721   : > { %v1785_v61 = vpop.xlane.xlu0 %1784 }
 0x722   : > { %6120 = vpow2.f32 %v1788_v8  ;;  %v1787_v9 = vsub.f32 %v1779_v3, %v1785_v61 }
 0x724   : > { %v1790_v10 = vmul.f32 1.442695, %v1787_v9 }
 0x726   : > { %6122 = vpow2.f32 %v1790_v10 }
 0x729   : > { %v1452_v24 = vpop.permute.xlu0 %1451 }
 0x72a   : > { %v1612_v28 = vadd.f32 %v6684_v36, %v1452_v24 }
 0x72c   : > { %v6121_v11 = vpop.eup %6120 }
 0x72d   : > { %v1792_v12 = vsel %vm1192_vm4, %v6121_v11, 0.0 }
 0x72e   : > { %1793 = vadd.xlane.f32.xlu1 %v1792_v12 }
 0x730   : > { %v6123_v13 = vpop.eup %6122 }
 0x731   : > { %v1795_v14 = vsel %vm1192_vm4, %v6123_v13, 0.0 }
 0x732   : > { %1796 = vadd.xlane.f32.xlu0 %v1795_v14 }
 0x73f   : > { %1476 = vperm.xlu1 %6111, %v1438_v15  }
 0x748   : > { %1486 = vperm.xlu0 %6110, %v1440_v18  }
 0x766   : > { %2097 = vxpose.xlu0.b32.start.end [1/1] (short) (narrow) %v1617_v27, 16 }
 0x768   : > { %1881 = vxpose.xlu1.b32.start.end [1/1] (short) (narrow) %v1612_v28, 16 }
 0x78a   : > { %1481 = vperm.xlu1 %6111, %v1439_v31  }
 0x793   : > { %1461 = vperm.xlu0 %6110, %v1435_v32  }
 0x7bb   : > { %v1794_v34 = vpop.xlane.xlu1 %1793 }
 0x7bc   : > { %6124 = vrcp.f32 %v1794_v34 }
 0x7bf   : > { %v1477_v35 = vpop.permute.xlu1 %1476  ;;  %v1797_v36 = vpop.xlane.xlu0 %1796 }
 0x7c0   : > { %v1637_v37 = vadd.f32 %v1636_v17, %v1477_v35  ;;  %6126 = vrcp.f32 %v1797_v36 }
 0x7c2   : > { %5757 = vmatprep.subr.mxu1 %v1637_v37 }
 0x7c3   : > { %5758 = vmatpush3.msra.mxu1 %v1637_v37 }
 0x7c6   : > { %v6125_v38 = vpop.eup %6124 }
 0x7c7   : > { %v1799_v43 = vmul.f32 %v6125_v38, %v6121_v11  ;;  %v1487_v48 = vpop.permute.xlu0 %1486 }
 0x7c8   : > { %v1647_v51 = vadd.f32 %v1646_v20, %v1487_v48 }
 0x7ca   : > { %v6127_v40 = vpop.eup %6126 }
 0x7cb   : > { %v1801_v42 = vmul.f32 %v6127_v40, %v6123_v13 }
 0x7cd   : > { %v6016_v56 = vpack.c.bf16 %v1801_v42, %v1799_v43 }
 0x7cf   : > { %6018 = vmatpush3.bf16.xpose.msk.msra.mxu0 %vm6768_vm5, %v6016_v56 }
 0x7d0   : > { %5745 = vmatprep.subr.mxu0 %v1632_v57 }
 0x7d6   : > { %5743 = vmatmul.mubr.msk.f32.vlgmr.msra.gmra.mrb[24].mxu0 %vm1192_vm4, %v1647_v51 }
 0x7d7   : > { %5746 = vmatpush3.msra.mxu0 %v1632_v57  ;;  %v1442_v57 = vld [vmem:[%s7459_s9 + $0x50] sm:$0xff] }
 0x7d8   : > { %6019 = vmatprep.subr.bf16.mxu0 %v6287_v7 }
 0x7e6   : > { %v2113_v62 = vpop.trf.xlu0 }
 0x7e7   : > { %5759 = vmatprep.mubr.msk.f32.mxu1 %vm1222_vm3, %v2113_v62 }
 0x7e8   : > { %v1897_v52 = vpop.trf.xlu1 }
 0x7e9   : > { %5747 = vmatprep.mubr.msk.f32.mxu0 %vm1222_vm3, %v1897_v52 }
 0x7ea   : > { %v2114_v63 = vpop.trf.xlu0 }
 0x7eb   : > { %5760 = vmatmul.mubr.msk.f32.vlgmr.msra.gmra.mrb[24].mxu1 %vm1222_vm3, %v2114_v63 }
 0x7ec   : > { %v1898_v39 = vpop.trf.xlu1 }
 0x7ed   : > { %5748 = vmatmul.mubr.msk.f32.vlgmr.msra.gmra.mrb[26].mxu0 %vm1222_vm3, %v1898_v39 }
 0x7ee   : > { %5754 = vmatprep.mubr.msk.f32.mxu0 %vm6288_vm2, %v6289_v45 }
 0x809   : > { %v1482_v53 = vpop.permute.xlu1 %1481 }
 0x80a   : > { %v1642_v0 = vadd.f32 %v5726_v16, %v1482_v53 }
 0x80c   : > { %5769 = vmatprep.subr.mxu1 %v1642_v0 }
 0x80d   : > { %5770 = vmatpush3.msra.mxu1 %v1642_v0 }
 0x80e   : > { %6027 = vmatprep.subr.bf16.mxu1 %v6287_v7 }
 0x812   : > { %v1462_v14 = vpop.permute.xlu0 %1461 }
 0x813   : > { %v1622_v15 = vadd.f32 %v6686_v41, %v1462_v14 }
 0x8a9   : > { %v1877_v2 = vpop.f32.mrb[24].mxu0 }
 0x8aa   : > { %v6789_v3 = vadd.f32 %v1877_v2, %v6643_v23  ;;  %v5744_v55 = vpop.f32.mrb[25].mxu0 }
 0x8be   : > { %v5761_v4 = vpop.f32.mrb[24].mxu1 }
 0x8bf   : > { %v2201_v5 = vpop.f32.mrb[25].mxu1  ;;  %v2211_v11 = vmul.f32 0.17677669, %v5761_v4 }
 0x8c0   : > { %v5749_v59 = vpop.f32.mrb[26].mxu0  ;;  %v2210_v61 = vmul.f32 0.17677669, %v2201_v5 }
 0x8c1   : > { %v1995_v6 = vmul.f32 0.17677669, %v5749_v59  ;;  %v1985_v8 = vpop.f32.mrb[27].mxu0  ;;  %v2215_v23 = vsel %vm1192_vm4, %v2211_v11, -inf }
 0x8c2   : > { %v1994_v9 = vmul.f32 0.17677669, %v1985_v8  ;;  %v2212_v13 = vsel %vm1192_vm4, %v2210_v61, -inf }
 0x8c3   : > { %v1999_v10 = vsel %vm1192_vm4, %v1995_v6, -inf }
 0x8c4   : > { %2000 = vmax.xlane.f32.xlu0 %v1999_v10  ;;  %v1996_v12 = vsel %vm1192_vm4, %v1994_v9, -inf }
 0x8c5   : > { %1997 = vmax.xlane.f32.xlu1 %v1996_v12  ;;  %v5280_v12 = vld [vmem:[%s7458_s8 + $0x60] sm:$0xff] }
 0x8c8   : > { %2213 = vmax.xlane.f32.xlu0 %v2212_v13 }
 0x8c9   : > { %2216 = vmax.xlane.f32.xlu1 %v2215_v23 }
 0x8f5   : > { %2313 = vxpose.xlu0.b32.start.end [1/1] (short) (narrow) %v1622_v15, 16  ;;  %v5281_v15 = vld [vmem:[%s7458_s8 + $0x68] sm:$0xff] }
 0x951   : > { %v2001_v16 = vpop.xlane.xlu0 %2000 }
 0x952   : > { %v1998_v17 = vpop.xlane.xlu1 %1997  ;;  %v2003_v35 = vsub.f32 %v1995_v6, %v2001_v16  ;;  %v5283_v16 = vld [vmem:[%s7458_s8 + $0x78] sm:$0xff] }
 0x953   : > { %v2002_v37 = vsub.f32 %v1994_v9, %v1998_v17  ;;  %v5285_v17 = vld [vmem:[%s7458_s8 + $0x88] sm:$0xff] }
 0x954   : > { %v2006_v36 = vmul.f32 1.442695, %v2003_v35 }
 0x955   : > { %v2214_v18 = vpop.xlane.xlu0 %2213  ;;  %v2004_v38 = vmul.f32 1.442695, %v2002_v37  ;;  %v1443_v37 = vld [vmem:[%s7459_s9 + $0x58] sm:$0xff] }
 0x956   : > { %v2218_v20 = vsub.f32 %v2210_v61, %v2214_v18  ;;  %v2217_v21 = vpop.xlane.xlu1 %2216  ;;  %v5292_v18 = vld [vmem:[%s7459_s9 + $0x60] sm:$0xff] }
 0x957   : > { %v2219_v24 = vsub.f32 %v2211_v11, %v2217_v21  ;;  %v5287_v21 = vld [vmem:[%s7458_s8 + $0x98] sm:$0xff] }
 0x958   : > { %v2220_v27 = vmul.f32 1.442695, %v2218_v20  ;;  %v5286_v20 = vld [vmem:[%s7458_s8 + $0x90] sm:$0xff] }
 0x959   : > { %v2222_v28 = vmul.f32 1.442695, %v2219_v24  ;;  %v5288_v24 = vld [vmem:[%s7458_s8 + $0xa0] sm:$0xff] }
 0x95a   : > { %6128 = vpow2.f32 %v2220_v27  ;;  %v5289_v27 = vld [vmem:[%s7458_s8 + $0xa8] sm:$0xff] }
 0x95b   : > { %6130 = vpow2.f32 %v2222_v28 }
 0x95c   : > { %6132 = vpow2.f32 %v2006_v36 }
 0x95d   : > { %6134 = vpow2.f32 %v2004_v38  ;;  %v5296_v38 = vld [vmem:[%s7459_s9 + $0x80] sm:$0xff] }
 0x964   : > { %v6129_v29 = vpop.eup %6128 }
 0x965   : > { %v2224_v30 = vsel %vm1192_vm4, %v6129_v29, 0.0  ;;  %v6131_v31 = vpop.eup %6130 }
 0x966   : > { %2225 = vadd.xlane.f32.xlu1 %v2224_v30  ;;  %v2227_v32 = vsel %vm1192_vm4, %v6131_v31, 0.0  ;;  %v6133_v40 = vpop.eup %6132 }
 0x967   : > { %v2011_v43 = vsel %vm1192_vm4, %v6133_v40, 0.0  ;;  %v6135_v42 = vpop.eup %6134 }
 0x968   : > { %v2008_v56 = vsel %vm1192_vm4, %v6135_v42, 0.0 }
 0x96a   : > { %2228 = vadd.xlane.f32.xlu1 %v2227_v32 }
 0x975   : > { %v2329_v41 = vpop.trf.xlu0 }
 0x976   : > { %5771 = vmatprep.mubr.msk.f32.mxu1 %vm1222_vm3, %v2329_v41 }
 0x979   : > { %v2330_v34 = vpop.trf.xlu0 }
 0x97a   : > { %5772 = vmatmul.mubr.msk.f32.vlgmr.msra.gmra.mrb[26].mxu1 %vm1222_vm3, %v2330_v34 }
 0x97b   : > { %1491 = vperm.xlu1 %6111, %v1441_v33   ;;  %5778 = vmatprep.mubr.msk.f32.mxu1 %vm6288_vm2, %v6289_v45 }
 0x99f   : > { %2012 = vadd.xlane.f32.xlu1 %v2011_v43 }
 0x9a3   : > { %2009 = vadd.xlane.f32.xlu1 %v2008_v56  ;;  %v2533_v56 = vsel %vm1192_vm4, %v6789_v3, 0.0 }
 0x9b4   : > { %1496 = vperm.xlu1 %6111, %v1442_v57  }
 0x9f3   : > { %v2226_v48 = vpop.xlane.xlu1 %2225 }
 0x9f7   : > { %v2229_v51 = vpop.xlane.xlu1 %2228 }
 0x9fb   : > { %v1492_v62 = vpop.permute.xlu1 %1491 }
 0x9fc   : > { %v1652_v8 = vadd.f32 %v6748_v19, %v1492_v62 }
 0xa2c   : > { %v2013_v52 = vpop.xlane.xlu1 %2012 }
 0xa2d   : > { %6136 = vrcp.f32 %v2013_v52 }
 0xa30   : > { %v2010_v63 = vpop.xlane.xlu1 %2009 }
 0xa31   : > { %6138 = vrcp.f32 %v2010_v63 }
 0xa32   : > { %6140 = vrcp.f32 %v2229_v51 }
 0xa33   : > { %6142 = vrcp.f32 %v2226_v48 }
 0xa34   : > { %v1497_v9 = vpop.permute.xlu1 %1496 }
 0xa35   : > { %v1657_v10 = vadd.f32 %v6786_v54, %v1497_v9  ;;  %v5300_v9 = vld [vmem:[%s7459_s9 + $0xa0] sm:$0xff] }
 0xa37   : > { %v6137_v39 = vpop.eup %6136 }
 0xa38   : > { %v2017_v0 = vmul.f32 %v6137_v39, %v6133_v40 }
 0xa3b   : > { %v6139_v53 = vpop.eup %6138 }
 0xa3c   : > { %v2015_v2 = vmul.f32 %v6139_v53, %v6135_v42  ;;  %v6141_v4 = vpop.eup %6140 }
 0xa3d   : > { %v6143_v5 = vpop.eup %6142  ;;  %v2233_v59 = vmul.f32 %v6141_v4, %v6131_v31 }
 0xa3e   : > { %v6020_v55 = vpack.c.bf16 %v2017_v0, %v2015_v2  ;;  %v2231_v6 = vmul.f32 %v6143_v5, %v6129_v29 }
 0xa40   : > { %6022 = vmatpush3.bf16.xpose.msk.msra.mxu0 %vm6768_vm5, %v6020_v55  ;;  %v6024_v61 = vpack.c.bf16 %v2233_v59, %v2231_v6 }
 0xa41   : > { %6023 = vmatprep.subr.bf16.mxu0 %v6287_v7 }
 0xa47   : > { %5755 = vmatmul.mubr.msk.f32.vlgmr.msra.gmra.mrb[28].mxu0 %vm1192_vm4, %v1652_v8 }
 0xa48   : > { %6026 = vmatpush3.bf16.xpose.msk.msra.mxu0 %vm6768_vm5, %v6024_v61  ;;  %5766 = vmatprep.mubr.msk.f32.mxu0 %vm6288_vm2, %v6289_v45 }
 0xa49   : > { %6032 = vmatprep.subr.bf16.mxu0 %v6705_v46 }
 0xa4d   : > { %v5773_v11 = vpop.f32.mrb[26].mxu1 }
 0xa4e   : > { %v2427_v19 = vmul.f32 0.17677669, %v5773_v11  ;;  %v2417_v13 = vpop.f32.mrb[27].mxu1 }
 0xa4f   : > { %v2426_v23 = vmul.f32 0.17677669, %v2417_v13  ;;  %5767 = vmatmul.mubr.msk.f32.vlgmr.msra.gmra.mrb[30].mxu0 %vm1192_vm4, %v1657_v10 }
 0xa50   : > { %6034 = vmatpush3.bf16.msra.mxu0 %v6705_v46  ;;  %v2431_v14 = vsel %vm1192_vm4, %v2427_v19, -inf  ;;  %5789 = vmatprep.mubr.msk.f32.mxu0 %vm444_vm0, %v5280_v12  ;;  %v5282_v46 = vld [vmem:[%s7458_s8 + $0x70] sm:$0xff] }
 0xa51   : > { %6036 = vmatprep.subr.bf16.mxu0 %v6713_v60  ;;  %2432 = vmax.xlane.f32.xlu0 %v2431_v14  ;;  %v2428_v54 = vsel %vm1192_vm4, %v2426_v23, -inf }
 0xa52   : > { %2429 = vmax.xlane.f32.xlu1 %v2428_v54 }
 0xa54   : > { %6038 = vmatpush3.bf16.msra.mxu0 %v6713_v60  ;;  %v5284_v60 = vld [vmem:[%s7458_s8 + $0x80] sm:$0xff] }
 0xa55   : > { %5837 = vmatprep.subr.mxu0 %v6289_v45 }
 0xa57   : > { %5790 = vmatmul.mubr.msk.f32.vlgmr.msra.gmra.mrb[32].mxu0 %vm444_vm0, %v5281_v15 }
 0xa58   : > { %5792 = vmatprep.mubr.msk.f32.mxu0 %vm444_vm0, %v5282_v46 }
 0xa5b   : > { %5793 = vmatmul.mubr.msk.f32.gmra.mrb[34].mxu0 %vm444_vm0, %v5283_v16 }
 0xa5c   : > { %5795 = vmatprep.mubr.msk.f32.mxu0 %vm444_vm0, %v5284_v60 }
 0xa5f   : > { %5796 = vmatmul.mubr.msk.f32.gmra.mrb[36].mxu0 %vm444_vm0, %v5285_v17 }
 0xa60   : > { %5798 = vmatprep.mubr.msk.f32.mxu0 %vm444_vm0, %v5286_v20 }
 0xa63   : > { %2660 = vperm.xlu1 %6111, %v5292_v18   ;;  %5799 = vmatmul.mubr.msk.f32.gmra.mrb[38].mxu0 %vm444_vm0, %v5287_v21 }
 0xa64   : > { %5801 = vmatprep.mubr.msk.f32.mxu0 %vm444_vm0, %v5288_v24 }
 0xa67   : > { %5802 = vmatmul.mubr.msk.f32.gmra.mrb[40].mxu0 %vm444_vm0, %v5289_v27 }
 0xade   : > { %v2433_v28 = vpop.xlane.xlu0 %2432 }
 0xadf   : > { %v2435_v29 = vsub.f32 %v2427_v19, %v2433_v28  ;;  %v2430_v30 = vpop.xlane.xlu1 %2429 }
 0xae0   : > { %v2434_v31 = vsub.f32 %v2426_v23, %v2430_v30 }
 0xae1   : > { %v2438_v32 = vmul.f32 1.442695, %v2435_v29 }
 0xae2   : > { %v2436_v41 = vmul.f32 1.442695, %v2434_v31 }
 0xae3   : > { %6144 = vpow2.f32 %v2438_v32  ;;  %v2661_v0 = vpop.permute.xlu1 %2660 }
 0xae4   : > { %6146 = vpow2.f32 %v2436_v41 }
 0xaed   : > { %v6145_v33 = vpop.eup %6144 }
 0xaee   : > { %v6147_v34 = vpop.eup %6146  ;;  %v2443_v35 = vsel %vm1192_vm4, %v6145_v33, 0.0 }
 0xaef   : > { %2444 = vadd.xlane.f32.xlu0 %v2443_v35  ;;  %v2440_v36 = vsel %vm1192_vm4, %v6147_v34, 0.0 }
 0xaf0   : > { %2441 = vadd.xlane.f32.xlu1 %v2440_v36 }
 0xb05   : > { %1501 = vperm.xlu0 %6110, %v1443_v37  }
 0xb09   : > { %2680 = vperm.xlu0 %6110, %v5296_v38  }
 0xb1a   : > { %v2093_v40 = vpop.f32.mrb[28].mxu0 }
 0xb1b   : > { %v2530_v43 = vadd.f32 %v6641_v22, %v2093_v40  ;;  %v5756_v42 = vpop.f32.mrb[29].mxu0 }
 0xb1d   : > { %v2534_v57 = vsel %vm1192_vm4, %v2530_v43, 0.0 }
 0xb1e   : > { %v2535_v48 = vadd.f32 %v2534_v57, %v2533_v56 }
 0xb22   : > { %v2309_v51 = vpop.f32.mrb[30].mxu0 }
 0xb23   : > { %v2531_v62 = vadd.f32 %v2309_v51, %v6649_v26  ;;  %v5768_v52 = vpop.f32.mrb[31].mxu0 }
 0xb25   : > { %v2536_v63 = vsel %vm1192_vm4, %v2531_v62, 0.0 }
 0xb26   : > { %v2537_v39 = vadd.f32 %v2536_v63, %v2535_v48 }
 0xb2a   : > { %v6885_v53 = vpop.f32.mrb[32].mxu0 }
 0xb2b   : > { %v2820_v2 = vpop.f32.mrb[33].mxu0 }
 0xb2c   : > { %v2821_v55 = vadd.f32 %v2820_v2, %v2661_v0 }
 0xb2e   : > { %2879 = vxpose.xlu0.b32.start.end [1/1] (short) (narrow) %v2821_v55, 8  ;;  %v6887_v22 = vpop.f32.mrb[34].mxu0 }
 0xb2f   : > { %v6889_v4 = vpop.f32.mrb[35].mxu0 }
 0xb32   : > { %v6891_v5 = vpop.f32.mrb[36].mxu0 }
 0xb33   : > { %v2840_v59 = vpop.f32.mrb[37].mxu0 }
 0xb36   : > { %v6893_v6 = vpop.f32.mrb[38].mxu0 }
 0xb37   : > { %v6895_v26 = vpop.f32.mrb[39].mxu0 }
 0xb3a   : > { %v6897_v8 = vpop.f32.mrb[40].mxu0 }
 0xb3b   : > { %v6899_v61 = vpop.f32.mrb[41].mxu0 }
 0xb57   : > { %2700 = vperm.xlu0 %6110, %v5300_v9  }
 0xb7c   : > { %v2445_v10 = vpop.xlane.xlu0 %2444 }
 0xb7d   : > { %6148 = vrcp.f32 %v2445_v10  ;;  %v2442_v11 = vpop.xlane.xlu1 %2441  ;;  %v5293_v10 = vld [vmem:[%s7459_s9 + $0x68] sm:$0xff] }
 0xb7e   : > { %6150 = vrcp.f32 %v2442_v11 }
 0xb84   : > { %v1502_v14 = vpop.permute.xlu0 %1501 }
 0xb85   : > { %v1662_v46 = vadd.f32 %v6784_v1, %v1502_v14 }
 0xb87   : > { %v6149_v12 = vpop.eup %6148 }
 0xb88   : > { %v6151_v19 = vpop.eup %6150  ;;  %v2449_v13 = vmul.f32 %v6149_v12, %v6145_v33  ;;  %v2681_v15 = vpop.permute.xlu0 %2680 }
 0xb89   : > { %v2447_v23 = vmul.f32 %v6151_v19, %v6147_v34  ;;  %v2841_v16 = vadd.f32 %v2840_v59, %v2681_v15 }
 0xb8b   : > { %v6028_v54 = vpack.c.bf16 %v2449_v13, %v2447_v23 }
 0xb8d   : > { %6030 = vmatpush3.bf16.xpose.msk.msra.mxu1 %vm6768_vm5, %v6028_v54 }
 0xb8e   : > { %5807 = vmatprep.subr.mxu1 %v6289_v45 }
 0xb94   : > { %5779 = vmatmul.mubr.msk.f32.vlgmr.msra.gmra.mrb[28].mxu1 %vm1192_vm4, %v1662_v46 }
 0xb95   : > { %5808 = vmatpush3.msra.mxu1 %v2841_v16  ;;  %5809 = vmatprep.mubr.msk.f32.mxu1 %vm6288_vm2, %v6289_v45 }
 0xb96   : > { %5812 = vmatprep.subr.mxu1 %v6289_v45 }
 0xbae   : > { %v2895_v60 = vpop.trf.xlu0 }
 0xbaf   : > { %5810 = vmatmul.mubr.msk.f32.vlgmr.msra.gmra.mrb[30].mxu1 %vm1222_vm3, %v2895_v60 }
 0xbb0   : > { %5814 = vmatprep.mubr.msk.f32.mxu1 %vm6288_vm2, %v6289_v45 }
 0xc67   : > { %v2525_v44 = vpop.f32.mrb[28].mxu1 }
 0xc68   : > { %v2532_v17 = vadd.f32 %v6647_v25, %v2525_v44  ;;  %v5780_v18 = vpop.f32.mrb[29].mxu1 }
 0xc69   : > { %v5297_v18 = vld [vmem:[%s7459_s9 + $0x88] sm:$0xff] }
 0xc6a   : > { %v2538_v1 = vsel %vm1192_vm4, %v2532_v17, 0.0 }
 0xc6b   : > { %v2539_v20 = vadd.f32 %v2538_v1, %v2537_v39  ;;  %v5294_v1 = vld [vmem:[%s7459_s9 + $0x70] sm:$0xff] }
 0xc6d   : > { %v2540_v21 = vrot.slane %v2539_v20, 4 }
 0xc6f   : > { %v2541_v24 = vadd.f32 %v2540_v21, %v2539_v20  ;;  %v5301_v20 = vld [vmem:[%s7459_s9 + $0xa8] sm:$0xff]  ;;  %v5299_v21 = vld [vmem:[%s7459_s9 + $0x98] sm:$0xff] }
 0xc71   : > { %v2542_v27 = vrot.slane %v2541_v24, 2 }
 0xc73   : > { %v2543_v28 = vadd.f32 %v2542_v27, %v2541_v24  ;;  %v2701_v27 = vpop.permute.xlu0 %2700 }
 0xc75   : > { %v2544_v29 = vrot.slane %v2543_v28, 1 }
 0xc77   : > { %v2545_v30 = vadd.f32 %v2544_v29, %v2543_v28 }
 0xc79   : > { %v2547_v31 = vmul.f32 0.03125, %v2545_v30 }
 0xc7b   : > { %v2551_v32 = vsub.f32 %v2532_v17, %v2547_v31  ;;  %v2548_v41 = vsub.f32 %v6789_v3, %v2547_v31  ;;  %v2549_v33 = vsub.f32 %v2530_v43, %v2547_v31  ;;  %v2550_v34 = vsub.f32 %v2531_v62, %v2547_v31 }
 0xc7d   : > { %v2552_v35 = vmul.f32 %v2548_v41, %v2548_v41  ;;  %v2553_v36 = vmul.f32 %v2549_v33, %v2549_v33  ;;  %v2554_v37 = vmul.f32 %v2550_v34, %v2550_v34  ;;  %v2555_v25 = vmul.f32 %v2551_v32, %v2551_v32 }
 0xc7f   : > { %v2556_v38 = vsel %vm1192_vm4, %v2552_v35, 0.0  ;;  %v2557_v40 = vsel %vm1192_vm4, %v2553_v36, 0.0  ;;  %v2559_v56 = vsel %vm1192_vm4, %v2554_v37, 0.0  ;;  %v2561_v51 = vsel %vm1192_vm4, %v2555_v25, 0.0 }
 0xc80   : > { %v2558_v42 = vadd.f32 %v2557_v40, %v2556_v38 }
 0xc82   : > { %v2980_v57 = vpop.f32.mrb[30].mxu1  ;;  %v2560_v48 = vadd.f32 %v2559_v56, %v2558_v42 }
 0xc83   : > { %v2984_v52 = vmul.f32 0.17677669, %v2980_v57  ;;  %v5811_v63 = vpop.f32.mrb[31].mxu1 }
 0xc84   : > { %v2562_v3 = vadd.f32 %v2561_v51, %v2560_v48  ;;  %v5295_v48 = vld [vmem:[%s7459_s9 + $0x78] sm:$0xff]  ;;  %v5290_v63 = vld [vmem:[%s7458_s8 + $0xb0] sm:$0xff] }
 0xc85   : > { %v2985_v43 = vsel %vm1222_vm3, %v2984_v52, -inf  ;;  %5804 = vmatprep.mubr.msk.f32.mxu0 %vm444_vm0, %v5290_v63 }
 0xc86   : > { %2986 = vmax.xlane.f32.xlu1 %v2985_v43  ;;  %v2563_v62 = vrot.slane %v2562_v3, 4 }
 0xc88   : > { %v2564_v39 = vadd.f32 %v2563_v62, %v2562_v3  ;;  %v5291_v3 = vld [vmem:[%s7458_s8 + $0xb8] sm:$0xff] }
 0xc89   : > { %5805 = vmatmul.mubr.msk.f32.gmra.mrb[42].mxu0 %vm444_vm0, %v5291_v3 }
 0xc8a   : > { %v2565_v0 = vrot.slane %v2564_v39, 2  ;;  %5839 = vmatprep.mubr.msk.f32.mxu0 %vm6288_vm2, %v6289_v45 }
 0xc8c   : > { %v2566_v2 = vadd.f32 %v2565_v0, %v2564_v39 }
 0xc8e   : > { %v2567_v55 = vrot.slane %v2566_v2, 1 }
 0xc90   : > { %v2568_v59 = vadd.f32 %v2567_v55, %v2566_v2 }
 0xc92   : > { %v2569_v9 = vmul.f32 0.03125, %v2568_v59 }
 0xc94   : > { %v2570_v11 = vadd.f32 1e-05, %v2569_v9 }
 0xc96   : > { %6152 = vrsqrt.f32 %v2570_v11 }
 0xc97   : > { %2665 = vperm.xlu1 %6111, %v5293_v10  }
 0xca0   : > { %v6153_v12 = vpop.eup %6152 }
 0xca1   : > { %v6926_v19 = vmul.f32 %v6153_v12, %v2550_v34  ;;  %v6928_v13 = vmul.f32 %v6153_v12, %v2548_v41  ;;  %v6930_v23 = vmul.f32 %v6153_v12, %v2549_v33  ;;  %v6932_v14 = vmul.f32 %v6153_v12, %v2551_v32 }
 0xca2   : > { %v2861_v32 = vadd.f32 %v6899_v61, %v2701_v27  ;;  %v5328_v27 = vld [vmem:[%s7460_s10 + $0x20] sm:$0xff] }
 0xd13   : > { %v2987_v54 = vpop.xlane.xlu1 %2986 }
 0xd14   : > { %v2988_v15 = vsub.f32 %v2984_v52, %v2987_v54 }
 0xd16   : > { %v2989_v46 = vmul.f32 1.442695, %v2988_v15 }
 0xd17   : > { %v2666_v16 = vpop.permute.xlu1 %2665 }
 0xd18   : > { %6154 = vpow2.f32 %v2989_v46  ;;  %v2826_v60 = vadd.f32 %v6885_v53, %v2666_v16  ;;  %v5298_v53 = vld [vmem:[%s7459_s9 + $0x90] sm:$0xff] }
 0xd1a   : > { %3072 = vxpose.xlu0.b32.start.end [1/1] (short) (narrow) %v2826_v60, 8 }
 0xd22   : > { %v6155_v44 = vpop.eup %6154 }
 0xd23   : > { %v2991_v17 = vsel %vm1222_vm3, %v6155_v44, 0.0 }
 0xd24   : > { %2992 = vadd.xlane.f32.xlu1 %v2991_v17 }
 0xd35   : > { %2685 = vperm.xlu1 %6111, %v5297_v18  }
 0xd43   : > { %2670 = vperm.xlu0 %6110, %v5294_v1  }
 0xd47   : > { %2705 = vperm.xlu0 %6110, %v5301_v20  }
 0xd4b   : > { %2690 = vperm.xlu0 %6110, %v5298_v53   ;;  %v5303_v53 = vld [vmem:[%s7459_s9 + $0xb8] sm:$0xff] }
 0xd4f   : > { %2695 = vperm.xlu0 %6110, %v5299_v21   ;;  %v2578_v21 = vld [vmem:[%s7460_s10 + $0x10] sm:$0xff] }
 0xd5c   : > { %v6995_v59 = vpop.f32.mrb[42].mxu0 }
 0xd5d   : > { %v6997_v9 = vpop.f32.mrb[43].mxu0 }
 0xd9a   : > { %v3088_v29 = vpop.trf.xlu0 }
 0xdb1   : > { %v2993_v24 = vpop.xlane.xlu1 %2992 }
 0xdb2   : > { %6156 = vrcp.f32 %v2993_v24  ;;  %v2606_v24 = vld [vmem:[%s7461_s11 + $0x10] sm:$0xff] }
 0xdb5   : > { %v2686_v31 = vpop.permute.xlu1 %2685 }
 0xdb6   : > { %v2846_v41 = vadd.f32 %v6891_v5, %v2686_v31 }
 0xdbc   : > { %v6157_v28 = vpop.eup %6156 }
 0xdbd   : > { %v2995_v30 = vmul.f32 %v6157_v28, %v6155_v44  ;;  %v5332_v28 = vld [vmem:[%s7461_s11 + $0x20] sm:$0xff] }
 0xdbf   : > { %5813 = vmatpush3.xpose.msk.msra.mxu1 %vm1222_vm3, %v2995_v30  ;;  %v5334_v30 = vld [vmem:[%s7461_s11 + $0x30] sm:$0xff] }
 0xdc0   : > { %5817 = vmatprep.subr.mxu1 %v6289_v45 }
 0xdc2   : > { %v2671_v33 = vpop.permute.xlu0 %2670  ;;  %5815 = vmatmul.mubr.msk.f32.vlgmr.msra.gmra.mrb[32].mxu1 %vm1222_vm3, %v2861_v32 }
 0xdc3   : > { %v2831_v34 = vadd.f32 %v6889_v4, %v2671_v33  ;;  %5818 = vmatpush3.msra.mxu1 %v2846_v41  ;;  %5819 = vmatprep.mubr.msk.f32.mxu1 %vm6288_vm2, %v6289_v45 }
 0xdc4   : > { %5822 = vmatprep.subr.mxu1 %v6289_v45 }
 0xdc5   : > { %3265 = vxpose.xlu0.b32.start.end [1/1] (short) (narrow) %v2831_v34, 8 }
 0xdc6   : > { %v2706_v35 = vpop.permute.xlu0 %2705  ;;  %5820 = vmatmul.mubr.msk.f32.vlgmr.msra.gmra.mrb[34].mxu1 %vm1222_vm3, %v3088_v29  ;;  %v5330_v29 = vld [vmem:[%s7460_s10 + $0x30] sm:$0xff] }
 0xdc7   : > { %v2866_v61 = vadd.f32 %v6897_v8, %v2706_v35  ;;  %5824 = vmatprep.mubr.msk.f32.mxu1 %vm6288_vm2, %v6289_v45 }
 0xdca   : > { %v2691_v5 = vpop.permute.xlu0 %2690 }
 0xdcb   : > { %v2851_v36 = vadd.f32 %v6895_v26, %v2691_v5 }
 0xdce   : > { %v2696_v37 = vpop.permute.xlu0 %2695 }
 0xdcf   : > { %v2856_v4 = vadd.f32 %v6893_v6, %v2696_v37 }
 0xdd1   : > { %5838 = vmatpush3.msra.mxu0 %v2856_v4  ;;  %v5302_v4 = vld [vmem:[%s7459_s9 + $0xb0] sm:$0xff] }
 0xe45   : > { %v3281_v55 = vpop.trf.xlu0 }
 0xe95   : > { %v3068_v25 = vpop.f32.mrb[32].mxu1 }
 0xe96   : > { %v6967_v38 = vadd.f32 %v3068_v25, %v6701_v49  ;;  %v5816_v40 = vpop.f32.mrb[33].mxu1  ;;  %v2576_v25 = vld [vmem:[%s7460_s10] sm:$0xff] }
 0xe97   : > { %v2577_v40 = vld [vmem:[%s7460_s10 + $0x8] sm:$0xff] }
 0xe98   : > { %v3655_v54 = vsel %vm1222_vm3, %v6967_v38, 0.0 }
 0xe99   : > { %v3173_v42 = vpop.f32.mrb[34].mxu1 }
 0xe9a   : > { %v3177_v56 = vmul.f32 0.17677669, %v3173_v42  ;;  %v5821_v57 = vpop.f32.mrb[35].mxu1  ;;  %v2604_v42 = vld [vmem:[%s7461_s11] sm:$0xff] }
 0xe9b   : > { %v2579_v57 = vld [vmem:[%s7460_s10 + $0x18] sm:$0xff] }
 0xe9c   : > { %v3178_v8 = vsel %vm1222_vm3, %v3177_v56, -inf }
 0xe9d   : > { %3179 = vmax.xlane.f32.xlu1 %v3178_v8  ;;  %v2607_v8 = vld [vmem:[%s7461_s11 + $0x18] sm:$0xff] }
 0xeae   : > { %2675 = vperm.xlu1 %6111, %v5295_v48   ;;  %v5329_v48 = vld [vmem:[%s7460_s10 + $0x28] sm:$0xff] }
 0xf2a   : > { %v3180_v26 = vpop.xlane.xlu1 %3179 }
 0xf2b   : > { %v3181_v51 = vsub.f32 %v3177_v56, %v3180_v26  ;;  %v2605_v56 = vld [vmem:[%s7461_s11 + $0x8] sm:$0xff] }
 0xf2c   : > { %v5333_v26 = vld [vmem:[%s7461_s11 + $0x28] sm:$0xff] }
 0xf2d   : > { %v3182_v6 = vmul.f32 1.442695, %v3181_v51  ;;  %v5331_v51 = vld [vmem:[%s7460_s10 + $0x38] sm:$0xff] }
 0xf2e   : > { %v2676_v43 = vpop.permute.xlu1 %2675 }
 0xf2f   : > { %6158 = vpow2.f32 %v3182_v6  ;;  %v2836_v62 = vadd.f32 %v6887_v22, %v2676_v43  ;;  %v5335_v6 = vld [vmem:[%s7461_s11 + $0x38] sm:$0xff] }
 0xf39   : > { %v6159_v52 = vpop.eup %6158 }
 0xf3a   : > { %v3184_v49 = vsel %vm1222_vm3, %v6159_v52, 0.0 }
 0xf3b   : > { %3185 = vadd.xlane.f32.xlu1 %v3184_v49 }
 0xf6e   : > { %3458 = vxpose.xlu1.b32.start.end [1/1] (short) (narrow) %v2836_v62, 8 }
 0xfc8   : > { %v3186_v39 = vpop.xlane.xlu1 %3185 }
 0xfc9   : > { %6160 = vrcp.f32 %v3186_v39 }
 0xfd3   : > { %v6161_v0 = vpop.eup %6160 }
 0xfd4   : > { %v3188_v2 = vmul.f32 %v6161_v0, %v6159_v52 }
 0xfd6   : > { %5823 = vmatpush3.xpose.msk.msra.mxu1 %vm1222_vm3, %v3188_v2 }
 0xfd7   : > { %5827 = vmatprep.subr.mxu1 %v6289_v45 }
 0xfd9   : > { %5825 = vmatmul.mubr.msk.f32.vlgmr.msra.gmra.mrb[36].mxu1 %vm1222_vm3, %v2866_v61 }
 0xfda   : > { %5828 = vmatpush3.msra.mxu1 %v2851_v36  ;;  %5829 = vmatprep.mubr.msk.f32.mxu1 %vm6288_vm2, %v6289_v45 }
 0xfdb   : > { %5832 = vmatprep.subr.mxu1 %v6289_v45 }
 0xfdd   : > { %5830 = vmatmul.mubr.msk.f32.vlgmr.msra.gmra.mrb[38].mxu1 %vm1222_vm3, %v3281_v55 }
 0xfde   : > { %5834 = vmatprep.mubr.msk.f32.mxu1 %vm6288_vm2, %v6289_v45 }
 0xfee   : > { %v3474_v22 = vpop.trf.xlu1 }
 0xfef   : > { %5840 = vmatmul.mubr.msk.f32.vlgmr.msra.gmra.mrb[44].mxu0 %vm1222_vm3, %v3474_v22 }
0x10ac   : > { %v3261_v10 = vpop.f32.mrb[36].mxu1 }
0x10ad   : > { %v7000_v11 = vadd.f32 %v6696_v47, %v3261_v10  ;;  %v5826_v12 = vpop.f32.mrb[37].mxu1 }
0x10af   : > { %v3656_v15 = vsel %vm1222_vm3, %v7000_v11, 0.0 }
0x10b0   : > { %v7006_v46 = vadd.f32 %v3656_v15, %v3655_v54  ;;  %v3366_v16 = vpop.f32.mrb[38].mxu1 }
0x10b1   : > { %v3370_v60 = vmul.f32 0.17677669, %v3366_v16  ;;  %v5831_v44 = vpop.f32.mrb[39].mxu1 }
0x10b3   : > { %v3371_v17 = vsel %vm1222_vm3, %v3370_v60, -inf }
0x10b4   : > { %3372 = vmax.xlane.f32.xlu0 %v3371_v17 }
0x10c2   : > { %v3559_v18 = vpop.f32.mrb[44].mxu0 }
0x10c3   : > { %v3563_v1 = vmul.f32 0.17677669, %v3559_v18  ;;  %v5841_v20 = vpop.f32.mrb[45].mxu0 }
0x10c5   : > { %v3564_v47 = vsel %vm1222_vm3, %v3563_v1, -inf }
0x10c6   : > { %3565 = vmax.xlane.f32.xlu1 %v3564_v47  ;;  %v5352_v47 = vld [vmem:[%s7459_s9 + $0xe0] sm:$0xff] }
0x10d7   : > { %2715 = vperm.xlu1 %6111, %v5303_v53   ;;  %v5336_v53 = vld [vmem:[%s7458_s8 + $0xc0] sm:$0xff] }
0x10d8   : > { %5855 = vmatprep.mubr.msk.f32.mxu0 %vm444_vm0, %v5336_v53 }
0x10db   : > { %2592 = vperm.xlu1 %6111, %v2578_v21  }
0x10df   : > { %2620 = vperm.xlu1 %6111, %v2606_v24  }
0x10e3   : > { %3704 = vperm.xlu1 %6111, %v5328_v27  }
0x10e7   : > { %3733 = vperm.xlu1 %6111, %v5332_v28  }
0x10eb   : > { %3714 = vperm.xlu1 %6111, %v5330_v29  }
0x10ef   : > { %3743 = vperm.xlu1 %6111, %v5334_v30  }
0x1141   : > { %v3373_v31 = vpop.xlane.xlu0 %3372 }
0x1142   : > { %v3374_v32 = vsub.f32 %v3370_v60, %v3373_v31 }
0x1144   : > { %v3375_v34 = vmul.f32 1.442695, %v3374_v32 }
0x1153   : > { %v3566_v41 = vpop.xlane.xlu1 %3565 }
0x1154   : > { %v3567_v33 = vsub.f32 %v3563_v1, %v3566_v41  ;;  %v5348_v1 = vld [vmem:[%s7459_s9 + $0xc0] sm:$0xff] }
0x1156   : > { %v3568_v35 = vmul.f32 1.442695, %v3567_v33 }
0x1157   : > { %v2716_v3 = vpop.permute.xlu1 %2715 }
0x1158   : > { %6162 = vpow2.f32 %v3568_v35  ;;  %v2876_v12 = vadd.f32 %v6995_v59, %v2716_v3 }
0x1159   : > { %6164 = vpow2.f32 %v3375_v34 }
0x115b   : > { %v2593_v55 = vpop.permute.xlu1 %2592 }
0x115c   : > { %v2602_v60 = vmul.f32 %v2593_v55, %v6926_v19 }
0x115f   : > { %v2621_v16 = vpop.permute.xlu1 %2620 }
0x1160   : > { %v2630_v17 = vadd.f32 %v2621_v16, %v2602_v60 }
0x1162   : > { %v6163_v61 = vpop.eup %6162 }
0x1163   : > { %v3570_v5 = vsel %vm1222_vm3, %v6163_v61, 0.0  ;;  %v6165_v36 = vpop.eup %6164 }
0x1164   : > { %3571 = vadd.xlane.f32.xlu0 %v3570_v5  ;;  %v3377_v37 = vsel %vm1222_vm3, %v6165_v36, 0.0 }
0x1168   : > { %3378 = vadd.xlane.f32.xlu0 %v3377_v37 }
0x117e   : > { %2710 = vperm.xlu0 %6110, %v5302_v4  }
0x1182   : > { %2582 = vperm.xlu0 %6110, %v2576_v25  }
0x1186   : > { %2587 = vperm.xlu0 %6110, %v2577_v40  }
0x118a   : > { %2610 = vperm.xlu0 %6110, %v2604_v42  }
0x118e   : > { %2615 = vperm.xlu0 %6110, %v2605_v56  }
0x1192   : > { %2597 = vperm.xlu0 %6110, %v2579_v57  }
0x1196   : > { %2625 = vperm.xlu0 %6110, %v2607_v8  }
0x119a   : > { %3709 = vperm.xlu0 %6110, %v5329_v48  }
0x119e   : > { %3738 = vperm.xlu0 %6110, %v5333_v26  }
0x11a2   : > { %3719 = vperm.xlu0 %6110, %v5331_v51  }
0x11a6   : > { %3748 = vperm.xlu0 %6110, %v5335_v6  }
0x11f1   : > { %v3572_v52 = vpop.xlane.xlu0 %3571 }
0x11f5   : > { %v3379_v49 = vpop.xlane.xlu0 %3378 }
0x11f6   : > { %6166 = vrcp.f32 %v3379_v49 }
0x11f7   : > { %6168 = vrcp.f32 %v3572_v52 }
0x11fd   : > { %v2711_v63 = vpop.permute.xlu0 %2710 }
0x11fe   : > { %v2871_v2 = vadd.f32 %v6997_v9, %v2711_v63 }
0x1200   : > { %v6167_v43 = vpop.eup %6166 }
0x1201   : > { %v3381_v62 = vmul.f32 %v6167_v43, %v6165_v36  ;;  %v2583_v39 = vpop.permute.xlu0 %2582  ;;  %v6169_v0 = vpop.eup %6168 }
0x1202   : > { %v3574_v22 = vmul.f32 %v6169_v0, %v6163_v61  ;;  %v2600_v54 = vmul.f32 %v2583_v39, %v6928_v13 }
0x1203   : > { %5833 = vmatpush3.xpose.msk.msra.mxu1 %vm1222_vm3, %v3381_v62 }
0x1204   : > { %5842 = vmatprep.subr.mxu1 %v6289_v45 }
0x1205   : > { %v2588_v10 = vpop.permute.xlu0 %2587 }
0x1206   : > { %5835 = vmatmul.mubr.msk.f32.vlgmr.msra.gmra.mrb[40].mxu1 %vm1222_vm3, %v2871_v2  ;;  %v2601_v44 = vmul.f32 %v2588_v10, %v6930_v23 }
0x1207   : > { %5843 = vmatpush3.xpose.msk.msra.mxu1 %vm1222_vm3, %v3574_v22  ;;  %5844 = vmatprep.mubr.msk.f32.mxu1 %vm6288_vm2, %v6289_v45 }
0x1208   : > { %5873 = vmatprep.subr.mxu1 %v6289_v45 }
0x1209   : > { %v2611_v15 = vpop.permute.xlu0 %2610 }
0x120a   : > { %v2628_v9 = vadd.f32 %v2611_v15, %v2600_v54  ;;  %5845 = vmatmul.mubr.msk.f32.vlgmr.msra.gmra.mrb[42].mxu1 %vm1222_vm3, %v2876_v12 }
0x120b   : > { %5875 = vmatprep.mubr.msk.f32.mxu1 %vm6288_vm2, %v6289_v45 }
0x120c   : > { %3759 = vrot.lane.b32.xlu1 %v2628_v9, %s6290_s28 }
0x120d   : > { %v2616_v59 = vpop.permute.xlu0 %2615 }
0x120e   : > { %v2629_v13 = vadd.f32 %v2616_v59, %v2601_v44 }
0x1210   : > { %3763 = vrot.lane.b32.xlu1 %v2630_v17, %s6290_s28  ;;  %3761 = vrot.lane.b32.xlu0 %v2629_v13, %s6290_s28 }
0x1211   : > { %v2598_v18 = vpop.permute.xlu0 %2597 }
0x1212   : > { %v2603_v20 = vmul.f32 %v2598_v18, %v6932_v14 }
0x1214   : > { %3803 = vperm.xlu1 %6111, %v5348_v1  }
0x1215   : > { %v2626_v19 = vpop.permute.xlu0 %2625 }
0x1216   : > { %v2631_v23 = vadd.f32 %v2626_v19, %v2603_v20 }
0x1218   : > { %3765 = vrot.lane.b32.xlu0 %v2631_v23, %s6290_s28 }
0x1219   : > { %v3710_v3 = vpop.permute.xlu0 %3709 }
0x121c   : > { %3823 = vperm.xlu0 %6110, %v5352_v47  }
0x121d   : > { %v3739_v2 = vpop.permute.xlu0 %3738 }
0x1221   : > { %v3720_v12 = vpop.permute.xlu0 %3719 }
0x1225   : > { %v3749_v15 = vpop.permute.xlu0 %3748 }
0x1282   : > { %v3762_v13 = vpop.permute.xlu0 %3761 }
0x12d9   : > { %v3454_v21 = vpop.f32.mrb[40].mxu1 }
0x12da   : > { %v3653_v24 = vadd.f32 %v3454_v21, %v6709_v58  ;;  %v5836_v14 = vpop.f32.mrb[41].mxu1 }
0x12db   : > { %v3766_v14 = vpop.permute.xlu0 %3765 }
0x12dc   : > { %v3658_v27 = vsel %vm1222_vm3, %v3653_v24, 0.0 }
0x12dd   : > { %v3659_v28 = vadd.f32 %v3658_v27, %v7006_v46  ;;  %v3647_v29 = vpop.f32.mrb[42].mxu1 }
0x12de   : > { %v3654_v30 = vadd.f32 %v6707_v50, %v3647_v29  ;;  %v5846_v31 = vpop.f32.mrb[43].mxu1 }
0x12e0   : > { %v3660_v32 = vsel %vm1222_vm3, %v3654_v30, 0.0 }
0x12e1   : > { %v3661_v41 = vadd.f32 %v3660_v32, %v3659_v28 }
0x12e3   : > { %v3662_v33 = vrot.slane %v3661_v41, 4 }
0x12e5   : > { %v3663_v34 = vadd.f32 %v3662_v33, %v3661_v41  ;;  %v5337_v41 = vld [vmem:[%s7458_s8 + $0xc8] sm:$0xff]  ;;  %v5338_v33 = vld [vmem:[%s7458_s8 + $0xd0] sm:$0xff] }
0x12e7   : > { %v3664_v35 = vrot.slane %v3663_v34, 2 }
0x12e9   : > { %v3665_v61 = vadd.f32 %v3664_v35, %v3663_v34  ;;  %v5339_v34 = vld [vmem:[%s7458_s8 + $0xd8] sm:$0xff]  ;;  %v5340_v35 = vld [vmem:[%s7458_s8 + $0xe0] sm:$0xff] }
0x12eb   : > { %v3666_v5 = vrot.slane %v3665_v61, 1 }
0x12ed   : > { %v3667_v36 = vadd.f32 %v3666_v5, %v3665_v61  ;;  %v5341_v61 = vld [vmem:[%s7458_s8 + $0xe8] sm:$0xff] }
0x12ef   : > { %v3668_v37 = vmul.f32 0.03125, %v3667_v36 }
0x12f1   : > { %v3669_v58 = vsub.f32 %v6967_v38, %v3668_v37  ;;  %v3670_v4 = vsub.f32 %v7000_v11, %v3668_v37  ;;  %v3671_v25 = vsub.f32 %v3653_v24, %v3668_v37  ;;  %v3672_v46 = vsub.f32 %v3654_v30, %v3668_v37  ;;  %v3705_v11 = vpop.permute.xlu1 %3704 }
0x12f3   : > { %v3673_v40 = vmul.f32 %v3669_v58, %v3669_v58  ;;  %v3674_v42 = vmul.f32 %v3670_v4, %v3670_v4  ;;  %v3675_v50 = vmul.f32 %v3671_v25, %v3671_v25  ;;  %v3676_v56 = vmul.f32 %v3672_v46, %v3672_v46 }
0x12f5   : > { %v3677_v57 = vsel %vm1222_vm3, %v3673_v40, 0.0  ;;  %v3678_v8 = vsel %vm1222_vm3, %v3674_v42, 0.0  ;;  %v3680_v26 = vsel %vm1222_vm3, %v3675_v50, 0.0  ;;  %v3682_v6 = vsel %vm1222_vm3, %v3676_v56, 0.0  ;;  %v3734_v39 = vpop.permute.xlu1 %3733  ;;  %v3824_v40 = vpop.permute.xlu0 %3823  ;;  %v5350_v56 = vld [vmem:[%s7459_s9 + $0xd0] sm:$0xff] }
0x12f6   : > { %v3679_v48 = vadd.f32 %v3678_v8, %v3677_v57 }
0x12f8   : > { %v3681_v51 = vadd.f32 %v3680_v26, %v3679_v48  ;;  %v5342_v26 = vld [vmem:[%s7458_s8 + $0xf0] sm:$0xff] }
0x12f9   : > { %v3715_v10 = vpop.permute.xlu1 %3714 }
0x12fa   : > { %v3683_v52 = vadd.f32 %v3682_v6, %v3681_v51  ;;  %v5343_v51 = vld [vmem:[%s7458_s8 + $0xf8] sm:$0xff]  ;;  %v5344_v6 = vld [vmem:[%s7458_s8 + $0x100] sm:$0xff] }
0x12fc   : > { %v3684_v38 = vrot.slane %v3683_v52, 4 }
0x12fd   : > { %v3744_v54 = vpop.permute.xlu1 %3743 }
0x12fe   : > { %v3685_v49 = vadd.f32 %v3684_v38, %v3683_v52  ;;  %v5345_v52 = vld [vmem:[%s7458_s8 + $0x108] sm:$0xff] }
0x1300   : > { %v3686_v63 = vrot.slane %v3685_v49, 2 }
0x1301   : > { %v3760_v16 = vpop.permute.xlu1 %3759 }
0x1302   : > { %v3687_v43 = vadd.f32 %v3686_v63, %v3685_v49 }
0x1304   : > { %v3688_v62 = vrot.slane %v3687_v43, 1 }
0x1305   : > { %v3764_v24 = vpop.permute.xlu1 %3763 }
0x1306   : > { %v3689_v0 = vadd.f32 %v3688_v62, %v3687_v43 }
0x1308   : > { %v3690_v55 = vmul.f32 0.03125, %v3689_v0 }
0x1309   : > { %v3804_v36 = vpop.permute.xlu1 %3803 }
0x130a   : > { %v3691_v22 = vadd.f32 1e-05, %v3690_v55 }
0x130c   : > { %6170 = vrsqrt.f32 %v3691_v22 }
0x1316   : > { %v6171_v9 = vpop.eup %6170 }
0x1317   : > { %v3696_v60 = vmul.f32 %v6171_v9, %v3672_v46  ;;  %v3693_v44 = vmul.f32 %v6171_v9, %v3669_v58  ;;  %v3694_v59 = vmul.f32 %v6171_v9, %v3670_v4  ;;  %v3695_v17 = vmul.f32 %v6171_v9, %v3671_v25 }
0x1319   : > { %v3725_v18 = vmul.f32 %v3720_v12, %v3696_v60  ;;  %v3722_v1 = vmul.f32 %v3705_v11, %v3693_v44  ;;  %v3723_v20 = vmul.f32 %v3710_v3, %v3694_v59  ;;  %v3724_v19 = vmul.f32 %v3715_v10, %v3695_v17  ;;  %v5349_v10 = vld [vmem:[%s7459_s9 + $0xc8] sm:$0xff] }
0x131b   : > { %v3754_v23 = vadd.f32 %v3749_v15, %v3725_v18  ;;  %v3751_v47 = vadd.f32 %v3734_v39, %v3722_v1  ;;  %v3752_v53 = vadd.f32 %v3739_v2, %v3723_v20  ;;  %v3753_v21 = vadd.f32 %v3744_v54, %v3724_v19  ;;  %v5356_v18 = vld [vmem:[%s7459_s9 + $0x100] sm:$0xff] }
0x131d   : > { %v7108_v27 = vsel %vm1222_vm3, %v3751_v47, %v3760_v16  ;;  %v7111_v28 = vsel %vm1222_vm3, %v3752_v53, %v3762_v13  ;;  %v7114_v29 = vsel %vm1222_vm3, %v3753_v21, %v3764_v24  ;;  %v7117_v30 = vsel %vm1222_vm3, %v3754_v23, %v3766_v14  ;;  %v5353_v47 = vld [vmem:[%s7459_s9 + $0xe8] sm:$0xff]  ;;  %v5351_v53 = vld [vmem:[%s7459_s9 + $0xd8] sm:$0xff]  ;;  %v5354_v21 = vld [vmem:[%s7459_s9 + $0xf0] sm:$0xff] }
0x131e   : > { %v6039_v31 = vpack.c.bf16 %v7111_v28, %v7108_v27  ;;  %v6043_v32 = vpack.c.bf16 %v7117_v30, %v7114_v29 }
0x1320   : > { %6040 = vmatprep.subr.bf16.mxu0 %v6039_v31 }
0x1321   : > { %6042 = vmatpush3.bf16.msra.mxu0 %v6039_v31 }
0x1322   : > { %6044 = vmatprep.subr.bf16.mxu0 %v6043_v32 }
0x1325   : > { %6046 = vmatpush3.bf16.msra.mxu0 %v6043_v32 }
0x1326   : > { %6051 = vmatprep.subr.bf16.mxu0 %v6287_v7 }
0x1328   : > { %5856 = vmatmul.mubr.msk.f32.vlgmr.msra.gmra.mrb[46].mxu0 %vm444_vm0, %v5337_v41 }
0x1329   : > { %5858 = vmatprep.mubr.msk.f32.mxu0 %vm444_vm0, %v5338_v33 }
0x132c   : > { %5859 = vmatmul.mubr.msk.f32.gmra.mrb[48].mxu0 %vm444_vm0, %v5339_v34 }
0x132d   : > { %5861 = vmatprep.mubr.msk.f32.mxu0 %vm444_vm0, %v5340_v35  ;;  %v5355_v35 = vld [vmem:[%s7459_s9 + $0xf8] sm:$0xff] }
0x1330   : > { %5862 = vmatmul.mubr.msk.f32.gmra.mrb[50].mxu0 %vm444_vm0, %v5341_v61 }
0x1331   : > { %5864 = vmatprep.mubr.msk.f32.mxu0 %vm444_vm0, %v5342_v26 }
0x1334   : > { %5865 = vmatmul.mubr.msk.f32.gmra.mrb[52].mxu0 %vm444_vm0, %v5343_v51 }
0x1335   : > { %5867 = vmatprep.mubr.msk.f32.mxu0 %vm444_vm0, %v5344_v6 }
0x1338   : > { %5868 = vmatmul.mubr.msk.f32.gmra.mrb[54].mxu0 %vm444_vm0, %v5345_v52 }
0x13fb   : > { %v7144_v5 = vpop.f32.mrb[46].mxu0 }
0x13fc   : > { %v3963_v37 = vpop.f32.mrb[47].mxu0 }
0x13fd   : > { %v3964_v58 = vadd.f32 %v3963_v37, %v3804_v36 }
0x13ff   : > { %4022 = vxpose.xlu1.b32.start.end [1/1] (short) (narrow) %v3964_v58, 24  ;;  %v7146_v4 = vpop.f32.mrb[48].mxu0 }
0x1400   : > { %v7148_v25 = vpop.f32.mrb[49].mxu0 }
0x1403   : > { %v7150_v46 = vpop.f32.mrb[50].mxu0 }
0x1404   : > { %v3983_v42 = vpop.f32.mrb[51].mxu0 }
0x1405   : > { %v3984_v50 = vadd.f32 %v3983_v42, %v3824_v40 }
0x1407   : > { %5874 = vmatpush3.msra.mxu1 %v3984_v50  ;;  %v7192_v1 = vpop.f32.mrb[52].mxu0 }
0x1408   : > { %6047 = vmatprep.subr.bf16.mxu1 %v6287_v7  ;;  %v3993_v20 = vpop.f32.mrb[53].mxu0 }
0x140b   : > { %v7194_v19 = vpop.f32.mrb[54].mxu0 }
0x140c   : > { %v4003_v23 = vpop.f32.mrb[55].mxu0 }
0x1425   : > { %3813 = vperm.xlu1 %6111, %v5350_v56  }
0x147f   : > { %v4038_v57 = vpop.trf.xlu1 }
0x1480   : > { %5876 = vmatmul.mubr.msk.f32.vlgmr.msra.gmra.mrb[44].mxu1 %vm1222_vm3, %v4038_v57 }
0x1481   : > { %5878 = vmatprep.mubr.msk.f32.mxu1 %vm6288_vm2, %v6289_v45 }
0x1483   : > { %v4039_v8 = vpop.trf.xlu1 }
0x1484   : > { %5879 = vmatmul.mubr.msk.f32.gmra.mrb[46].mxu1 %vm1222_vm3, %v4039_v8 }
0x1485   : > { %5881 = vmatprep.mubr.msk.f32.mxu1 %vm6288_vm2, %v6289_v45 }
0x1487   : > { %v4040_v48 = vpop.trf.xlu1 }
0x1488   : > { %5882 = vmatmul.mubr.msk.f32.gmra.mrb[48].mxu1 %vm1222_vm3, %v4040_v48 }
0x1489   : > { %5890 = vmatprep.mubr.msk.f32.mxu1 %vm6288_vm2, %v6289_v45 }
0x14a4   : > { %v3814_v61 = vpop.permute.xlu1 %3813 }
0x14a5   : > { %v3974_v36 = vadd.f32 %v7148_v25, %v3814_v61 }
0x1553   : > { %v4129_v38 = vpop.f32.mrb[44].mxu1 }
0x1554   : > { %v4143_v49 = vmul.f32 0.17677669, %v4129_v38  ;;  %v5877_v11 = vpop.f32.mrb[45].mxu1 }
0x1556   : > { %v4147_v63 = vsel %vm4146_vm6, %v4143_v49, -inf }
0x1557   : > { %4148 = vmax.xlane.f32.xlu0 %v4147_v63  ;;  %v4134_v3 = vpop.f32.mrb[46].mxu1 }
0x1558   : > { %v4144_v43 = vmul.f32 0.17677669, %v4134_v3  ;;  %v5880_v62 = vpop.f32.mrb[47].mxu1 }
0x155a   : > { %v4150_v39 = vsel %vm4146_vm6, %v4144_v43, -inf }
0x155b   : > { %4151 = vmax.xlane.f32.xlu0 %v4150_v39  ;;  %v4139_v0 = vpop.f32.mrb[48].mxu1 }
0x155c   : > { %v4145_v2 = vmul.f32 0.17677669, %v4139_v0  ;;  %v5883_v55 = vpop.f32.mrb[49].mxu1 }
0x155e   : > { %v4153_v22 = vsel %vm4146_vm6, %v4145_v2, -inf }
0x155f   : > { %4154 = vmax.xlane.f32.xlu0 %v4153_v22 }
0x1575   : > { %3808 = vperm.xlu0 %6110, %v5349_v10  }
0x15e4   : > { %v4149_v12 = vpop.xlane.xlu0 %4148 }
0x15e5   : > { %v4156_v54 = vsub.f32 %v4143_v49, %v4149_v12 }
0x15e7   : > { %v4159_v15 = vmul.f32 1.442695, %v4156_v54 }
0x15e8   : > { %v4152_v9 = vpop.xlane.xlu0 %4151 }
0x15e9   : > { %6172 = vpow2.f32 %v4159_v15  ;;  %v4157_v16 = vsub.f32 %v4144_v43, %v4152_v9 }
0x15eb   : > { %v4161_v60 = vmul.f32 1.442695, %v4157_v16 }
0x15ec   : > { %v4155_v24 = vpop.xlane.xlu0 %4154 }
0x15ed   : > { %6174 = vpow2.f32 %v4161_v60  ;;  %v4158_v14 = vsub.f32 %v4145_v2, %v4155_v24 }
0x15ef   : > { %v4163_v31 = vmul.f32 1.442695, %v4158_v14 }
0x15f1   : > { %6176 = vpow2.f32 %v4163_v31 }
0x15f3   : > { %v6173_v44 = vpop.eup %6172 }
0x15f4   : > { %v4165_v59 = vsel %vm4146_vm6, %v6173_v44, 0.0  ;;  %v3809_v41 = vpop.permute.xlu0 %3808 }
0x15f5   : > { %4166 = vadd.xlane.f32.xlu1 %v4165_v59  ;;  %v3969_v34 = vadd.f32 %v7144_v5, %v3809_v41 }
0x15f7   : > { %v6175_v17 = vpop.eup %6174 }
0x15f8   : > { %v4168_v13 = vsel %vm4146_vm6, %v6175_v17, 0.0 }
0x15f9   : > { %4169 = vadd.xlane.f32.xlu0 %v4168_v13 }
0x15fb   : > { %v6177_v32 = vpop.eup %6176 }
0x15fc   : > { %v4171_v33 = vsel %vm4146_vm6, %v6177_v32, 0.0 }
0x1606   : > { %3843 = vperm.xlu1 %6111, %v5356_v18  }
0x160a   : > { %3828 = vperm.xlu1 %6111, %v5353_v47  }
0x160f   : > { %3818 = vperm.xlu0 %6110, %v5351_v53  }
0x1613   : > { %3833 = vperm.xlu0 %6110, %v5354_v21  }
0x162e   : > { %4172 = vadd.xlane.f32.xlu1 %v4171_v33 }
0x1631   : > { %4262 = vxpose.xlu0.b32.start.end [1/1] (short) (narrow) %v3969_v34, 24 }
0x163f   : > { %3838 = vperm.xlu1 %6111, %v5355_v35  }
0x1668   : > { %4501 = vxpose.xlu1.b32.start.end [1/1] (short) (narrow) %v3974_v36, 24  ;;  %v5346_v36 = vld [vmem:[%s7458_s8 + $0x110] sm:$0xff] }
0x1669   : > { %5870 = vmatprep.mubr.msk.f32.mxu0 %vm444_vm0, %v5346_v36 }
0x1682   : > { %v4167_v37 = vpop.xlane.xlu1 %4166 }
0x1683   : > { %6178 = vrcp.f32 %v4167_v37  ;;  %v5347_v37 = vld [vmem:[%s7458_s8 + $0x118] sm:$0xff] }
0x1684   : > { %5871 = vmatmul.mubr.msk.f32.gmra.mrb[56].mxu0 %vm444_vm0, %v5347_v37 }
0x1685   : > { %5910 = vmatprep.mubr.msk.f32.mxu0 %vm6288_vm2, %v6289_v45 }
0x1686   : > { %v4170_v58 = vpop.xlane.xlu0 %4169  ;;  %v3844_v48 = vpop.permute.xlu1 %3843 }
0x1687   : > { %6180 = vrcp.f32 %v4170_v58  ;;  %v4004_v49 = vadd.f32 %v4003_v23, %v3844_v48 }
0x168a   : > { %v3829_v26 = vpop.permute.xlu1 %3828 }
0x168b   : > { %v3989_v11 = vadd.f32 %v7150_v46, %v3829_v26 }
0x168d   : > { %v6179_v42 = vpop.eup %6178 }
0x168e   : > { %v3819_v40 = vpop.permute.xlu0 %3818  ;;  %v4175_v5 = vmul.f32 %v6179_v42, %v6173_v44 }
0x168f   : > { %v3979_v50 = vadd.f32 %v7146_v4, %v3819_v40 }
0x1691   : > { %v6181_v56 = vpop.eup %6180  ;;  %4740 = vxpose.xlu0.b32.start.end [1/1] (short) (narrow) %v3979_v50, 24 }
0x1692   : > { %v4177_v57 = vmul.f32 %v6181_v56, %v6175_v17  ;;  %v3834_v4 = vpop.permute.xlu0 %3833 }
0x1693   : > { %v3994_v63 = vadd.f32 %v3993_v20, %v3834_v4 }
0x1694   : > { %v6048_v25 = vpack.c.bf16 %v4177_v57, %v4175_v5 }
0x1696   : > { %6050 = vmatpush3.bf16.xpose.msk.msra.mxu1 %vm7214_vm7, %v6048_v25 }
0x1697   : > { %5888 = vmatprep.subr.mxu1 %v6289_v45 }
0x16b1   : > { %v4278_v38 = vpop.trf.xlu0 }
0x16b5   : > { %v4279_v3 = vpop.trf.xlu0 }
0x16b9   : > { %v4280_v46 = vpop.trf.xlu0 }
0x16bb   : > { %v4173_v51 = vpop.xlane.xlu1 %4172 }
0x16bc   : > { %6182 = vrcp.f32 %v4173_v51 }
0x16bf   : > { %v3839_v43 = vpop.permute.xlu1 %3838 }
0x16c0   : > { %v3999_v62 = vadd.f32 %v7192_v1, %v3839_v43 }
0x16c6   : > { %v6183_v6 = vpop.eup %6182 }
0x16c7   : > { %v4179_v52 = vmul.f32 %v6183_v6, %v6177_v32 }
0x16c9   : > { %5889 = vmatpush3.xpose.msk.msra.mxu1 %vm4146_vm6, %v4179_v52 }
0x16ca   : > { %5893 = vmatprep.subr.mxu1 %v6289_v45 }
0x16cc   : > { %5891 = vmatmul.mubr.msk.f32.vlgmr.msra.gmra.mrb[50].mxu1 %vm4146_vm6, %v4004_v49 }
0x16cd   : > { %5894 = vmatpush3.msra.mxu1 %v3989_v11  ;;  %5895 = vmatprep.mubr.msk.f32.mxu1 %vm6288_vm2, %v6289_v45 }
0x16ce   : > { %5913 = vmatprep.subr.mxu1 %v6289_v45 }
0x16d0   : > { %5896 = vmatmul.mubr.msk.f32.vlgmr.msra.gmra.mrb[52].mxu1 %vm1222_vm3, %v4278_v38 }
0x16d1   : > { %5914 = vmatpush3.msra.mxu1 %v3994_v63  ;;  %5898 = vmatprep.mubr.msk.f32.mxu1 %vm6288_vm2, %v6289_v45 }
0x16d2   : > { %5933 = vmatprep.subr.mxu1 %v6289_v45 }
0x16d4   : > { %5899 = vmatmul.mubr.msk.f32.gmra.mrb[54].mxu1 %vm1222_vm3, %v4279_v3 }
0x16d5   : > { %5901 = vmatprep.mubr.msk.f32.mxu1 %vm6288_vm2, %v6289_v45 }
0x16d8   : > { %5902 = vmatmul.mubr.msk.f32.gmra.mrb[56].mxu1 %vm1222_vm3, %v4280_v46 }
0x16d9   : > { %5915 = vmatprep.mubr.msk.f32.mxu1 %vm6288_vm2, %v6289_v45 }
0x16e8   : > { %v4517_v39 = vpop.trf.xlu1 }
0x16e9   : > { %5916 = vmatmul.mubr.msk.f32.vlgmr.msra.gmra.mrb[58].mxu1 %vm1222_vm3, %v4517_v39 }
0x16ea   : > { %5934 = vmatpush3.msra.mxu1 %v3999_v62  ;;  %5918 = vmatprep.mubr.msk.f32.mxu1 %vm6288_vm2, %v6289_v45 }
0x16ec   : > { %v4518_v0 = vpop.trf.xlu1 }
0x16ed   : > { %5919 = vmatmul.mubr.msk.f32.gmra.mrb[60].mxu1 %vm1222_vm3, %v4518_v0 }
0x16ee   : > { %5921 = vmatprep.mubr.msk.f32.mxu1 %vm6288_vm2, %v6289_v45 }
0x16f0   : > { %v4519_v2 = vpop.trf.xlu1 }
0x16f1   : > { %5922 = vmatmul.mubr.msk.f32.gmra.mrb[62].mxu1 %vm1222_vm3, %v4519_v2 }
0x16f2   : > { %5935 = vmatprep.mubr.msk.f32.mxu1 %vm6288_vm2, %v6289_v45 }
0x1711   : > { %v4756_v55 = vpop.trf.xlu0 }
0x1712   : > { %5936 = vmatmul.mubr.msk.f32.vlgmr.msra.gmra.mrb[64].mxu1 %vm1222_vm3, %v4756_v55 }
0x1713   : > { %5938 = vmatprep.mubr.msk.f32.mxu1 %vm6288_vm2, %v6289_v45 }
0x1715   : > { %v4757_v22 = vpop.trf.xlu0 }
0x1716   : > { %5939 = vmatmul.mubr.msk.f32.gmra.mrb[66].mxu1 %vm1222_vm3, %v4757_v22 }
0x1717   : > { %5941 = vmatprep.mubr.msk.f32.mxu1 %vm6288_vm2, %v6289_v45 }
0x1719   : > { %v4758_v10 = vpop.trf.xlu0 }
0x171a   : > { %5942 = vmatmul.mubr.msk.f32.gmra.mrb[68].mxu1 %vm1222_vm3, %v4758_v10 }
0x179f   : > { %v7255_v12 = vpop.f32.mrb[50].mxu1 }
0x17a0   : > { %v5892_v54 = vpop.f32.mrb[51].mxu1 }
0x17a3   : > { %v4369_v15 = vpop.f32.mrb[52].mxu1 }
0x17a4   : > { %v4383_v9 = vmul.f32 0.17677669, %v4369_v15  ;;  %v5897_v16 = vpop.f32.mrb[53].mxu1 }
0x17a6   : > { %v4386_v60 = vsel %vm4146_vm6, %v4383_v9, -inf }
0x17a7   : > { %4387 = vmax.xlane.f32.xlu0 %v4386_v60  ;;  %v4374_v44 = vpop.f32.mrb[54].mxu1 }
0x17a8   : > { %v4384_v59 = vmul.f32 0.17677669, %v4374_v44  ;;  %v5900_v17 = vpop.f32.mrb[55].mxu1 }
0x17aa   : > { %v4389_v13 = vsel %vm4146_vm6, %v4384_v59, -inf }
0x17ab   : > { %4390 = vmax.xlane.f32.xlu1 %v4389_v13  ;;  %v4379_v18 = vpop.f32.mrb[56].mxu1 }
0x17ac   : > { %v4385_v1 = vmul.f32 0.17677669, %v4379_v18  ;;  %v5903_v20 = vpop.f32.mrb[57].mxu1 }
0x17ae   : > { %v4392_v23 = vsel %vm4146_vm6, %v4385_v1, -inf }
0x17af   : > { %4393 = vmax.xlane.f32.xlu1 %v4392_v23 }
0x17bc   : > { %v4608_v47 = vpop.f32.mrb[58].mxu1 }
0x17bd   : > { %v4622_v53 = vmul.f32 0.17677669, %v4608_v47  ;;  %v5917_v21 = vpop.f32.mrb[59].mxu1 }
0x17bf   : > { %v4625_v24 = vsel %vm4146_vm6, %v4622_v53, -inf }
0x17c0   : > { %4626 = vmax.xlane.f32.xlu0 %v4625_v24  ;;  %v4613_v14 = vpop.f32.mrb[60].mxu1 }
0x17c1   : > { %v4623_v31 = vmul.f32 0.17677669, %v4613_v14  ;;  %v5920_v32 = vpop.f32.mrb[61].mxu1 }
0x17c3   : > { %v4628_v41 = vsel %vm4146_vm6, %v4623_v31, -inf }
0x17c4   : > { %4629 = vmax.xlane.f32.xlu1 %v4628_v41  ;;  %v4618_v33 = vpop.f32.mrb[62].mxu1 }
0x17c5   : > { %v4624_v34 = vmul.f32 0.17677669, %v4618_v33  ;;  %v5923_v35 = vpop.f32.mrb[63].mxu1 }
0x17c7   : > { %v4631_v61 = vsel %vm4146_vm6, %v4624_v34, -inf }
0x17c8   : > { %4632 = vmax.xlane.f32.xlu0 %v4631_v61 }
0x17e5   : > { %v4847_v58 = vpop.f32.mrb[64].mxu1 }
0x17e6   : > { %v7273_v40 = vmul.f32 0.17677669, %v4847_v58  ;;  %v5937_v42 = vpop.f32.mrb[65].mxu1 }
0x17e8   : > { %v4864_v50 = vsel %vm4146_vm6, %v7273_v40, -inf }
0x17e9   : > { %4865 = vmax.xlane.f32.xlu1 %v4864_v50  ;;  %v4852_v56 = vpop.f32.mrb[66].mxu1  ;;  %v5358_v50 = vld [vmem:[%s7459_s9 + $0x110] sm:$0xff] }
0x17ea   : > { %v4862_v5 = vmul.f32 0.17677669, %v4852_v56  ;;  %v5940_v57 = vpop.f32.mrb[67].mxu1  ;;  %v7322_v56 = vpop.f32.mrb[56].mxu0 }
0x17eb   : > { %v4013_v57 = vpop.f32.mrb[57].mxu0 }
0x17ec   : > { %v4867_v25 = vsel %vm4146_vm6, %v4862_v5, -inf }
0x17ed   : > { %4868 = vmax.xlane.f32.xlu0 %v4867_v25  ;;  %v4857_v48 = vpop.f32.mrb[68].mxu1  ;;  %v5404_v25 = vld [vmem:[%s7461_s11 + $0x40] sm:$0xff] }
0x17ee   : > { %v4863_v26 = vmul.f32 0.17677669, %v4857_v48  ;;  %v5943_v51 = vpop.f32.mrb[69].mxu1  ;;  %v5405_v48 = vld [vmem:[%s7461_s11 + $0x48] sm:$0xff] }
0x17ef   : > { %v5406_v51 = vld [vmem:[%s7461_s11 + $0x50] sm:$0xff] }
0x17f0   : > { %v4870_v4 = vsel %vm4146_vm6, %v4863_v26, -inf }
0x17f1   : > { %4871 = vmax.xlane.f32.xlu1 %v4870_v4  ;;  %v5401_v4 = vld [vmem:[%s7460_s10 + $0x48] sm:$0xff] }
0x1834   : > { %v4388_v6 = vpop.xlane.xlu0 %4387 }
0x1835   : > { %v4395_v52 = vsub.f32 %v4383_v9, %v4388_v6  ;;  %v5402_v6 = vld [vmem:[%s7460_s10 + $0x50] sm:$0xff] }
0x1837   : > { %v4398_v38 = vmul.f32 1.442695, %v4395_v52  ;;  %v5403_v52 = vld [vmem:[%s7460_s10 + $0x58] sm:$0xff] }
0x1838   : > { %v4391_v49 = vpop.xlane.xlu1 %4390 }
0x1839   : > { %6184 = vpow2.f32 %v4398_v38  ;;  %v4396_v11 = vsub.f32 %v4384_v59, %v4391_v49  ;;  %v5407_v38 = vld [vmem:[%s7461_s11 + $0x58] sm:$0xff] }
0x183b   : > { %v4400_v63 = vmul.f32 1.442695, %v4396_v11 }
0x183c   : > { %v4394_v3 = vpop.xlane.xlu1 %4393 }
0x183d   : > { %6186 = vpow2.f32 %v4400_v63  ;;  %v4397_v46 = vsub.f32 %v4385_v1, %v4394_v3 }
0x183f   : > { %v4402_v43 = vmul.f32 1.442695, %v4397_v46 }
0x1841   : > { %6188 = vpow2.f32 %v4402_v43 }
0x1843   : > { %v7279_v62 = vpop.eup %6184 }
0x1844   : > { %v4404_v39 = vsel %vm4146_vm6, %v7279_v62, 0.0 }
0x1845   : > { %4405 = vadd.xlane.f32.xlu0 %v4404_v39 }
0x1847   : > { %v7283_v0 = vpop.eup %6186 }
0x1848   : > { %v4407_v2 = vsel %vm4146_vm6, %v7283_v0, 0.0 }
0x1849   : > { %4408 = vadd.xlane.f32.xlu1 %v4407_v2 }
0x184b   : > { %v7287_v55 = vpop.eup %6188 }
0x184c   : > { %v4410_v22 = vsel %vm4146_vm6, %v7287_v55, 0.0 }
0x184d   : > { %v4627_v10 = vpop.xlane.xlu0 %4626  ;;  %4411 = vadd.xlane.f32.xlu0 %v4410_v22 }
0x184e   : > { %v4634_v54 = vsub.f32 %v4622_v53, %v4627_v10  ;;  %v5357_v53 = vld [vmem:[%s7459_s9 + $0x108] sm:$0xff] }
0x1850   : > { %v4637_v15 = vmul.f32 1.442695, %v4634_v54 }
0x1851   : > { %v4630_v9 = vpop.xlane.xlu1 %4629 }
0x1852   : > { %6190 = vpow2.f32 %v4637_v15  ;;  %v4635_v16 = vsub.f32 %v4623_v31, %v4630_v9 }
0x1854   : > { %v4639_v60 = vmul.f32 1.442695, %v4635_v16 }
0x1855   : > { %v4633_v44 = vpop.xlane.xlu0 %4632 }
0x1856   : > { %6192 = vpow2.f32 %v4639_v60  ;;  %v4636_v59 = vsub.f32 %v4624_v34, %v4633_v44 }
0x1858   : > { %v4641_v17 = vmul.f32 1.442695, %v4636_v59 }
0x185a   : > { %6194 = vpow2.f32 %v4641_v17 }
0x185c   : > { %v7291_v13 = vpop.eup %6190 }
0x185d   : > { %v4643_v18 = vsel %vm4146_vm6, %v7291_v13, 0.0 }
0x185e   : > { %4644 = vadd.xlane.f32.xlu1 %v4643_v18 }
0x1860   : > { %v7295_v1 = vpop.eup %6192 }
0x1861   : > { %v4646_v20 = vsel %vm4146_vm6, %v7295_v1, 0.0 }
0x1862   : > { %4647 = vadd.xlane.f32.xlu0 %v4646_v20 }
0x1864   : > { %v7299_v23 = vpop.eup %6194 }
0x1865   : > { %v4649_v47 = vsel %vm4146_vm6, %v7299_v23, 0.0 }
0x1866   : > { %4650 = vadd.xlane.f32.xlu1 %v4649_v47 }
0x1876   : > { %v4866_v21 = vpop.xlane.xlu1 %4865 }
0x1877   : > { %v4873_v33 = vsub.f32 %v7273_v40, %v4866_v21 }
0x1878   : > { %3848 = vperm.xlu0 %6110, %v5357_v53  }
0x1879   : > { %v4876_v35 = vmul.f32 1.442695, %v4873_v33  ;;  %v4979_v33 = vadd.f32 %v7255_v12, %v7108_v27 }
0x187a   : > { %v4869_v24 = vpop.xlane.xlu0 %4868 }
0x187b   : > { %v4874_v14 = vsub.f32 %v4862_v5, %v4869_v24  ;;  %v5400_v5 = vld [vmem:[%s7460_s10 + $0x40] sm:$0xff] }
0x187d   : > { %v4878_v31 = vmul.f32 1.442695, %v4874_v14 }
0x187e   : > { %v4872_v32 = vpop.xlane.xlu1 %4871 }
0x187f   : > { %6196 = vpow2.f32 %v4878_v31  ;;  %v4875_v41 = vsub.f32 %v4863_v26, %v4872_v32  ;;  %v5359_v26 = vld [vmem:[%s7459_s9 + $0x118] sm:$0xff] }
0x1881   : > { %v4880_v34 = vmul.f32 1.442695, %v4875_v41 }
0x1883   : > { %6198 = vpow2.f32 %v4880_v34 }
0x1884   : > { %6200 = vpow2.f32 %v4876_v35 }
0x1889   : > { %v7307_v61 = vpop.eup %6196 }
0x188a   : > { %v4885_v36 = vsel %vm4146_vm6, %v7307_v61, 0.0 }
0x188b   : > { %4886 = vadd.xlane.f32.xlu1 %v4885_v36 }
0x188d   : > { %v7311_v37 = vpop.eup %6198 }
0x188e   : > { %v4888_v58 = vsel %vm4146_vm6, %v7311_v37, 0.0  ;;  %v7315_v42 = vpop.eup %6200 }
0x188f   : > { %4889 = vadd.xlane.f32.xlu1 %v4888_v58  ;;  %v4882_v40 = vsel %vm4146_vm6, %v7315_v42, 0.0 }
0x1897   : > { %4883 = vadd.xlane.f32.xlu0 %v4882_v40 }
0x18a0   : > { %3853 = vperm.xlu1 %6111, %v5358_v50  }
0x18a4   : > { %5032 = vperm.xlu1 %6111, %v5400_v5  }
0x18a8   : > { %5061 = vperm.xlu1 %6111, %v5404_v25  }
0x18ac   : > { %5066 = vperm.xlu1 %6111, %v5405_v48  }
0x18ad   : > { %3858 = vperm.xlu0 %6110, %v5359_v26  }
0x18b0   : > { %5071 = vperm.xlu1 %6111, %v5406_v51  }
0x18b1   : > { %5037 = vperm.xlu0 %6110, %v5401_v4  }
0x18b5   : > { %5042 = vperm.xlu0 %6110, %v5402_v6  }
0x18b9   : > { %5047 = vperm.xlu0 %6110, %v5403_v52  }
0x18bd   : > { %5076 = vperm.xlu0 %6110, %v5407_v38  }
0x18d2   : > { %v4406_v49 = vpop.xlane.xlu0 %4405 }
0x18d3   : > { %6202 = vrcp.f32 %v4406_v49 }
0x18d6   : > { %v4409_v11 = vpop.xlane.xlu1 %4408 }
0x18d7   : > { %6204 = vrcp.f32 %v4409_v11 }
0x18da   : > { %v4412_v63 = vpop.xlane.xlu0 %4411 }
0x18db   : > { %6206 = vrcp.f32 %v4412_v63 }
0x18dd   : > { %v6203_v3 = vpop.eup %6202 }
0x18de   : > { %v4414_v43 = vmul.f32 %v6203_v3, %v7279_v62 }
0x18e1   : > { %v6205_v46 = vpop.eup %6204 }
0x18e2   : > { %v4416_v39 = vmul.f32 %v6205_v46, %v7283_v0 }
0x18e4   : > { %v6052_v2 = vpack.c.bf16 %v4416_v39, %v4414_v43 }
0x18e5   : > { %v6207_v22 = vpop.eup %6206 }
0x18e6   : > { %6054 = vmatpush3.bf16.xpose.msk.msra.mxu0 %vm7214_vm7, %v6052_v2  ;;  %v4418_v54 = vmul.f32 %v6207_v22, %v7287_v55 }
0x18e7   : > { %5908 = vmatprep.subr.mxu0 %v6289_v45 }
0x18eb   : > { %v4645_v10 = vpop.xlane.xlu1 %4644 }
0x18ec   : > { %6208 = vrcp.f32 %v4645_v10 }
0x18ee   : > { %5909 = vmatpush3.xpose.msk.msra.mxu0 %vm4146_vm6, %v4418_v54 }
0x18ef   : > { %v4648_v15 = vpop.xlane.xlu0 %4647  ;;  %6055 = vmatprep.subr.bf16.mxu0 %v6287_v7 }
0x18f0   : > { %6210 = vrcp.f32 %v4648_v15 }
0x18f3   : > { %v4651_v62 = vpop.xlane.xlu1 %4650 }
0x18f4   : > { %6212 = vrcp.f32 %v4651_v62 }
0x18f6   : > { %v6209_v0 = vpop.eup %6208 }
0x18f7   : > { %v3849_v9 = vpop.permute.xlu0 %3848  ;;  %v4653_v44 = vmul.f32 %v6209_v0, %v7291_v13 }
0x18f8   : > { %v4009_v16 = vadd.f32 %v7194_v19, %v3849_v9 }
0x18fa   : > { %v6211_v60 = vpop.eup %6210  ;;  %5911 = vmatmul.mubr.msk.f32.vlgmr.msra.gmra.mrb[58].mxu0 %vm4146_vm6, %v4009_v16 }
0x18fb   : > { %v4655_v55 = vmul.f32 %v6211_v60, %v7295_v1  ;;  %5930 = vmatprep.mubr.msk.f32.mxu0 %vm6288_vm2, %v6289_v45 }
0x18fd   : > { %v6056_v59 = vpack.c.bf16 %v4655_v55, %v4653_v44 }
0x18fe   : > { %v6213_v17 = vpop.eup %6212 }
0x18ff   : > { %6058 = vmatpush3.bf16.xpose.msk.msra.mxu0 %vm7214_vm7, %v6056_v59  ;;  %v4657_v18 = vmul.f32 %v6213_v17, %v7299_v23 }
0x1900   : > { %5928 = vmatprep.subr.mxu0 %v6289_v45 }
0x1907   : > { %5929 = vmatpush3.xpose.msk.msra.mxu0 %vm4146_vm6, %v4657_v18 }
0x1908   : > { %6059 = vmatprep.subr.bf16.mxu0 %v6287_v7 }
0x1918   : > { %v4887_v19 = vpop.xlane.xlu1 %4886 }
0x1919   : > { %6214 = vrcp.f32 %v4887_v19 }
0x191c   : > { %v4890_v13 = vpop.xlane.xlu1 %4889 }
0x1920   : > { %v3854_v20 = vpop.permute.xlu1 %3853 }
0x1921   : > { %v4014_v1 = vadd.f32 %v4013_v57, %v3854_v20 }
0x1923   : > { %5931 = vmatmul.mubr.msk.f32.vlgmr.msra.gmra.mrb[60].mxu0 %vm4146_vm6, %v4014_v1  ;;  %v6215_v53 = vpop.eup %6214 }
0x1924   : > { %v4884_v47 = vpop.xlane.xlu0 %4883  ;;  %5950 = vmatprep.mubr.msk.f32.mxu0 %vm6288_vm2, %v6289_v45  ;;  %v4894_v23 = vmul.f32 %v6215_v53, %v7307_v61  ;;  %v4983_v61 = vsel %vm4146_vm6, %v4979_v33, 0.0  ;;  %v5033_v59 = vpop.permute.xlu1 %5032 }
0x1925   : > { %6216 = vrcp.f32 %v4884_v47 }
0x1926   : > { %6218 = vrcp.f32 %v4890_v13 }
0x1928   : > { %v5062_v19 = vpop.permute.xlu1 %5061 }
0x192c   : > { %v3859_v32 = vpop.permute.xlu0 %3858 }
0x192d   : > { %v4019_v41 = vadd.f32 %v7322_v56, %v3859_v32 }
0x192f   : > { %v6217_v21 = vpop.eup %6216 }
0x1930   : > { %v4892_v24 = vmul.f32 %v6217_v21, %v7315_v42  ;;  %v6219_v14 = vpop.eup %6218  ;;  %v5038_v17 = vpop.permute.xlu0 %5037 }
0x1931   : > { %v4896_v31 = vmul.f32 %v6219_v14, %v7311_v37 }
0x1932   : > { %v6060_v7 = vpack.c.bf16 %v4894_v23, %v4892_v24 }
0x1934   : > { %6062 = vmatpush3.bf16.xpose.msk.msra.mxu0 %vm7214_vm7, %v6060_v7  ;;  %v5043_v21 = vpop.permute.xlu0 %5042  ;;  %v5067_v7 = vpop.permute.xlu1 %5066 }
0x1935   : > { %5948 = vmatprep.subr.mxu0 %v6289_v45 }
0x1938   : > { %v5048_v32 = vpop.permute.xlu0 %5047 }
0x193c   : > { %5949 = vmatpush3.xpose.msk.msra.mxu0 %vm4146_vm6, %v4896_v31 }
0x193f   : > { %5951 = vmatmul.mubr.msk.f32.vlgmr.msra.gmra.mrb[62].mxu0 %vm4146_vm6, %v4019_v41  ;;  %v5072_v41 = vpop.permute.xlu1 %5071 }
0x19cd   : > { %v4497_v34 = vpop.f32.mrb[58].mxu0 }
0x19ce   : > { %v4980_v35 = vadd.f32 %v4497_v34, %v7111_v28  ;;  %v5912_v8 = vpop.f32.mrb[59].mxu0 }
0x19d0   : > { %v4984_v45 = vsel %vm4146_vm6, %v4980_v35, 0.0 }
0x19d1   : > { %v4985_v36 = vadd.f32 %v4984_v45, %v4983_v61 }
0x19f6   : > { %v4736_v37 = vpop.f32.mrb[60].mxu0 }
0x19f7   : > { %v4981_v58 = vadd.f32 %v4736_v37, %v7114_v29  ;;  %v5932_v42 = vpop.f32.mrb[61].mxu0 }
0x19f9   : > { %v4986_v40 = vsel %vm4146_vm6, %v4981_v58, 0.0 }
0x19fa   : > { %v4987_v50 = vadd.f32 %v4986_v40, %v4985_v36 }
0x1a12   : > { %v4975_v56 = vpop.f32.mrb[62].mxu0 }
0x1a13   : > { %v4982_v5 = vadd.f32 %v4975_v56, %v7117_v30  ;;  %v5952_v27 = vpop.f32.mrb[63].mxu0 }
0x1a15   : > { %v4988_v12 = vsel %vm4146_vm6, %v4982_v5, 0.0 }
0x1a16   : > { %v4989_v28 = vadd.f32 %v4988_v12, %v4987_v50 }
0x1a18   : > { %v4990_v57 = vrot.slane %v4989_v28, 4 }
0x1a1a   : > { %v4991_v25 = vadd.f32 %v4990_v57, %v4989_v28 }
0x1a1c   : > { %v4992_v48 = vrot.slane %v4991_v25, 2 }
0x1a1e   : > { %v4993_v26 = vadd.f32 %v4992_v48, %v4991_v25 }
0x1a20   : > { %v4994_v51 = vrot.slane %v4993_v26, 1 }
0x1a22   : > { %v4995_v4 = vadd.f32 %v4994_v51, %v4993_v26 }
0x1a24   : > { %v4996_v6 = vmul.f32 0.03125, %v4995_v4 }
0x1a26   : > { %v4997_v52 = vsub.f32 %v4979_v33, %v4996_v6  ;;  %v4998_v29 = vsub.f32 %v4980_v35, %v4996_v6  ;;  %v4999_v38 = vsub.f32 %v4981_v58, %v4996_v6  ;;  %v5000_v49 = vsub.f32 %v4982_v5, %v4996_v6  ;;  %v5077_v35 = vpop.permute.xlu0 %5076 }
0x1a28   : > { %v5001_v11 = vmul.f32 %v4997_v52, %v4997_v52  ;;  %v5002_v63 = vmul.f32 %v4998_v29, %v4998_v29  ;;  %v5003_v3 = vmul.f32 %v4999_v38, %v4999_v38  ;;  %v5004_v46 = vmul.f32 %v5000_v49, %v5000_v49 }
0x1a2a   : > { %v5005_v30 = vsel %vm4146_vm6, %v5001_v11, 0.0  ;;  %v5006_v43 = vsel %vm4146_vm6, %v5002_v63, 0.0  ;;  %v5008_v2 = vsel %vm4146_vm6, %v5003_v3, 0.0  ;;  %v5010_v10 = vsel %vm4146_vm6, %v5004_v46, 0.0 }
0x1a2b   : > { %v5007_v39 = vadd.f32 %v5006_v43, %v5005_v30 }
0x1a2d   : > { %v5009_v22 = vadd.f32 %v5008_v2, %v5007_v39 }
0x1a2f   : > { %v5011_v54 = vadd.f32 %v5010_v10, %v5009_v22 }
0x1a31   : > { %v5012_v15 = vrot.slane %v5011_v54, 4 }
0x1a33   : > { %v5013_v62 = vadd.f32 %v5012_v15, %v5011_v54 }
0x1a35   : > { %v5014_v9 = vrot.slane %v5013_v62, 2 }
0x1a37   : > { %v5015_v0 = vadd.f32 %v5014_v9, %v5013_v62 }
0x1a39   : > { %v5016_v16 = vrot.slane %v5015_v0, 1 }
0x1a3b   : > { %v5017_v60 = vadd.f32 %v5016_v16, %v5015_v0 }
0x1a3d   : > { %v5018_v44 = vmul.f32 0.03125, %v5017_v60 }
0x1a3f   : > { %v5019_v55 = vadd.f32 1e-05, %v5018_v44 }
0x1a41   : > { %6220 = vrsqrt.f32 %v5019_v55 }
0x1a4b   : > { %v6221_v18 = vpop.eup %6220 }
0x1a4c   : > { %v5024_v13 = vmul.f32 %v6221_v18, %v5000_v49  ;;  %v5021_v20 = vmul.f32 %v6221_v18, %v4997_v52  ;;  %v5022_v1 = vmul.f32 %v6221_v18, %v4998_v29  ;;  %v5023_v47 = vmul.f32 %v6221_v18, %v4999_v38 }
0x1a4e   : > { %v5050_v53 = vmul.f32 %v5033_v59, %v5021_v20  ;;  %v5051_v24 = vmul.f32 %v5038_v17, %v5022_v1  ;;  %v5052_v31 = vmul.f32 %v5043_v21, %v5023_v47  ;;  %v5053_v33 = vmul.f32 %v5048_v32, %v5024_v13 }
0x1a50   : > { %v5079_v23 = vadd.f32 %v5062_v19, %v5050_v53  ;;  %v5080_v14 = vadd.f32 %v5067_v7, %v5051_v24  ;;  %v5081_v34 = vadd.f32 %v5072_v41, %v5052_v31  ;;  %v5082_v8 = vadd.f32 %v5077_v35, %v5053_v33 }
0x1a52   : > { %5083 = vxpose.xlu1.b32.start [1/4] (short) (narrow) %v5079_v23, 24 }
0x1a56   : > { %5084 = vxpose.xlu1.b32.cont [2/4] (short) (narrow) %v5080_v14, 24 }
0x1a5a   : > { %5085 = vxpose.xlu1.b32.cont [3/4] (short) (narrow) %v5081_v34, 24 }
0x1a5e   : > { %5086 = vxpose.xlu1.b32.end [4/4] (short) (narrow) %v5082_v8, 24 }
0x1ad2   : > { %v5099_v61 = vpop.trf.xlu1 }
0x1ad3   : > { %5115 = vst.msk [vmem:[%s421_s15] sm:$0xff] %vm444_vm0, %v5099_v61 }
0x1ad6   : > { %v5100_v45 = vpop.trf.xlu1 }
0x1ad7   : > { %5116 = vst.msk [vmem:[%s421_s15 + $0x8] sm:$0xff] %vm444_vm0, %v5100_v45 }
0x1ada   : > { %v5101_v36 = vpop.trf.xlu1 }
0x1adb   : > { %5117 = vst.msk [vmem:[%s421_s15 + $0x10] sm:$0xff] %vm444_vm0, %v5101_v36 }
0x1adc   : > { %6235 = shalt.err (!%p6232_p3)
}
0x1add   : > { %s6236_s20 = scalar_lea.hbm %s7405_s17, 384  ;;  %s6240_s15 = scalar_lea.hbm %s7462_s12, 768 }
0x1ade   : > { %p6237_p4 = scmp.ne.s32.totalorder %s7405_s17, %s6236_s20  ;;  %p6241_p9 = scmp.lt.u32.totalorder %s7405_s17, %s7462_s12 }
0x1adf   : > { %p6242_p10 = scmp.lt.u32.totalorder %s6240_s15, %s6236_s20  ;;  %p6244_p12 = scmp.lt.u32.totalorder %s6236_s20, %s7405_s17 }
0x1ae0   : > { %p6238_p7 = pnand %p6237_p4, %p6396_p5 }
0x1ae1   : > { %p6243_p11 = por %p6242_p10, %p6241_p9 }
0x1ae2   : > { %p6239_p8 = pneg %p6238_p7 }
0x1ae3   : > { %p6245_p13 = por %p6244_p12, %p6243_p11 }
0x1ae5   : > { %p6246_p0 = pnand %p6245_p13, %p6239_p8 }
0x1ae7   : > { %6249 = shalt.err (!%p6246_p0)
}
0x1ae8   : > { %s6292_s30 = smov 128  }
0x1ae9   : > { %6065 = dma.vmem_to_hbm [thread:$0]  (%p6396_p5), %s7400_s16, 384, %s7405_s17, %s7408_s27, %s6292_s30, %s6292_s30, %s6290_s28  }
0x1aea PF: > { %s7479_s14 = sld [smem:[#allocation5_spill]]  ;;  %p6071_p1 = scmp.ge.s32.totalorder %s6284_s24, 2 }
0x1aec   : > { %p6068_p2 = pnand %p6071_p1, %p6400_p6 }
0x1af0   : > { %s5147_s21 = sand.u32 1, %s7479_s14  }
0x1af1   : > { %s5148_s23 = scalar_lea.sflag [#allocation3], %s5147_s21 }
0x1af2   : > { %6267 = dma.done.wait (!%p6068_p2), %s5148_s23, 384  }
0x1af3   : > { %6269 = vsyncadd (!%p6068_p2), %s5148_s23, 4294966912  ;;  %s7481_s24 = sld [smem:[#allocation7_spill]]  ;;  %s7482_s20 = sld [smem:[#allocation6_spill]] }
0x1af4   : > { %s7483_s23 = sld [smem:[#allocation8_spill]]  ;;  %s7484_s21 = smov %s6276_s22 }
0x1af9   : > { %p22_p3 = scmp.ge.s32.totalorder %s7481_s24, 4   ;;  %s7485_s22 = smov %s7482_s20 }
0x1afb   :  { %24 = sbr.rel (!%p22_p3) target bundleno = 3 (0x3), region = 114 }
0x1b02   :  { %5153 = vsyncpa [#allocation3], 1 }
0x1b03   :  { %5155 = vsyncpa [#allocation3 + $0x1], 1 }

</bundles_post_ra>
